<compile_context>
chip_gen: v6e
topology: v6e:2x2x1
jax: 0.10.0
libtpu: 0.0.40
codegen_flags: <defaults>
</compile_context>

<pallas_src>
import numpy as np
import jax
import jax.numpy as jnp
from jax.experimental import pallas as pl
from jax.experimental.pallas import tpu as pltpu

EPS_BN = 1e-5
EPS_LN = 1e-5


def _rup(v, m):
    return ((v + m - 1) // m) * m


# ----------------------------------------------------------------------------
# Fused kernel factory (all sizes are static Python ints)
# ----------------------------------------------------------------------------
def _make_fcn_kernel(W, Wo, n_valid, valid_rows, R1, M2C, R2, M3C):

    def kernel(xcol_ref, w1_ref, s1_ref, b1_ref,
               w2_ref, s2_ref, b2_ref,
               w3_ref, s3_ref, b3_ref,
               ln_g_ref, ln_b_ref, lin_w_ref, lin_b_ref,
               logits_ref, cam_ref,
               stage1_ref, h1_ref, stage2_ref, h2_ref):

        def shift_copies(stage_ref, h_ref, rows):
            # h_ref[dx, p, :] = act[p + dx] in bf16.  One f32->bf16 convert per
            # dx (3 total) instead of one per tap (9), and every later tap load
            # becomes a 16-row-aligned bf16 load (bf16 packs 2 rows / sublane).
            for dx in range(3):
                h_ref[dx] = stage_ref[dx:dx + rows, :].astype(h_ref.dtype)

        def conv3x3(src_ref, w_ref, s_ref, b_ref, m):
            # 3x3 "valid" conv over the flattened spatial axis + folded BN + ReLU.
            # Output row p, tap (dy, dx) needs act[p + dy*W + dx] == src_ref[dx, p + dy*W, :];
            # dy*W is a multiple of 16, so all loads are tile-aligned.
            cout = w_ref.shape[-1]
            acc = jnp.zeros((m, cout), jnp.float32)
            for dy in range(3):
                for dx in range(3):
                    acc = acc + jnp.dot(src_ref[dx, dy * W:dy * W + m, :],
                                        w_ref[dy * 3 + dx],
                                        preferred_element_type=jnp.float32)
            return jnp.maximum(acc * s_ref[...] + b_ref[...], 0.0)

        # ---- conv1: ONE im2col matmul (K = 9 * cin_pad) + folded BN + ReLU ----
        y1 = jnp.dot(xcol_ref[0], w1_ref[...], preferred_element_type=jnp.float32)
        stage1_ref[...] = jnp.maximum(y1 * s1_ref[...] + b1_ref[...], 0.0)
        shift_copies(stage1_ref, h1_ref, R1)

        # ---- conv2 ----
        stage2_ref[...] = conv3x3(h1_ref, w2_ref, s2_ref, b2_ref, M2C)
        shift_copies(stage2_ref, h2_ref, R2)

        # ---- conv3 (CAM features), kept in f32 ----
        y3 = conv3x3(h2_ref, w3_ref, s3_ref, b3_ref, M3C)       # (M3C, C3)
        cam_ref[0] = y3                                         # lane-dense, sublane-aligned slab

        # ---- global average pool over the Ho*Wo valid flat rows (mask built in-kernel) ----
        rows = jax.lax.broadcasted_iota(jnp.int32, (M3C, 1), 0)
        mask = jnp.logical_and(rows % W < Wo, rows < valid_rows).astype(jnp.float32)
        pooled = jnp.sum(y3 * mask, axis=0, keepdims=True) * (1.0 / n_valid)

        # ---- LayerNorm over channels ----
        mu = jnp.mean(pooled, axis=-1, keepdims=True)
        var = jnp.mean(jnp.square(pooled - mu), axis=-1, keepdims=True)
        xn = (pooled - mu) * jax.lax.rsqrt(var + EPS_LN)
        xn = xn * ln_g_ref[...] + ln_b_ref[...]

        # ---- Linear head (padded to 128 output lanes -> unmasked store) ----
        logits = jnp.dot(xn.astype(jnp.bfloat16), lin_w_ref[...],
                         preferred_element_type=jnp.float32) + lin_b_ref[...]
        logits_ref[0] = logits

    return kernel


def _fold_bn(gamma, beta, conv_bias):
    # eval-mode BN (running_mean=0, running_var=1) folded with the conv bias
    scale = gamma / jnp.sqrt(1.0 + EPS_BN)
    bias = beta + conv_bias * scale
    return (scale.reshape(1, -1).astype(jnp.float32),
            bias.reshape(1, -1).astype(jnp.float32))


# ----------------------------------------------------------------------------
# Forward (Pallas)
# ----------------------------------------------------------------------------
def fcn_forward(params, x_nchw):
    B, Cin, H, W = x_nchw.shape
    C1 = params["w1"].shape[-1]
    C2 = params["w2"].shape[-1]
    C3 = params["w3"].shape[-1]
    NC = params["lin_w"].shape[1]
    Ho, Wo = H - 6, W - 6
    n_valid = Ho * Wo

    # ---- static, sublane/packing-aligned row plan (16->256/240/208/192/160) ----
    M3C = _rup(Ho * W, 8)          # conv3 rows computed / CAM slab rows
    R2 = _rup(2 * W + M3C, 16)     # rows per dx-shifted bf16 copy of act2
    M2C = _rup(R2 + 2, 16)         # conv2 rows computed
    R1 = _rup(2 * W + M2C, 16)     # rows per dx-shifted bf16 copy of act1
    M1C = _rup(R1 + 2, 16)         # conv1 rows computed (= im2col rows)
    NCP = _rup(max(NC, 128), 128)  # lane-dense logits width
    # in-bounds / "junk never feeds a valid row" geometry (see header comment)
    assert R1 >= 2 * W + M2C and M1C >= R1 + 2
    assert R2 >= 2 * W + M3C and M2C >= R2 + 2
    assert M3C >= Ho * W and H >= 7 and W >= 7

    # ---- host-side layout plumbing (free): NCHW->NHWC, flatten, im2col for conv1 ----
    x = jnp.transpose(x_nchw, (0, 2, 3, 1)).astype(jnp.float32)
    cin_pad = _rup(max(Cin, 1), 8)
    if cin_pad != Cin:
        x = jnp.pad(x, ((0, 0), (0, 0), (0, 0), (0, cin_pad - Cin)))
    x_flat = x.reshape(B, H * W, cin_pad)
    pad_rows = M1C + 2 * W + 2 - H * W
    if pad_rows > 0:
        x_flat = jnp.pad(x_flat, ((0, 0), (0, pad_rows), (0, 0)))
    offs = [dy * W + dx for dy in range(3) for dx in range(3)]
    x_col = jnp.concatenate([x_flat[:, o:o + M1C, :] for o in offs],
                            axis=-1).astype(jnp.bfloat16)          # (B, M1C, 9*cin_pad)
    K1 = 9 * cin_pad

    w1 = params["w1"]
    if cin_pad != Cin:
        w1 = jnp.pad(w1, ((0, 0), (0, 0), (0, cin_pad - Cin), (0, 0)))
    w1_col = w1.reshape(K1, C1).astype(jnp.bfloat16)                # (9*cin_pad, C1)
    w2 = params["w2"].reshape(9, C1, C2).astype(jnp.bfloat16)
    w3 = params["w3"].reshape(9, C2, C3).astype(jnp.bfloat16)

    s1, b1 = _fold_bn(params["gamma1"], params["beta1"], params["b1"])
    s2, b2 = _fold_bn(params["gamma2"], params["beta2"], params["b2"])
    s3, b3 = _fold_bn(params["gamma3"], params["beta3"], params["b3"])

    ln_g = params["ln_gamma"].reshape(1, C3).astype(jnp.float32)
    ln_b = params["ln_beta"].reshape(1, C3).astype(jnp.float32)
    lin_w = jnp.pad(params["lin_w"], ((0, 0), (0, NCP - NC))).astype(jnp.bfloat16)
    lin_b = jnp.pad(params["lin_b"], (0, NCP - NC)).reshape(1, NCP).astype(jnp.float32)

    kernel = _make_fcn_kernel(W, Wo, n_valid, Ho * W, R1, M2C, R2, M3C)

    def full(shape):
        n = len(shape)
        return pl.BlockSpec(shape, lambda b, _n=n: (0,) * _n)

    logits_p, cam_flat = pl.pallas_call(
        kernel,
        out_shape=(jax.ShapeDtypeStruct((B, 1, NCP), jnp.float32),
                   jax.ShapeDtypeStruct((B, M3C, C3), jnp.float32)),
        grid=(B,),
        in_specs=[
            pl.BlockSpec((1, M1C, K1), lambda b: (b, 0, 0)),        # per-sample im2col
            full((K1, C1)), full((1, C1)), full((1, C1)),
            full((9, C1, C2)), full((1, C2)), full((1, C2)),
            full((9, C2, C3)), full((1, C3)), full((1, C3)),
            full((1, C3)), full((1, C3)),
            full((C3, NCP)), full((1, NCP)),
        ],
        out_specs=(
            pl.BlockSpec((1, 1, NCP), lambda b: (b, 0, 0)),
            pl.BlockSpec((1, M3C, C3), lambda b: (b, 0, 0)),
        ),
        scratch_shapes=[
            pltpu.VMEM((M1C, C1), jnp.float32),      # f32 act1 staging
            pltpu.VMEM((3, R1, C1), jnp.bfloat16),   # dx-shifted bf16 act1 copies
            pltpu.VMEM((M2C, C2), jnp.float32),      # f32 act2 staging
            pltpu.VMEM((3, R2, C2), jnp.bfloat16),   # dx-shifted bf16 act2 copies
        ],
        compiler_params=pltpu.CompilerParams(
            dimension_semantics=("parallel",)),      # batch across the 2 TCs on v7x
    )(x_col, w1_col, s1, b1, w2, s2, b2, w3, s3, b3,
      ln_g, ln_b, lin_w, lin_b)

    logits = logits_p[:, 0, :NC]

    # ----- wrapper-side un-flattening of the CAM feature map (free) -----
    cam_nhwc = cam_flat[:, :Ho * W, :].reshape(B, Ho, W, C3)[:, :, :Wo, :]
    cam = jnp.transpose(cam_nhwc, (0, 3, 1, 2))                    # back to NCHW
    return logits, cam


# ----------------------------------------------------------------------------
# Parameter init (deterministic, synthetic)
# ----------------------------------------------------------------------------
def init_params(key, in_channels, num_classes):
    ks = jax.random.split(key, 20)

    def conv_w(k, cin, cout):
        return jax.random.normal(k, (3, 3, cin, cout), jnp.float32) / np.sqrt(9.0 * cin)

    p = {}
    cins = [in_channels, 64, 128]
    couts = [64, 128, 128]
    i = 0
    for layer, (cin, cout) in enumerate(zip(cins, couts), start=1):
        p[f"w{layer}"] = conv_w(ks[i], cin, cout); i += 1
        p[f"b{layer}"] = 0.05 * jax.random.normal(ks[i], (cout,), jnp.float32); i += 1
        p[f"gamma{layer}"] = 1.0 + 0.1 * jax.random.normal(ks[i], (cout,), jnp.float32); i += 1
        p[f"beta{layer}"] = 0.1 * jax.random.normal(ks[i], (cout,), jnp.float32); i += 1
    p["ln_gamma"] = 1.0 + 0.1 * jax.random.normal(ks[i], (128,), jnp.float32); i += 1
    p["ln_beta"] = 0.1 * jax.random.normal(ks[i], (128,), jnp.float32); i += 1
    p["lin_w"] = jax.random.normal(ks[i], (128, num_classes), jnp.float32) / np.sqrt(128.0); i += 1
    p["lin_b"] = 0.05 * jax.random.normal(ks[i], (num_classes,), jnp.float32)
    return p


# ----------------------------------------------------------------------------
# Pure-JAX reference (same bf16-input / f32-accumulate matmul precision)
# ----------------------------------------------------------------------------
def fcn_reference(params, x_nchw):
    x = jnp.transpose(x_nchw, (0, 2, 3, 1))
    h = x
    for layer in (1, 2, 3):
        w = params[f"w{layer}"].astype(jnp.bfloat16)
        y = jax.lax.conv_general_dilated(
            h.astype(jnp.bfloat16), w, (1, 1), "VALID",
            dimension_numbers=("NHWC", "HWIO", "NHWC"),
            preferred_element_type=jnp.float32)
        scale = params[f"gamma{layer}"] / jnp.sqrt(1.0 + EPS_BN)
        bias = params[f"beta{layer}"] + params[f"b{layer}"] * scale
        h = jnp.maximum(y * scale + bias, 0.0)
    cam_data = jnp.transpose(h, (0, 3, 1, 2))
    pooled = jnp.mean(h, axis=(1, 2))
    mu = jnp.mean(pooled, axis=-1, keepdims=True)
    var = jnp.mean(jnp.square(pooled - mu), axis=-1, keepdims=True)
    xn = (pooled - mu) * jax.lax.rsqrt(var + EPS_LN)
    xn = xn * params["ln_gamma"] + params["ln_beta"]
    logits = jnp.dot(xn.astype(jnp.bfloat16), params["lin_w"].astype(jnp.bfloat16),
                     preferred_element_type=jnp.float32) + params["lin_b"]
    return logits, cam_data


if __name__ == "__main__":
    B, IN_CH, H, W = 2, 4, 16, 16
    NUM_CLASSES = 10

    key = jax.random.PRNGKey(0)
    k_x, k_p = jax.random.split(key)
    x = jax.random.normal(k_x, (B, IN_CH, H, W), jnp.float32)      # NCHW like PyTorch
    params = init_params(k_p, IN_CH, NUM_CLASSES)

    fwd = jax.jit(fcn_forward)
    logits, cam = jax.block_until_ready(fwd(params, x))
    ref_logits, ref_cam = jax.block_until_ready(jax.jit(fcn_reference)(params, x))

    assert logits.shape == (B, NUM_CLASSES)
    assert cam.shape == (B, 128, H - 6, W - 6)                     # 16 -> 14 -> 12 -> 10
    np.testing.assert_allclose(np.asarray(logits), np.asarray(ref_logits),
                               rtol=1e-2, atol=1e-2)
    np.testing.assert_allclose(np.asarray(cam), np.asarray(ref_cam),
                               rtol=1e-2, atol=1e-2)
    print("KERNEL_OK")
</pallas_src>

<mosaic_0001>
module attributes {stable_mosaic.version = 11 : i64} {
  func.func @kernel(%arg0: i32, %arg1: memref<1x256x72xbf16, #tpu.memory_space<vmem>>, %arg2: memref<72x64xbf16, #tpu.memory_space<vmem>>, %arg3: memref<1x64xf32, #tpu.memory_space<vmem>>, %arg4: memref<1x64xf32, #tpu.memory_space<vmem>>, %arg5: memref<9x64x128xbf16, #tpu.memory_space<vmem>>, %arg6: memref<1x128xf32, #tpu.memory_space<vmem>>, %arg7: memref<1x128xf32, #tpu.memory_space<vmem>>, %arg8: memref<9x128x128xbf16, #tpu.memory_space<vmem>>, %arg9: memref<1x128xf32, #tpu.memory_space<vmem>>, %arg10: memref<1x128xf32, #tpu.memory_space<vmem>>, %arg11: memref<1x128xf32, #tpu.memory_space<vmem>>, %arg12: memref<1x128xf32, #tpu.memory_space<vmem>>, %arg13: memref<128x128xbf16, #tpu.memory_space<vmem>>, %arg14: memref<1x128xf32, #tpu.memory_space<vmem>>, %arg15: memref<1x1x128xf32, #tpu.memory_space<vmem>>, %arg16: memref<1x160x128xf32, #tpu.memory_space<vmem>>, %arg17: memref<256x64xf32, #tpu.memory_space<vmem>>, %arg18: memref<3x240x64xbf16, #tpu.memory_space<vmem>>, %arg19: memref<208x128xf32, #tpu.memory_space<vmem>>, %arg20: memref<3x192x128xbf16, #tpu.memory_space<vmem>>) attributes {dimension_semantics = [#tpu.dimension_semantics<parallel>], iteration_bounds = array<i64: 2>, scalar_prefetch = 0 : i64, scratch_operands = 4 : i64, tpu.core_type = #tpu.core_type<tc>, window_params = [{transform_indices = @transform_0, window_bounds = array<i64: 1, 256, 72>}, {pipeline_mode = #tpu.pipeline_mode<synchronous>, transform_indices = @transform_1, window_bounds = array<i64: 72, 64>}, {pipeline_mode = #tpu.pipeline_mode<synchronous>, transform_indices = @transform_2, window_bounds = array<i64: 1, 64>}, {pipeline_mode = #tpu.pipeline_mode<synchronous>, transform_indices = @transform_3, window_bounds = array<i64: 1, 64>}, {pipeline_mode = #tpu.pipeline_mode<synchronous>, transform_indices = @transform_4, window_bounds = array<i64: 9, 64, 128>}, {pipeline_mode = #tpu.pipeline_mode<synchronous>, transform_indices = @transform_5, window_bounds = array<i64: 1, 128>}, {pipeline_mode = #tpu.pipeline_mode<synchronous>, transform_indices = @transform_6, window_bounds = array<i64: 1, 128>}, {pipeline_mode = #tpu.pipeline_mode<synchronous>, transform_indices = @transform_7, window_bounds = array<i64: 9, 128, 128>}, {pipeline_mode = #tpu.pipeline_mode<synchronous>, transform_indices = @transform_8, window_bounds = array<i64: 1, 128>}, {pipeline_mode = #tpu.pipeline_mode<synchronous>, transform_indices = @transform_9, window_bounds = array<i64: 1, 128>}, {pipeline_mode = #tpu.pipeline_mode<synchronous>, transform_indices = @transform_10, window_bounds = array<i64: 1, 128>}, {pipeline_mode = #tpu.pipeline_mode<synchronous>, transform_indices = @transform_11, window_bounds = array<i64: 1, 128>}, {pipeline_mode = #tpu.pipeline_mode<synchronous>, transform_indices = @transform_12, window_bounds = array<i64: 128, 128>}, {pipeline_mode = #tpu.pipeline_mode<synchronous>, transform_indices = @transform_13, window_bounds = array<i64: 1, 128>}, {transform_indices = @transform_14, window_bounds = array<i64: 1, 1, 128>}, {transform_indices = @transform_15, window_bounds = array<i64: 1, 160, 128>}]} {
    %c0 = arith.constant 0 : index
    %c0_0 = arith.constant 0 : index
    %c0_1 = arith.constant 0 : index
    %0 = vector.load %arg1[%c0, %c0_0, %c0_1] : memref<1x256x72xbf16, #tpu.memory_space<vmem>>, vector<1x256x72xbf16>
    %1 = vector.shape_cast %0 : vector<1x256x72xbf16> to vector<256x72xbf16>
    %c0_2 = arith.constant 0 : index
    %c0_3 = arith.constant 0 : index
    %2 = vector.load %arg2[%c0_2, %c0_3] : memref<72x64xbf16, #tpu.memory_space<vmem>>, vector<72x64xbf16>
    %cst = arith.constant dense<0.000000e+00> : vector<256x64xf32>
    %3 = tpu.matmul %1, %2, %cst {dimension_numbers = #tpu.dot_dimension_numbers<[1], [0], [0], [1], [0, 0, 1, 1], [], []>} : vector<256x72xbf16>, vector<72x64xbf16>, vector<256x64xf32> -> vector<256x64xf32>
    %c0_4 = arith.constant 0 : index
    %c0_5 = arith.constant 0 : index
    %4 = vector.load %arg3[%c0_4, %c0_5] : memref<1x64xf32, #tpu.memory_space<vmem>>, vector<1x64xf32>
    %5 = vector.broadcast %4 : vector<1x64xf32> to vector<256x64xf32>
    %6 = arith.mulf %3, %5 : vector<256x64xf32>
    %c0_6 = arith.constant 0 : index
    %c0_7 = arith.constant 0 : index
    %7 = vector.load %arg4[%c0_6, %c0_7] : memref<1x64xf32, #tpu.memory_space<vmem>>, vector<1x64xf32>
    %8 = vector.broadcast %7 : vector<1x64xf32> to vector<256x64xf32>
    %9 = arith.addf %6, %8 : vector<256x64xf32>
    %cst_8 = arith.constant 0.000000e+00 : f32
    %10 = vector.broadcast %cst_8 : f32 to vector<256x64xf32>
    %11 = arith.maximumf %9, %10 : vector<256x64xf32>
    %c0_9 = arith.constant 0 : index
    %c0_10 = arith.constant 0 : index
    %12 = vector.load %arg17[%c0_9, %c0_10] : memref<256x64xf32, #tpu.memory_space<vmem>>, vector<256x64xf32>
    tpu.vector_store %arg17[%c0_9, %c0_10], %11 {strides = array<i32>} : memref<256x64xf32, #tpu.memory_space<vmem>>, vector<256x64xf32>,
    %c0_11 = arith.constant 0 : index
    %c0_12 = arith.constant 0 : index
    %13 = vector.load %arg17[%c0_11, %c0_12] : memref<256x64xf32, #tpu.memory_space<vmem>>, vector<240x64xf32>
    %14 = arith.truncf %13 : vector<240x64xf32> to vector<240x64xbf16>
    %c0_13 = arith.constant 0 : index
    %c0_14 = arith.constant 0 : index
    %c0_15 = arith.constant 0 : index
    %15 = vector.load %arg18[%c0_13, %c0_14, %c0_15] : memref<3x240x64xbf16, #tpu.memory_space<vmem>>, vector<1x240x64xbf16>
    %16 = vector.shape_cast %15 : vector<1x240x64xbf16> to vector<240x64xbf16>
    %17 = vector.shape_cast %14 : vector<240x64xbf16> to vector<1x240x64xbf16>
    tpu.vector_store %arg18[%c0_13, %c0_14, %c0_15], %17 {strides = array<i32>} : memref<3x240x64xbf16, #tpu.memory_space<vmem>>, vector<1x240x64xbf16>,
    %c1 = arith.constant 1 : index
    %c0_16 = arith.constant 0 : index
    %18 = vector.load %arg17[%c1, %c0_16] : memref<256x64xf32, #tpu.memory_space<vmem>>, vector<240x64xf32>
    %19 = arith.truncf %18 : vector<240x64xf32> to vector<240x64xbf16>
    %c1_17 = arith.constant 1 : index
    %c0_18 = arith.constant 0 : index
    %c0_19 = arith.constant 0 : index
    %20 = vector.load %arg18[%c1_17, %c0_18, %c0_19] : memref<3x240x64xbf16, #tpu.memory_space<vmem>>, vector<1x240x64xbf16>
    %21 = vector.shape_cast %20 : vector<1x240x64xbf16> to vector<240x64xbf16>
    %22 = vector.shape_cast %19 : vector<240x64xbf16> to vector<1x240x64xbf16>
    tpu.vector_store %arg18[%c1_17, %c0_18, %c0_19], %22 {strides = array<i32>} : memref<3x240x64xbf16, #tpu.memory_space<vmem>>, vector<1x240x64xbf16>,
    %c2 = arith.constant 2 : index
    %c0_20 = arith.constant 0 : index
    %23 = vector.load %arg17[%c2, %c0_20] : memref<256x64xf32, #tpu.memory_space<vmem>>, vector<240x64xf32>
    %24 = arith.truncf %23 : vector<240x64xf32> to vector<240x64xbf16>
    %c2_21 = arith.constant 2 : index
    %c0_22 = arith.constant 0 : index
    %c0_23 = arith.constant 0 : index
    %25 = vector.load %arg18[%c2_21, %c0_22, %c0_23] : memref<3x240x64xbf16, #tpu.memory_space<vmem>>, vector<1x240x64xbf16>
    %26 = vector.shape_cast %25 : vector<1x240x64xbf16> to vector<240x64xbf16>
    %27 = vector.shape_cast %24 : vector<240x64xbf16> to vector<1x240x64xbf16>
    tpu.vector_store %arg18[%c2_21, %c0_22, %c0_23], %27 {strides = array<i32>} : memref<3x240x64xbf16, #tpu.memory_space<vmem>>, vector<1x240x64xbf16>,
    %cst_24 = arith.constant 0.000000e+00 : f32
    %28 = vector.broadcast %cst_24 : f32 to vector<208x128xf32>
    %c0_25 = arith.constant 0 : index
    %c0_26 = arith.constant 0 : index
    %c0_27 = arith.constant 0 : index
    %29 = vector.load %arg18[%c0_25, %c0_26, %c0_27] : memref<3x240x64xbf16, #tpu.memory_space<vmem>>, vector<1x208x64xbf16>
    %30 = vector.shape_cast %29 : vector<1x208x64xbf16> to vector<208x64xbf16>
    %c0_28 = arith.constant 0 : index
    %c0_29 = arith.constant 0 : index
    %c0_30 = arith.constant 0 : index
    %31 = vector.load %arg5[%c0_28, %c0_29, %c0_30] : memref<9x64x128xbf16, #tpu.memory_space<vmem>>, vector<1x64x128xbf16>
    %32 = vector.shape_cast %31 : vector<1x64x128xbf16> to vector<64x128xbf16>
    %cst_31 = arith.constant dense<0.000000e+00> : vector<208x128xf32>
    %33 = tpu.matmul %30, %32, %cst_31 {dimension_numbers = #tpu.dot_dimension_numbers<[1], [0], [0], [1], [0, 0, 1, 1], [], []>} : vector<208x64xbf16>, vector<64x128xbf16>, vector<208x128xf32> -> vector<208x128xf32>
    %34 = arith.addf %28, %33 : vector<208x128xf32>
    %c1_32 = arith.constant 1 : index
    %c0_33 = arith.constant 0 : index
    %c0_34 = arith.constant 0 : index
    %35 = vector.load %arg18[%c1_32, %c0_33, %c0_34] : memref<3x240x64xbf16, #tpu.memory_space<vmem>>, vector<1x208x64xbf16>
    %36 = vector.shape_cast %35 : vector<1x208x64xbf16> to vector<208x64xbf16>
    %c1_35 = arith.constant 1 : index
    %c0_36 = arith.constant 0 : index
    %c0_37 = arith.constant 0 : index
    %37 = vector.load %arg5[%c1_35, %c0_36, %c0_37] : memref<9x64x128xbf16, #tpu.memory_space<vmem>>, vector<1x64x128xbf16>
    %38 = vector.shape_cast %37 : vector<1x64x128xbf16> to vector<64x128xbf16>
    %cst_38 = arith.constant dense<0.000000e+00> : vector<208x128xf32>
    %39 = tpu.matmul %36, %38, %cst_38 {dimension_numbers = #tpu.dot_dimension_numbers<[1], [0], [0], [1], [0, 0, 1, 1], [], []>} : vector<208x64xbf16>, vector<64x128xbf16>, vector<208x128xf32> -> vector<208x128xf32>
    %40 = arith.addf %34, %39 : vector<208x128xf32>
    %c2_39 = arith.constant 2 : index
    %c0_40 = arith.constant 0 : index
    %c0_41 = arith.constant 0 : index
    %41 = vector.load %arg18[%c2_39, %c0_40, %c0_41] : memref<3x240x64xbf16, #tpu.memory_space<vmem>>, vector<1x208x64xbf16>
    %42 = vector.shape_cast %41 : vector<1x208x64xbf16> to vector<208x64xbf16>
    %c2_42 = arith.constant 2 : index
    %c0_43 = arith.constant 0 : index
    %c0_44 = arith.constant 0 : index
    %43 = vector.load %arg5[%c2_42, %c0_43, %c0_44] : memref<9x64x128xbf16, #tpu.memory_space<vmem>>, vector<1x64x128xbf16>
    %44 = vector.shape_cast %43 : vector<1x64x128xbf16> to vector<64x128xbf16>
    %cst_45 = arith.constant dense<0.000000e+00> : vector<208x128xf32>
    %45 = tpu.matmul %42, %44, %cst_45 {dimension_numbers = #tpu.dot_dimension_numbers<[1], [0], [0], [1], [0, 0, 1, 1], [], []>} : vector<208x64xbf16>, vector<64x128xbf16>, vector<208x128xf32> -> vector<208x128xf32>
    %46 = arith.addf %40, %45 : vector<208x128xf32>
    %c0_46 = arith.constant 0 : index
    %c16 = arith.constant 16 : index
    %c0_47 = arith.constant 0 : index
    %47 = vector.load %arg18[%c0_46, %c16, %c0_47] : memref<3x240x64xbf16, #tpu.memory_space<vmem>>, vector<1x208x64xbf16>
    %48 = vector.shape_cast %47 : vector<1x208x64xbf16> to vector<208x64xbf16>
    %c3 = arith.constant 3 : index
    %c0_48 = arith.constant 0 : index
    %c0_49 = arith.constant 0 : index
    %49 = vector.load %arg5[%c3, %c0_48, %c0_49] : memref<9x64x128xbf16, #tpu.memory_space<vmem>>, vector<1x64x128xbf16>
    %50 = vector.shape_cast %49 : vector<1x64x128xbf16> to vector<64x128xbf16>
    %cst_50 = arith.constant dense<0.000000e+00> : vector<208x128xf32>
    %51 = tpu.matmul %48, %50, %cst_50 {dimension_numbers = #tpu.dot_dimension_numbers<[1], [0], [0], [1], [0, 0, 1, 1], [], []>} : vector<208x64xbf16>, vector<64x128xbf16>, vector<208x128xf32> -> vector<208x128xf32>
    %52 = arith.addf %46, %51 : vector<208x128xf32>
    %c1_51 = arith.constant 1 : index
    %c16_52 = arith.constant 16 : index
    %c0_53 = arith.constant 0 : index
    %53 = vector.load %arg18[%c1_51, %c16_52, %c0_53] : memref<3x240x64xbf16, #tpu.memory_space<vmem>>, vector<1x208x64xbf16>
    %54 = vector.shape_cast %53 : vector<1x208x64xbf16> to vector<208x64xbf16>
    %c4 = arith.constant 4 : index
    %c0_54 = arith.constant 0 : index
    %c0_55 = arith.constant 0 : index
    %55 = vector.load %arg5[%c4, %c0_54, %c0_55] : memref<9x64x128xbf16, #tpu.memory_space<vmem>>, vector<1x64x128xbf16>
    %56 = vector.shape_cast %55 : vector<1x64x128xbf16> to vector<64x128xbf16>
    %cst_56 = arith.constant dense<0.000000e+00> : vector<208x128xf32>
    %57 = tpu.matmul %54, %56, %cst_56 {dimension_numbers = #tpu.dot_dimension_numbers<[1], [0], [0], [1], [0, 0, 1, 1], [], []>} : vector<208x64xbf16>, vector<64x128xbf16>, vector<208x128xf32> -> vector<208x128xf32>
    %58 = arith.addf %52, %57 : vector<208x128xf32>
    %c2_57 = arith.constant 2 : index
    %c16_58 = arith.constant 16 : index
    %c0_59 = arith.constant 0 : index
    %59 = vector.load %arg18[%c2_57, %c16_58, %c0_59] : memref<3x240x64xbf16, #tpu.memory_space<vmem>>, vector<1x208x64xbf16>
    %60 = vector.shape_cast %59 : vector<1x208x64xbf16> to vector<208x64xbf16>
    %c5 = arith.constant 5 : index
    %c0_60 = arith.constant 0 : index
    %c0_61 = arith.constant 0 : index
    %61 = vector.load %arg5[%c5, %c0_60, %c0_61] : memref<9x64x128xbf16, #tpu.memory_space<vmem>>, vector<1x64x128xbf16>
    %62 = vector.shape_cast %61 : vector<1x64x128xbf16> to vector<64x128xbf16>
    %cst_62 = arith.constant dense<0.000000e+00> : vector<208x128xf32>
    %63 = tpu.matmul %60, %62, %cst_62 {dimension_numbers = #tpu.dot_dimension_numbers<[1], [0], [0], [1], [0, 0, 1, 1], [], []>} : vector<208x64xbf16>, vector<64x128xbf16>, vector<208x128xf32> -> vector<208x128xf32>
    %64 = arith.addf %58, %63 : vector<208x128xf32>
    %c0_63 = arith.constant 0 : index
    %c32 = arith.constant 32 : index
    %c0_64 = arith.constant 0 : index
    %65 = vector.load %arg18[%c0_63, %c32, %c0_64] : memref<3x240x64xbf16, #tpu.memory_space<vmem>>, vector<1x208x64xbf16>
    %66 = vector.shape_cast %65 : vector<1x208x64xbf16> to vector<208x64xbf16>
    %c6 = arith.constant 6 : index
    %c0_65 = arith.constant 0 : index
    %c0_66 = arith.constant 0 : index
    %67 = vector.load %arg5[%c6, %c0_65, %c0_66] : memref<9x64x128xbf16, #tpu.memory_space<vmem>>, vector<1x64x128xbf16>
    %68 = vector.shape_cast %67 : vector<1x64x128xbf16> to vector<64x128xbf16>
    %cst_67 = arith.constant dense<0.000000e+00> : vector<208x128xf32>
    %69 = tpu.matmul %66, %68, %cst_67 {dimension_numbers = #tpu.dot_dimension_numbers<[1], [0], [0], [1], [0, 0, 1, 1], [], []>} : vector<208x64xbf16>, vector<64x128xbf16>, vector<208x128xf32> -> vector<208x128xf32>
    %70 = arith.addf %64, %69 : vector<208x128xf32>
    %c1_68 = arith.constant 1 : index
    %c32_69 = arith.constant 32 : index
    %c0_70 = arith.constant 0 : index
    %71 = vector.load %arg18[%c1_68, %c32_69, %c0_70] : memref<3x240x64xbf16, #tpu.memory_space<vmem>>, vector<1x208x64xbf16>
    %72 = vector.shape_cast %71 : vector<1x208x64xbf16> to vector<208x64xbf16>
    %c7 = arith.constant 7 : index
    %c0_71 = arith.constant 0 : index
    %c0_72 = arith.constant 0 : index
    %73 = vector.load %arg5[%c7, %c0_71, %c0_72] : memref<9x64x128xbf16, #tpu.memory_space<vmem>>, vector<1x64x128xbf16>
    %74 = vector.shape_cast %73 : vector<1x64x128xbf16> to vector<64x128xbf16>
    %cst_73 = arith.constant dense<0.000000e+00> : vector<208x128xf32>
    %75 = tpu.matmul %72, %74, %cst_73 {dimension_numbers = #tpu.dot_dimension_numbers<[1], [0], [0], [1], [0, 0, 1, 1], [], []>} : vector<208x64xbf16>, vector<64x128xbf16>, vector<208x128xf32> -> vector<208x128xf32>
    %76 = arith.addf %70, %75 : vector<208x128xf32>
    %c2_74 = arith.constant 2 : index
    %c32_75 = arith.constant 32 : index
    %c0_76 = arith.constant 0 : index
    %77 = vector.load %arg18[%c2_74, %c32_75, %c0_76] : memref<3x240x64xbf16, #tpu.memory_space<vmem>>, vector<1x208x64xbf16>
    %78 = vector.shape_cast %77 : vector<1x208x64xbf16> to vector<208x64xbf16>
    %c8 = arith.constant 8 : index
    %c0_77 = arith.constant 0 : index
    %c0_78 = arith.constant 0 : index
    %79 = vector.load %arg5[%c8, %c0_77, %c0_78] : memref<9x64x128xbf16, #tpu.memory_space<vmem>>, vector<1x64x128xbf16>
    %80 = vector.shape_cast %79 : vector<1x64x128xbf16> to vector<64x128xbf16>
    %cst_79 = arith.constant dense<0.000000e+00> : vector<208x128xf32>
    %81 = tpu.matmul %78, %80, %cst_79 {dimension_numbers = #tpu.dot_dimension_numbers<[1], [0], [0], [1], [0, 0, 1, 1], [], []>} : vector<208x64xbf16>, vector<64x128xbf16>, vector<208x128xf32> -> vector<208x128xf32>
    %82 = arith.addf %76, %81 : vector<208x128xf32>
    %c0_80 = arith.constant 0 : index
    %c0_81 = arith.constant 0 : index
    %83 = vector.load %arg6[%c0_80, %c0_81] : memref<1x128xf32, #tpu.memory_space<vmem>>, vector<1x128xf32>
    %84 = vector.broadcast %83 : vector<1x128xf32> to vector<208x128xf32>
    %85 = arith.mulf %82, %84 : vector<208x128xf32>
    %c0_82 = arith.constant 0 : index
    %c0_83 = arith.constant 0 : index
    %86 = vector.load %arg7[%c0_82, %c0_83] : memref<1x128xf32, #tpu.memory_space<vmem>>, vector<1x128xf32>
    %87 = vector.broadcast %86 : vector<1x128xf32> to vector<208x128xf32>
    %88 = arith.addf %85, %87 : vector<208x128xf32>
    %cst_84 = arith.constant 0.000000e+00 : f32
    %89 = vector.broadcast %cst_84 : f32 to vector<208x128xf32>
    %90 = arith.maximumf %88, %89 : vector<208x128xf32>
    %c0_85 = arith.constant 0 : index
    %c0_86 = arith.constant 0 : index
    %91 = vector.load %arg19[%c0_85, %c0_86] : memref<208x128xf32, #tpu.memory_space<vmem>>, vector<208x128xf32>
    tpu.vector_store %arg19[%c0_85, %c0_86], %90 {strides = array<i32>} : memref<208x128xf32, #tpu.memory_space<vmem>>, vector<208x128xf32>,
    %c0_87 = arith.constant 0 : index
    %c0_88 = arith.constant 0 : index
    %92 = vector.load %arg19[%c0_87, %c0_88] : memref<208x128xf32, #tpu.memory_space<vmem>>, vector<192x128xf32>
    %93 = arith.truncf %92 : vector<192x128xf32> to vector<192x128xbf16>
    %c0_89 = arith.constant 0 : index
    %c0_90 = arith.constant 0 : index
    %c0_91 = arith.constant 0 : index
    %94 = vector.load %arg20[%c0_89, %c0_90, %c0_91] : memref<3x192x128xbf16, #tpu.memory_space<vmem>>, vector<1x192x128xbf16>
    %95 = vector.shape_cast %94 : vector<1x192x128xbf16> to vector<192x128xbf16>
    %96 = vector.shape_cast %93 : vector<192x128xbf16> to vector<1x192x128xbf16>
    tpu.vector_store %arg20[%c0_89, %c0_90, %c0_91], %96 {strides = array<i32>} : memref<3x192x128xbf16, #tpu.memory_space<vmem>>, vector<1x192x128xbf16>,
    %c1_92 = arith.constant 1 : index
    %c0_93 = arith.constant 0 : index
    %97 = vector.load %arg19[%c1_92, %c0_93] : memref<208x128xf32, #tpu.memory_space<vmem>>, vector<192x128xf32>
    %98 = arith.truncf %97 : vector<192x128xf32> to vector<192x128xbf16>
    %c1_94 = arith.constant 1 : index
    %c0_95 = arith.constant 0 : index
    %c0_96 = arith.constant 0 : index
    %99 = vector.load %arg20[%c1_94, %c0_95, %c0_96] : memref<3x192x128xbf16, #tpu.memory_space<vmem>>, vector<1x192x128xbf16>
    %100 = vector.shape_cast %99 : vector<1x192x128xbf16> to vector<192x128xbf16>
    %101 = vector.shape_cast %98 : vector<192x128xbf16> to vector<1x192x128xbf16>
    tpu.vector_store %arg20[%c1_94, %c0_95, %c0_96], %101 {strides = array<i32>} : memref<3x192x128xbf16, #tpu.memory_space<vmem>>, vector<1x192x128xbf16>,
    %c2_97 = arith.constant 2 : index
    %c0_98 = arith.constant 0 : index
    %102 = vector.load %arg19[%c2_97, %c0_98] : memref<208x128xf32, #tpu.memory_space<vmem>>, vector<192x128xf32>
    %103 = arith.truncf %102 : vector<192x128xf32> to vector<192x128xbf16>
    %c2_99 = arith.constant 2 : index
    %c0_100 = arith.constant 0 : index
    %c0_101 = arith.constant 0 : index
    %104 = vector.load %arg20[%c2_99, %c0_100, %c0_101] : memref<3x192x128xbf16, #tpu.memory_space<vmem>>, vector<1x192x128xbf16>
    %105 = vector.shape_cast %104 : vector<1x192x128xbf16> to vector<192x128xbf16>
    %106 = vector.shape_cast %103 : vector<192x128xbf16> to vector<1x192x128xbf16>
    tpu.vector_store %arg20[%c2_99, %c0_100, %c0_101], %106 {strides = array<i32>} : memref<3x192x128xbf16, #tpu.memory_space<vmem>>, vector<1x192x128xbf16>,
    %cst_102 = arith.constant 0.000000e+00 : f32
    %107 = vector.broadcast %cst_102 : f32 to vector<160x128xf32>
    %c0_103 = arith.constant 0 : index
    %c0_104 = arith.constant 0 : index
    %c0_105 = arith.constant 0 : index
    %108 = vector.load %arg20[%c0_103, %c0_104, %c0_105] : memref<3x192x128xbf16, #tpu.memory_space<vmem>>, vector<1x160x128xbf16>
    %109 = vector.shape_cast %108 : vector<1x160x128xbf16> to vector<160x128xbf16>
    %c0_106 = arith.constant 0 : index
    %c0_107 = arith.constant 0 : index
    %c0_108 = arith.constant 0 : index
    %110 = vector.load %arg8[%c0_106, %c0_107, %c0_108] : memref<9x128x128xbf16, #tpu.memory_space<vmem>>, vector<1x128x128xbf16>
    %111 = vector.shape_cast %110 : vector<1x128x128xbf16> to vector<128x128xbf16>
    %cst_109 = arith.constant dense<0.000000e+00> : vector<160x128xf32>
    %112 = tpu.matmul %109, %111, %cst_109 {dimension_numbers = #tpu.dot_dimension_numbers<[1], [0], [0], [1], [0, 0, 1, 1], [], []>} : vector<160x128xbf16>, vector<128x128xbf16>, vector<160x128xf32> -> vector<160x128xf32>
    %113 = arith.addf %107, %112 : vector<160x128xf32>
    %c1_110 = arith.constant 1 : index
    %c0_111 = arith.constant 0 : index
    %c0_112 = arith.constant 0 : index
    %114 = vector.load %arg20[%c1_110, %c0_111, %c0_112] : memref<3x192x128xbf16, #tpu.memory_space<vmem>>, vector<1x160x128xbf16>
    %115 = vector.shape_cast %114 : vector<1x160x128xbf16> to vector<160x128xbf16>
    %c1_113 = arith.constant 1 : index
    %c0_114 = arith.constant 0 : index
    %c0_115 = arith.constant 0 : index
    %116 = vector.load %arg8[%c1_113, %c0_114, %c0_115] : memref<9x128x128xbf16, #tpu.memory_space<vmem>>, vector<1x128x128xbf16>
    %117 = vector.shape_cast %116 : vector<1x128x128xbf16> to vector<128x128xbf16>
    %cst_116 = arith.constant dense<0.000000e+00> : vector<160x128xf32>
    %118 = tpu.matmul %115, %117, %cst_116 {dimension_numbers = #tpu.dot_dimension_numbers<[1], [0], [0], [1], [0, 0, 1, 1], [], []>} : vector<160x128xbf16>, vector<128x128xbf16>, vector<160x128xf32> -> vector<160x128xf32>
    %119 = arith.addf %113, %118 : vector<160x128xf32>
    %c2_117 = arith.constant 2 : index
    %c0_118 = arith.constant 0 : index
    %c0_119 = arith.constant 0 : index
    %120 = vector.load %arg20[%c2_117, %c0_118, %c0_119] : memref<3x192x128xbf16, #tpu.memory_space<vmem>>, vector<1x160x128xbf16>
    %121 = vector.shape_cast %120 : vector<1x160x128xbf16> to vector<160x128xbf16>
    %c2_120 = arith.constant 2 : index
    %c0_121 = arith.constant 0 : index
    %c0_122 = arith.constant 0 : index
    %122 = vector.load %arg8[%c2_120, %c0_121, %c0_122] : memref<9x128x128xbf16, #tpu.memory_space<vmem>>, vector<1x128x128xbf16>
    %123 = vector.shape_cast %122 : vector<1x128x128xbf16> to vector<128x128xbf16>
    %cst_123 = arith.constant dense<0.000000e+00> : vector<160x128xf32>
    %124 = tpu.matmul %121, %123, %cst_123 {dimension_numbers = #tpu.dot_dimension_numbers<[1], [0], [0], [1], [0, 0, 1, 1], [], []>} : vector<160x128xbf16>, vector<128x128xbf16>, vector<160x128xf32> -> vector<160x128xf32>
    %125 = arith.addf %119, %124 : vector<160x128xf32>
    %c0_124 = arith.constant 0 : index
    %c16_125 = arith.constant 16 : index
    %c0_126 = arith.constant 0 : index
    %126 = vector.load %arg20[%c0_124, %c16_125, %c0_126] : memref<3x192x128xbf16, #tpu.memory_space<vmem>>, vector<1x160x128xbf16>
    %127 = vector.shape_cast %126 : vector<1x160x128xbf16> to vector<160x128xbf16>
    %c3_127 = arith.constant 3 : index
    %c0_128 = arith.constant 0 : index
    %c0_129 = arith.constant 0 : index
    %128 = vector.load %arg8[%c3_127, %c0_128, %c0_129] : memref<9x128x128xbf16, #tpu.memory_space<vmem>>, vector<1x128x128xbf16>
    %129 = vector.shape_cast %128 : vector<1x128x128xbf16> to vector<128x128xbf16>
    %cst_130 = arith.constant dense<0.000000e+00> : vector<160x128xf32>
    %130 = tpu.matmul %127, %129, %cst_130 {dimension_numbers = #tpu.dot_dimension_numbers<[1], [0], [0], [1], [0, 0, 1, 1], [], []>} : vector<160x128xbf16>, vector<128x128xbf16>, vector<160x128xf32> -> vector<160x128xf32>
    %131 = arith.addf %125, %130 : vector<160x128xf32>
    %c1_131 = arith.constant 1 : index
    %c16_132 = arith.constant 16 : index
    %c0_133 = arith.constant 0 : index
    %132 = vector.load %arg20[%c1_131, %c16_132, %c0_133] : memref<3x192x128xbf16, #tpu.memory_space<vmem>>, vector<1x160x128xbf16>
    %133 = vector.shape_cast %132 : vector<1x160x128xbf16> to vector<160x128xbf16>
    %c4_134 = arith.constant 4 : index
    %c0_135 = arith.constant 0 : index
    %c0_136 = arith.constant 0 : index
    %134 = vector.load %arg8[%c4_134, %c0_135, %c0_136] : memref<9x128x128xbf16, #tpu.memory_space<vmem>>, vector<1x128x128xbf16>
    %135 = vector.shape_cast %134 : vector<1x128x128xbf16> to vector<128x128xbf16>
    %cst_137 = arith.constant dense<0.000000e+00> : vector<160x128xf32>
    %136 = tpu.matmul %133, %135, %cst_137 {dimension_numbers = #tpu.dot_dimension_numbers<[1], [0], [0], [1], [0, 0, 1, 1], [], []>} : vector<160x128xbf16>, vector<128x128xbf16>, vector<160x128xf32> -> vector<160x128xf32>
    %137 = arith.addf %131, %136 : vector<160x128xf32>
    %c2_138 = arith.constant 2 : index
    %c16_139 = arith.constant 16 : index
    %c0_140 = arith.constant 0 : index
    %138 = vector.load %arg20[%c2_138, %c16_139, %c0_140] : memref<3x192x128xbf16, #tpu.memory_space<vmem>>, vector<1x160x128xbf16>
    %139 = vector.shape_cast %138 : vector<1x160x128xbf16> to vector<160x128xbf16>
    %c5_141 = arith.constant 5 : index
    %c0_142 = arith.constant 0 : index
    %c0_143 = arith.constant 0 : index
    %140 = vector.load %arg8[%c5_141, %c0_142, %c0_143] : memref<9x128x128xbf16, #tpu.memory_space<vmem>>, vector<1x128x128xbf16>
    %141 = vector.shape_cast %140 : vector<1x128x128xbf16> to vector<128x128xbf16>
    %cst_144 = arith.constant dense<0.000000e+00> : vector<160x128xf32>
    %142 = tpu.matmul %139, %141, %cst_144 {dimension_numbers = #tpu.dot_dimension_numbers<[1], [0], [0], [1], [0, 0, 1, 1], [], []>} : vector<160x128xbf16>, vector<128x128xbf16>, vector<160x128xf32> -> vector<160x128xf32>
    %143 = arith.addf %137, %142 : vector<160x128xf32>
    %c0_145 = arith.constant 0 : index
    %c32_146 = arith.constant 32 : index
    %c0_147 = arith.constant 0 : index
    %144 = vector.load %arg20[%c0_145, %c32_146, %c0_147] : memref<3x192x128xbf16, #tpu.memory_space<vmem>>, vector<1x160x128xbf16>
    %145 = vector.shape_cast %144 : vector<1x160x128xbf16> to vector<160x128xbf16>
    %c6_148 = arith.constant 6 : index
    %c0_149 = arith.constant 0 : index
    %c0_150 = arith.constant 0 : index
    %146 = vector.load %arg8[%c6_148, %c0_149, %c0_150] : memref<9x128x128xbf16, #tpu.memory_space<vmem>>, vector<1x128x128xbf16>
    %147 = vector.shape_cast %146 : vector<1x128x128xbf16> to vector<128x128xbf16>
    %cst_151 = arith.constant dense<0.000000e+00> : vector<160x128xf32>
    %148 = tpu.matmul %145, %147, %cst_151 {dimension_numbers = #tpu.dot_dimension_numbers<[1], [0], [0], [1], [0, 0, 1, 1], [], []>} : vector<160x128xbf16>, vector<128x128xbf16>, vector<160x128xf32> -> vector<160x128xf32>
    %149 = arith.addf %143, %148 : vector<160x128xf32>
    %c1_152 = arith.constant 1 : index
    %c32_153 = arith.constant 32 : index
    %c0_154 = arith.constant 0 : index
    %150 = vector.load %arg20[%c1_152, %c32_153, %c0_154] : memref<3x192x128xbf16, #tpu.memory_space<vmem>>, vector<1x160x128xbf16>
    %151 = vector.shape_cast %150 : vector<1x160x128xbf16> to vector<160x128xbf16>
    %c7_155 = arith.constant 7 : index
    %c0_156 = arith.constant 0 : index
    %c0_157 = arith.constant 0 : index
    %152 = vector.load %arg8[%c7_155, %c0_156, %c0_157] : memref<9x128x128xbf16, #tpu.memory_space<vmem>>, vector<1x128x128xbf16>
    %153 = vector.shape_cast %152 : vector<1x128x128xbf16> to vector<128x128xbf16>
    %cst_158 = arith.constant dense<0.000000e+00> : vector<160x128xf32>
    %154 = tpu.matmul %151, %153, %cst_158 {dimension_numbers = #tpu.dot_dimension_numbers<[1], [0], [0], [1], [0, 0, 1, 1], [], []>} : vector<160x128xbf16>, vector<128x128xbf16>, vector<160x128xf32> -> vector<160x128xf32>
    %155 = arith.addf %149, %154 : vector<160x128xf32>
    %c2_159 = arith.constant 2 : index
    %c32_160 = arith.constant 32 : index
    %c0_161 = arith.constant 0 : index
    %156 = vector.load %arg20[%c2_159, %c32_160, %c0_161] : memref<3x192x128xbf16, #tpu.memory_space<vmem>>, vector<1x160x128xbf16>
    %157 = vector.shape_cast %156 : vector<1x160x128xbf16> to vector<160x128xbf16>
    %c8_162 = arith.constant 8 : index
    %c0_163 = arith.constant 0 : index
    %c0_164 = arith.constant 0 : index
    %158 = vector.load %arg8[%c8_162, %c0_163, %c0_164] : memref<9x128x128xbf16, #tpu.memory_space<vmem>>, vector<1x128x128xbf16>
    %159 = vector.shape_cast %158 : vector<1x128x128xbf16> to vector<128x128xbf16>
    %cst_165 = arith.constant dense<0.000000e+00> : vector<160x128xf32>
    %160 = tpu.matmul %157, %159, %cst_165 {dimension_numbers = #tpu.dot_dimension_numbers<[1], [0], [0], [1], [0, 0, 1, 1], [], []>} : vector<160x128xbf16>, vector<128x128xbf16>, vector<160x128xf32> -> vector<160x128xf32>
    %161 = arith.addf %155, %160 : vector<160x128xf32>
    %c0_166 = arith.constant 0 : index
    %c0_167 = arith.constant 0 : index
    %162 = vector.load %arg9[%c0_166, %c0_167] : memref<1x128xf32, #tpu.memory_space<vmem>>, vector<1x128xf32>
    %163 = vector.broadcast %162 : vector<1x128xf32> to vector<160x128xf32>
    %164 = arith.mulf %161, %163 : vector<160x128xf32>
    %c0_168 = arith.constant 0 : index
    %c0_169 = arith.constant 0 : index
    %165 = vector.load %arg10[%c0_168, %c0_169] : memref<1x128xf32, #tpu.memory_space<vmem>>, vector<1x128xf32>
    %166 = vector.broadcast %165 : vector<1x128xf32> to vector<160x128xf32>
    %167 = arith.addf %164, %166 : vector<160x128xf32>
    %cst_170 = arith.constant 0.000000e+00 : f32
    %168 = vector.broadcast %cst_170 : f32 to vector<160x128xf32>
    %169 = arith.maximumf %167, %168 : vector<160x128xf32>
    %c0_171 = arith.constant 0 : index
    %c0_172 = arith.constant 0 : index
    %c0_173 = arith.constant 0 : index
    %170 = vector.load %arg16[%c0_171, %c0_172, %c0_173] : memref<1x160x128xf32, #tpu.memory_space<vmem>>, vector<1x160x128xf32>
    %171 = vector.shape_cast %170 : vector<1x160x128xf32> to vector<160x128xf32>
    %172 = vector.shape_cast %169 : vector<160x128xf32> to vector<1x160x128xf32>
    tpu.vector_store %arg16[%c0_171, %c0_172, %c0_173], %172 {strides = array<i32>} : memref<1x160x128xf32, #tpu.memory_space<vmem>>, vector<1x160x128xf32>,
    %173 = tpu.iota {dimensions = array<i32: 0>} : vector<160x1xi32>
    %c16_i32 = arith.constant 16 : i32
    %c0_i32 = arith.constant 0 : i32
    %174 = arith.cmpi eq, %c16_i32, %c0_i32 : i32
    %c1_i32 = arith.constant 1 : i32
    %175 = arith.select %174, %c1_i32, %c16_i32 : i32
    %176 = vector.broadcast %175 : i32 to vector<160x1xi32>
    %177 = arith.remsi %173, %176 : vector<160x1xi32>
    %c0_i32_174 = arith.constant 0 : i32
    %178 = vector.broadcast %c0_i32_174 : i32 to vector<160x1xi32>
    %179 = arith.cmpi ne, %177, %178 : vector<160x1xi32>
    %c0_i32_175 = arith.constant 0 : i32
    %180 = vector.broadcast %c0_i32_175 : i32 to vector<160x1xi32>
    %181 = arith.cmpi slt, %177, %180 : vector<160x1xi32>
    %c0_i32_176 = arith.constant 0 : i32
    %182 = arith.cmpi slt, %175, %c0_i32_176 : i32
    %183 = vector.broadcast %182 : i1 to vector<160x1xi1>
    %184 = vector.broadcast %183 : vector<160x1xi1> to vector<160x1xi1>
    %185 = arith.xori %181, %184 : vector<160x1xi1>
    %186 = arith.andi %185, %179 : vector<160x1xi1>
    %187 = vector.broadcast %175 : i32 to vector<160x1xi32>
    %188 = arith.addi %177, %187 : vector<160x1xi32>
    %189 = arith.select %186, %188, %177 : vector<160x1xi1>, vector<160x1xi32>
    %c10_i32 = arith.constant 10 : i32
    %190 = vector.broadcast %c10_i32 : i32 to vector<160x1xi32>
    %191 = arith.cmpi slt, %189, %190 : vector<160x1xi32>
    %c160_i32 = arith.constant 160 : i32
    %192 = vector.broadcast %c160_i32 : i32 to vector<160x1xi32>
    %193 = arith.cmpi slt, %173, %192 : vector<160x1xi32>
    %194 = arith.andi %191, %193 : vector<160x1xi1>
    %195 = arith.extui %194 : vector<160x1xi1> to vector<160x1xi32>
    %196 = arith.sitofp %195 : vector<160x1xi32> to vector<160x1xf32>
    %197 = vector.broadcast %196 : vector<160x1xf32> to vector<160x128xf32>
    %198 = arith.mulf %169, %197 : vector<160x128xf32>
    %cst_177 = arith.constant dense<0.000000e+00> : vector<128xf32>
    %199 = vector.multi_reduction <add>, %198, %cst_177 [0] : vector<160x128xf32> to vector<128xf32>
    %200 = vector.shape_cast %199 : vector<128xf32> to vector<1x128xf32>
    %cst_178 = arith.constant 0.00999999977 : f32
    %201 = vector.broadcast %cst_178 : f32 to vector<1x128xf32>
    %202 = arith.mulf %200, %201 : vector<1x128xf32>
    %cst_179 = arith.constant dense<0.000000e+00> : vector<1xf32>
    %203 = vector.multi_reduction <add>, %202, %cst_179 [1] : vector<1x128xf32> to vector<1xf32>
    %204 = vector.shape_cast %203 : vector<1xf32> to vector<1x1xf32>
    %cst_180 = arith.constant 1.280000e+02 : f32
    %205 = vector.broadcast %cst_180 : f32 to vector<1x1xf32>
    %206 = arith.divf %204, %205 : vector<1x1xf32>
    %207 = vector.broadcast %206 : vector<1x1xf32> to vector<1x128xf32>
    %208 = arith.subf %202, %207 : vector<1x128xf32>
    %209 = arith.mulf %208, %208 : vector<1x128xf32>
    %cst_181 = arith.constant dense<0.000000e+00> : vector<1xf32>
    %210 = vector.multi_reduction <add>, %209, %cst_181 [1] : vector<1x128xf32> to vector<1xf32>
    %211 = vector.shape_cast %210 : vector<1xf32> to vector<1x1xf32>
    %cst_182 = arith.constant 1.280000e+02 : f32
    %212 = vector.broadcast %cst_182 : f32 to vector<1x1xf32>
    %213 = arith.divf %211, %212 : vector<1x1xf32>
    %214 = vector.broadcast %206 : vector<1x1xf32> to vector<1x128xf32>
    %215 = arith.subf %202, %214 : vector<1x128xf32>
    %cst_183 = arith.constant 9.99999974E-6 : f32
    %216 = vector.broadcast %cst_183 : f32 to vector<1x1xf32>
    %217 = arith.addf %213, %216 : vector<1x1xf32>
    %218 = math.rsqrt %217 : vector<1x1xf32>
    %219 = vector.broadcast %218 : vector<1x1xf32> to vector<1x128xf32>
    %220 = arith.mulf %215, %219 : vector<1x128xf32>
    %c0_184 = arith.constant 0 : index
    %c0_185 = arith.constant 0 : index
    %221 = vector.load %arg11[%c0_184, %c0_185] : memref<1x128xf32, #tpu.memory_space<vmem>>, vector<1x128xf32>
    %222 = arith.mulf %220, %221 : vector<1x128xf32>
    %c0_186 = arith.constant 0 : index
    %c0_187 = arith.constant 0 : index
    %223 = vector.load %arg12[%c0_186, %c0_187] : memref<1x128xf32, #tpu.memory_space<vmem>>, vector<1x128xf32>
    %224 = arith.addf %222, %223 : vector<1x128xf32>
    %225 = arith.truncf %224 : vector<1x128xf32> to vector<1x128xbf16>
    %c0_188 = arith.constant 0 : index
    %c0_189 = arith.constant 0 : index
    %226 = vector.load %arg13[%c0_188, %c0_189] : memref<128x128xbf16, #tpu.memory_space<vmem>>, vector<128x128xbf16>
    %cst_190 = arith.constant dense<0.000000e+00> : vector<1x128xf32>
    %227 = tpu.matmul %225, %226, %cst_190 {dimension_numbers = #tpu.dot_dimension_numbers<[1], [0], [0], [1], [0, 0, 1, 1], [], []>} : vector<1x128xbf16>, vector<128x128xbf16>, vector<1x128xf32> -> vector<1x128xf32>
    %c0_191 = arith.constant 0 : index
    %c0_192 = arith.constant 0 : index
    %228 = vector.load %arg14[%c0_191, %c0_192] : memref<1x128xf32, #tpu.memory_space<vmem>>, vector<1x128xf32>
    %229 = arith.addf %227, %228 : vector<1x128xf32>
    %c0_193 = arith.constant 0 : index
    %c0_194 = arith.constant 0 : index
    %c0_195 = arith.constant 0 : index
    %230 = vector.load %arg15[%c0_193, %c0_194, %c0_195] : memref<1x1x128xf32, #tpu.memory_space<vmem>>, vector<1x1x128xf32>
    %231 = vector.shape_cast %230 : vector<1x1x128xf32> to vector<1x128xf32>
    %232 = vector.shape_cast %229 : vector<1x128xf32> to vector<1x1x128xf32>
    tpu.vector_store %arg15[%c0_193, %c0_194, %c0_195], %232 {strides = array<i32>} : memref<1x1x128xf32, #tpu.memory_space<vmem>>, vector<1x1x128xf32>,
    return
  }
  func.func @transform_0(%arg0: i32) -> (i32, i32, i32) {
    %c0_i32 = arith.constant 0 : i32
    %c0_i32_0 = arith.constant 0 : i32
    %c0_i32_1 = arith.constant 0 : i32
    return %arg0, %c0_i32, %c0_i32_0 : i32, i32, i32
  }
  func.func @transform_1(%arg0: i32) -> (i32, i32) {
    %c0_i32 = arith.constant 0 : i32
    %c0_i32_0 = arith.constant 0 : i32
    %c0_i32_1 = arith.constant 0 : i32
    return %c0_i32, %c0_i32_0 : i32, i32
  }
  func.func @transform_2(%arg0: i32) -> (i32, i32) {
    %c0_i32 = arith.constant 0 : i32
    %c0_i32_0 = arith.constant 0 : i32
    %c0_i32_1 = arith.constant 0 : i32
    return %c0_i32, %c0_i32_0 : i32, i32
  }
  func.func @transform_3(%arg0: i32) -> (i32, i32) {
    %c0_i32 = arith.constant 0 : i32
    %c0_i32_0 = arith.constant 0 : i32
    %c0_i32_1 = arith.constant 0 : i32
    return %c0_i32, %c0_i32_0 : i32, i32
  }
  func.func @transform_4(%arg0: i32) -> (i32, i32, i32) {
    %c0_i32 = arith.constant 0 : i32
    %c0_i32_0 = arith.constant 0 : i32
    %c0_i32_1 = arith.constant 0 : i32
    %c0_i32_2 = arith.constant 0 : i32
    return %c0_i32, %c0_i32_0, %c0_i32_1 : i32, i32, i32
  }
  func.func @transform_5(%arg0: i32) -> (i32, i32) {
    %c0_i32 = arith.constant 0 : i32
    %c0_i32_0 = arith.constant 0 : i32
    %c0_i32_1 = arith.constant 0 : i32
    return %c0_i32, %c0_i32_0 : i32, i32
  }
  func.func @transform_6(%arg0: i32) -> (i32, i32) {
    %c0_i32 = arith.constant 0 : i32
    %c0_i32_0 = arith.constant 0 : i32
    %c0_i32_1 = arith.constant 0 : i32
    return %c0_i32, %c0_i32_0 : i32, i32
  }
  func.func @transform_7(%arg0: i32) -> (i32, i32, i32) {
    %c0_i32 = arith.constant 0 : i32
    %c0_i32_0 = arith.constant 0 : i32
    %c0_i32_1 = arith.constant 0 : i32
    %c0_i32_2 = arith.constant 0 : i32
    return %c0_i32, %c0_i32_0, %c0_i32_1 : i32, i32, i32
  }
  func.func @transform_8(%arg0: i32) -> (i32, i32) {
    %c0_i32 = arith.constant 0 : i32
    %c0_i32_0 = arith.constant 0 : i32
    %c0_i32_1 = arith.constant 0 : i32
    return %c0_i32, %c0_i32_0 : i32, i32
  }
  func.func @transform_9(%arg0: i32) -> (i32, i32) {
    %c0_i32 = arith.constant 0 : i32
    %c0_i32_0 = arith.constant 0 : i32
    %c0_i32_1 = arith.constant 0 : i32
    return %c0_i32, %c0_i32_0 : i32, i32
  }
  func.func @transform_10(%arg0: i32) -> (i32, i32) {
    %c0_i32 = arith.constant 0 : i32
    %c0_i32_0 = arith.constant 0 : i32
    %c0_i32_1 = arith.constant 0 : i32
    return %c0_i32, %c0_i32_0 : i32, i32
  }
  func.func @transform_11(%arg0: i32) -> (i32, i32) {
    %c0_i32 = arith.constant 0 : i32
    %c0_i32_0 = arith.constant 0 : i32
    %c0_i32_1 = arith.constant 0 : i32
    return %c0_i32, %c0_i32_0 : i32, i32
  }
  func.func @transform_12(%arg0: i32) -> (i32, i32) {
    %c0_i32 = arith.constant 0 : i32
    %c0_i32_0 = arith.constant 0 : i32
    %c0_i32_1 = arith.constant 0 : i32
    return %c0_i32, %c0_i32_0 : i32, i32
  }
  func.func @transform_13(%arg0: i32) -> (i32, i32) {
    %c0_i32 = arith.constant 0 : i32
    %c0_i32_0 = arith.constant 0 : i32
    %c0_i32_1 = arith.constant 0 : i32
    return %c0_i32, %c0_i32_0 : i32, i32
  }
  func.func @transform_14(%arg0: i32) -> (i32, i32, i32) {
    %c0_i32 = arith.constant 0 : i32
    %c0_i32_0 = arith.constant 0 : i32
    %c0_i32_1 = arith.constant 0 : i32
    return %arg0, %c0_i32, %c0_i32_0 : i32, i32, i32
  }
  func.func @transform_15(%arg0: i32) -> (i32, i32, i32) {
    %c0_i32 = arith.constant 0 : i32
    %c0_i32_0 = arith.constant 0 : i32
    %c0_i32_1 = arith.constant 0 : i32
    return %arg0, %c0_i32, %c0_i32_0 : i32, i32, i32
  }
}

</mosaic_0001>

<bundles_post_ra>
// kernel: fcn_forward.1
= control target key start
LH: loop header
LB: loop body
LE: loop exit
PB: predicated region body
PF: predicated region fallthrough
CT: control target
= control target key end

     0   :  { %s13177_s0 = inlined_call_operand.vmem [shape: bf16[2,256,72], index: 0, kind: input, shape index: {}]   ;;  %s13178_s1 = inlined_call_operand.vmem [shape: bf16[72,64], index: 1, kind: input, shape index: {}]   ;;  %s13179_s2 = inlined_call_operand.vmem [shape: f32[1,64], index: 2, kind: input, shape index: {}]   ;;  %s13180_s3 = inlined_call_operand.vmem [shape: f32[1,64], index: 3, kind: input, shape index: {}]   ;;  %s13181_s4 = inlined_call_operand.vmem [shape: bf16[9,64,128], index: 4, kind: input, shape index: {}]   ;;  %s13182_s5 = inlined_call_operand.vmem [shape: f32[1,128], index: 5, kind: input, shape index: {}]   ;;  %s13183_s6 = inlined_call_operand.vmem [shape: f32[1,128], index: 6, kind: input, shape index: {}]   ;;  %s13184_s7 = inlined_call_operand.vmem [shape: bf16[9,128,128], index: 7, kind: input, shape index: {}]   ;;  %s13185_s8 = inlined_call_operand.vmem [shape: f32[1,128], index: 8, kind: input, shape index: {}]   ;;  %s13186_s9 = inlined_call_operand.vmem [shape: f32[1,128], index: 9, kind: input, shape index: {}]   ;;  %s13187_s10 = inlined_call_operand.vmem [shape: f32[1,128], index: 10, kind: input, shape index: {}]   ;;  %s13188_s11 = inlined_call_operand.vmem [shape: f32[1,128], index: 11, kind: input, shape index: {}]   ;;  %s13189_s12 = inlined_call_operand.vmem [shape: bf16[128,128], index: 12, kind: input, shape index: {}]   ;;  %s13190_s13 = inlined_call_operand.vmem [shape: f32[1,128], index: 13, kind: input, shape index: {}]   ;;  %s13191_s14 = inlined_call_operand.hbm [shape: f32[2,1,128], index: 14, kind: output, shape index: {0}]   ;;  %s13192_s15 = inlined_call_operand.vmem [shape: f32[2,160,128], index: 15, kind: output, shape index: {1}]  }
   0x1   :  { %13198 = sst [smem:[#allocation32_spill]] %s13177_s0 }
   0x2   :  { %13199 = sst [smem:[#allocation33_spill]] %s13178_s1 }
   0x3   :  { %21 = vsyncpa [#allocation7], 0 }
   0x4   :  { %23 = vsyncpa [#allocation7 + $0x1], 0  ;;  %s11213_s18 = smov 0   ;;  %s11215_s19 = smov 0  }
   0x5   :  { %s11217_s20 = smov 0   ;;  %s11219_s21 = smov 0  }
   0x6 LB: > { %13200 = sst [smem:[#allocation9_spill]] %s11124_s20  ;;  %s11234_s22 = sadd.s32 4294967295, %s11128_s21   ;;  %s11128_s21 = sphi %s11219_s21, %s13260_s21   ;;  %s11124_s20 = sphi %s11217_s20, %s13262_s20   ;;  %s11120_s19 = sphi %s11215_s19, %s13264_s19   ;;  %s11116_s18 = sphi %s11213_s18, %s13263_s18  }
   0x7   : > { %s8173_s23 = sadd.s32 4294967294, %s11128_s21   ;;  %s11238_s24 = sadd.s32 1, %s11128_s21  }
   0x8   : > { %13201 = sst [smem:[#allocation10_spill]] %s11238_s24  ;;  %s335_s25 = sadd.s32 1, %s11124_s20 }
   0x9   : > { %s332_s26 = ssub.s32 %s11128_s21, %s11238_s24  ;;  %p345_p0 = scmp.ne.s32.totalorder %s11124_s20, %s11120_s19 }
   0xa   : > { %p333_p1 = scmp.eq.s32.totalorder %s332_s26, 0  ;;  %p346_p2 = scmp.eq.s32.totalorder %s11234_s22, 1 }
   0xb   : > { %p351_p3 = scmp.ne.s32.totalorder %s11120_s19, %s11116_s18  ;;  %p352_p4 = scmp.eq.s32.totalorder %s8173_s23, 1 }
   0xc   : > { %s11249_s27 = scalar_select %p333_p1, %s11124_s20, %s335_s25  }
   0xd   : > { %p11251_p5 = por %p346_p2, %p345_p0  ;;  %p11255_p6 = por %p352_p4, %p351_p3 }
   0xe   : > { %13202 = sst [smem:[#allocation11_spill]] %s11249_s27  ;;  %p8176_p7 = scmp.ge.s32.totalorder %s11128_s21, 1 }
   0xf   : > { %p443_p8 = scmp.lt.s32.totalorder %s11128_s21, 3 }
  0x11   : > { %p444_p9 = pnand %p8176_p7, %p443_p8 }
  0x13   : > { %447 = sbr.rel (%p444_p9) target bundleno = 1898 (0x76a), region = 76 }
  0x18   : > { %s13205_s1 = sld [smem:[#allocation33_spill]]  ;;  %vm703_vm0 = vcmask 1043456   ;;  %p495_p10 = scmp.lt.s32.totalorder %s11234_s22, 1  ;;  %vm654_vm1 = vcmask 588800   ;;  %v10741_v22 = vld [vmem:[%s13181_s4 + $0x38] sm:$0xff]   ;;  %v13196_v24 = vmov 0.0  }
  0x19   : > { %s13206_s0 = sld [smem:[#allocation32_spill]]  ;;  %v10742_v23 = vld [vmem:[%s13181_s4 + $0x18] sm:$0xff]   ;;  %9793 = vmatprep.subr.bf16.mxu1 %v13196_v24  ;;  %v10743_v25 = vld [vmem:[%s13181_s4 + $0x30] sm:$0xff]   ;;  %v10745_v27 = vld [vmem:[%s13181_s4 + $0x28] sm:$0xff]   ;;  %vm11131_vm2 = vmmov 0   ;;  %vm978_vm3 = vcmask 523264  }
  0x1a   : > { %s11272_s27 = scalar_select %p495_p10, %s11234_s22, 1  ;;  %9794 = vmatpush3.bf16.msra.mxu1 %v10741_v22  ;;  %v10744_v26 = vld [vmem:[%s13181_s4 + $0x10] sm:$0xff]   ;;  %v10746_v28 = vld [vmem:[%s13181_s4 + $0x8] sm:$0xff]   ;;  %v10747_v29 = vld [vmem:[%s13181_s4 + $0x20] sm:$0xff]   ;;  %9801 = vmatprep.mubr.msk.bf16.mxu1 %vm11131_vm2, %v13196_v24  ;;  %vm1161_vm4 = vcmask 519168  }
  0x1b   : > { %9795 = vmatprep.subr.bf16.mxu1 %v13196_v24  ;;  %v10748_v30 = vld [vmem:[%s13181_s4] sm:$0xff]   ;;  %s486_s23 = sand.u32 1, %s11120_s19  }
  0x1c   : > { %s9030_s20 = sshll.u32 %s11272_s27, 7  ;;  %v11359_v31 = vld [vmem:[%s13179_s2] ss:$0 sm:$0xff]  ;;  %s10678_s25 = smul.u32 160, %s11272_s27 }
  0x1d   : > { %v11364_v33 = vld [vmem:[%s13180_s3] ss:$0 sm:$0xff]  ;;  %s487_s27 = scalar_lea.vmem [#allocation6], %s486_s23 }
  0x1e   : > { %v10720_v0 = vld [vmem:[%s13205_s1 + $0x20] ss:$0 sps:$4 sm:$0xff]   ;;  %v10721_v1 = vld [vmem:[%s13205_s1 + $0x18] sm:$0xff]   ;;  %v10722_v3 = vld [vmem:[%s13205_s1 + $0x10] sm:$0xff]   ;;  %9796 = vmatpush3.bf16.msra.mxu1 %v10743_v25  ;;  %s12929_s16 = scalar_lea.vmem %s13192_s15, %s10678_s25 }
  0x1f   : > { %10677 = vmatprep.subr.msk.bf16.mxu0 %vm703_vm0, %v10720_v0  ;;  %v705_v2 = vsel %vm703_vm0, %v10720_v0, 0  ;;  %v10723_v4 = vld [vmem:[%s13205_s1 + $0x8] sm:$0xff]   ;;  %s11281_s24 = scalar_lea.vmem %s13206_s0, %s9030_s20  ;;  %v10724_v6 = vld [vmem:[%s13205_s1] sm:$0xff]   ;;  %9797 = vmatprep.subr.bf16.mxu1 %v13196_v24  ;;  %s9027_s20 = sshll.u32 %s11234_s22, 4 }
  0x20   : > { %9752 = vmatpush3.bf16.msra.mxu0 %v705_v2  ;;  %v10725_v5 = vld [vmem:[%s11281_s24] sm:$0xff]   ;;  %v10726_v7 = vld [vmem:[%s11281_s24 + $0x8] sm:$0xff]   ;;  %v10727_v8 = vld [vmem:[%s11281_s24 + $0x10] sm:$0xff]   ;;  %s8090_s0 = sshll.u32 %s487_s27, 4  ;;  %s13136_s17 = scalar_lea.hbm %s13191_s14, %s9027_s20  ;;  %s13138_s0 = int_to_ptr.vmem [resolvable:$true] %s8090_s0 }
  0x21   : > { %9753 = vmatprep.subr.bf16.mxu0 %v10721_v1  ;;  %9761 = vmatprep.mubr.msk.bf16.mxu0 %vm654_vm1, %v10725_v5  ;;  %v10728_v9 = vld [vmem:[%s11281_s24 + $0x18] sm:$0xff]   ;;  %v10729_v10 = vld [vmem:[%s11281_s24 + $0x20] sm:$0xff]   ;;  %v10730_v11 = vld [vmem:[%s11281_s24 + $0x28] sm:$0xff]   ;;  %s11068_s25 = scalar_lea.vmem %s13138_s0, 16  ;;  %s11132_s22 = smov [#allocation6]  }
  0x22   : > { %v10731_v12 = vld [vmem:[%s11281_s24 + $0x30] sm:$0xff]   ;;  %v10732_v13 = vld [vmem:[%s11281_s24 + $0x38] sm:$0xff]   ;;  %v10733_v14 = vld [vmem:[%s11281_s24 + $0x40] sm:$0xff]   ;;  %9798 = vmatpush3.bf16.msra.mxu1 %v10745_v27  ;;  %p11069_p11 = scmp.ne.s32.totalorder %s13138_s0, %s11068_s25  ;;  %s11072_s26 = sshll.u32 %s11132_s22, 4  ;;  %s11073_s26 = int_to_ptr.vmem [resolvable:$false] %s11072_s26 }
  0x23   : > { %v10734_v15 = vld [vmem:[%s11281_s24 + $0x48] sm:$0xff]   ;;  %v10735_v16 = vld [vmem:[%s11281_s24 + $0x50] sm:$0xff]   ;;  %v10736_v17 = vld [vmem:[%s11281_s24 + $0x58] sm:$0xff]   ;;  %9799 = vmatprep.subr.bf16.mxu1 %v13196_v24  ;;  %s11074_s30 = scalar_lea.vmem %s11073_s26, 32  ;;  %p11075_p0 = scmp.lt.s32.totalorder %s13138_s0, %s11073_s26 }
  0x24   : > { %9754 = vmatpush3.bf16.msra.mxu0 %v10721_v1  ;;  %v10737_v18 = vld [vmem:[%s11281_s24 + $0x60] sm:$0xff]   ;;  %v10738_v19 = vld [vmem:[%s11281_s24 + $0x68] sm:$0xff]   ;;  %v10739_v20 = vld [vmem:[%s11281_s24 + $0x70] sm:$0xff]   ;;  %p11070_p12 = pnand %p11069_p11, %p11251_p5  ;;  %p11076_p1 = scmp.lt.s32.totalorder %s11074_s30, %s11068_s25 }
  0x25   : > { %9755 = vmatprep.subr.bf16.mxu0 %v10722_v3  ;;  %v10740_v21 = vld [vmem:[%s11281_s24 + $0x78] sm:$0xff]   ;;  %s8073_s24 = scalar_lea.sflag [#allocation7], %s486_s23 }
  0x26   : > { %9800 = vmatpush3.bf16.msra.mxu1 %v10747_v29  ;;  %p11071_p13 = pneg %p11070_p12  ;;  %p11077_p2 = por %p11076_p1, %p11075_p0 }
  0x27   : > { %9913 = vmatprep.subr.bf16.mxu1 %v13196_v24 }
  0x28   : > { %9756 = vmatpush3.bf16.msra.mxu0 %v10722_v3  ;;  %p11078_p3 = pnand %p11077_p2, %p11071_p13 }
  0x29   : > { %9757 = vmatprep.subr.bf16.mxu0 %v10723_v4 }
  0x2c   : > { %9758 = vmatpush3.bf16.msra.mxu0 %v10723_v4 }
  0x2d   : > { %9759 = vmatprep.subr.bf16.mxu0 %v10724_v6 }
  0x30   : > { %9760 = vmatpush3.bf16.msra.mxu0 %v10724_v6 }
  0x31   : > { %9853 = vmatprep.subr.bf16.mxu0 %v13196_v24 }
  0x33   : > { %9762 = vmatmul.mubr.msk.bf16.vlgmr.msra.gmra.mxu0 %vm654_vm1, %v10726_v7 }
  0x34   : > { %9765 = vmatprep.mubr.msk.bf16.mxu0 %vm654_vm1, %v10727_v8  ;;  %9854 = vmatpush3.bf16.msra.mxu0 %v10742_v23 }
  0x35   : > { %9855 = vmatprep.subr.bf16.mxu0 %v13196_v24 }
  0x38   : > { %9856 = vmatpush3.bf16.msra.mxu0 %v10744_v26 }
  0x39   : > { %9857 = vmatprep.subr.bf16.mxu0 %v13196_v24 }
  0x3b   : > { %9766 = vmatmul.mubr.msk.bf16.gmra.mxu0 %vm654_vm1, %v10728_v9 }
  0x3c   : > { %9769 = vmatprep.mubr.msk.bf16.mxu0 %vm654_vm1, %v10729_v10  ;;  %9858 = vmatpush3.bf16.msra.mxu0 %v10746_v28 }
  0x3d   : > { %9859 = vmatprep.subr.bf16.mxu0 %v13196_v24 }
  0x40   : > { %9860 = vmatpush3.bf16.msra.mxu0 %v10748_v30 }
  0x41   : > { %9973 = vmatprep.subr.bf16.mxu0 %v13196_v24 }
  0x43   : > { %9770 = vmatmul.mubr.msk.bf16.gmra.mxu0 %vm654_vm1, %v10730_v11 }
  0x44   : > { %9773 = vmatprep.mubr.msk.bf16.mxu0 %vm654_vm1, %v10731_v12 }
  0x4b   : > { %9774 = vmatmul.mubr.msk.bf16.gmra.mxu0 %vm654_vm1, %v10732_v13 }
  0x4c   : > { %9777 = vmatprep.mubr.msk.bf16.mxu0 %vm654_vm1, %v10733_v14 }
  0x53   : > { %9778 = vmatmul.mubr.msk.bf16.gmra.mxu0 %vm654_vm1, %v10734_v15 }
  0x54   : > { %9781 = vmatprep.mubr.msk.bf16.mxu0 %vm654_vm1, %v10735_v16 }
  0x5b   : > { %9782 = vmatmul.mubr.msk.bf16.gmra.mxu0 %vm654_vm1, %v10736_v17 }
  0x5c   : > { %9785 = vmatprep.mubr.msk.bf16.mxu0 %vm654_vm1, %v10737_v18 }
  0x63   : > { %9786 = vmatmul.mubr.msk.bf16.gmra.mxu0 %vm654_vm1, %v10738_v19 }
  0x64   : > { %9789 = vmatprep.mubr.msk.bf16.mxu0 %vm654_vm1, %v10739_v20 }
  0x6b   : > { %9790 = vmatmul.mubr.msk.bf16.gmra.mxu0 %vm654_vm1, %v10740_v21 }
  0x6c   : > { %9861 = vmatprep.mubr.msk.bf16.mxu0 %vm11131_vm2, %v13196_v24 }
  0xf3   : > { %v9763_v32 = vpop.f32.mrf.mxu0 }
  0xf4   : > { %v877_v34 = vmul.f32 %v9763_v32, %v11359_v31 }
  0xf5   : > { %v741_v35 = vpop.f32.mrf.mxu0 }
  0xf6   : > { %v916_v36 = vadd.f32 %v11364_v33, %v877_v34  ;;  %v875_v37 = vmul.f32 %v11359_v31, %v741_v35 }
  0xf7   : > { %v9764_v38 = vpop.f32.mrf.mxu0 }
  0xf8   : > { %v948_v39 = vmax.f32 %v916_v36, 0.0  ;;  %v914_v40 = vadd.f32 %v11364_v33, %v875_v37  ;;  %v878_v41 = vmul.f32 %v9764_v38, %v11359_v31 }
  0xf9   : > { %v744_v42 = vpop.f32.mrf.mxu0 }
  0xfa   : > { %981 = vst.msk [vmem:[#allocation2 + $0x10] sm:$0xff] %vm978_vm3, %v948_v39  ;;  %v946_v43 = vmax.f32 %v914_v40, 0.0  ;;  %v917_v44 = vadd.f32 %v11364_v33, %v878_v41  ;;  %v876_v45 = vmul.f32 %v11359_v31, %v744_v42 }
  0xfb   : > { %v9767_v46 = vpop.f32.mrf.mxu0 }
  0xfc   : > { %979 = vst.msk [vmem:[#allocation2] sm:$0xff] %vm978_vm3, %v946_v43  ;;  %v949_v47 = vmax.f32 %v917_v44, 0.0  ;;  %v915_v48 = vadd.f32 %v11364_v33, %v876_v45  ;;  %v881_v49 = vmul.f32 %v9767_v46, %v11359_v31 }
  0xfd   : > { %v757_v50 = vpop.f32.mrf.mxu0 }
  0xfe   : > { %982 = vst.msk [vmem:[#allocation2 + $0x18] sm:$0xff] %vm978_vm3, %v949_v47  ;;  %v947_v51 = vmax.f32 %v915_v48, 0.0  ;;  %v920_v52 = vadd.f32 %v11364_v33, %v881_v49  ;;  %v879_v53 = vmul.f32 %v11359_v31, %v757_v50 }
  0xff   : > { %v9768_v54 = vpop.f32.mrf.mxu0 }
 0x100   : > { %980 = vst.msk [vmem:[#allocation2 + $0x8] sm:$0xff] %vm978_vm3, %v947_v51  ;;  %v952_v55 = vmax.f32 %v920_v52, 0.0  ;;  %v918_v56 = vadd.f32 %v11364_v33, %v879_v53  ;;  %v882_v57 = vmul.f32 %v9768_v54, %v11359_v31 }
 0x101   : > { %v1013_v58 = vld [vmem:[#allocation2 + $0x10] sm:$0xff]  ;;  %v760_v59 = vpop.f32.mrf.mxu0 }
 0x102   : > { %v9033_v60 = vpack.c.bf16 %v1013_v58, %v1013_v58  ;;  %985 = vst.msk [vmem:[#allocation2 + $0x30] sm:$0xff] %vm978_vm3, %v952_v55  ;;  %v950_v61 = vmax.f32 %v918_v56, 0.0  ;;  %v921_v62 = vadd.f32 %v11364_v33, %v882_v57  ;;  %v880_v63 = vmul.f32 %v11359_v31, %v760_v59  ;;  %v10751_v57 = vld [vmem:[%s13181_s4 + $0x58] sm:$0xff]  }
 0x103   : > { %v1011_v0 = vld [vmem:[#allocation2] sm:$0xff]  ;;  %v9771_v1 = vpop.f32.mrf.mxu0 }
 0x104   : > { %1164 = vst.msk [vmem:[#allocation3 + $0x8] sm:$0xf] %vm1161_vm4, %v9033_v60  ;;  %v9031_v2 = vpack.c.bf16 %v1011_v0, %v1011_v0  ;;  %v953_v3 = vmax.f32 %v921_v62, 0.0  ;;  %v919_v4 = vadd.f32 %v11364_v33, %v880_v63  ;;  %v885_v5 = vmul.f32 %v9771_v1, %v11359_v31 }
 0x105   : > { %983 = vst.msk [vmem:[#allocation2 + $0x20] sm:$0xff] %vm978_vm3, %v950_v61  ;;  %v1014_v6 = vld [vmem:[#allocation2 + $0x18] sm:$0xff]  ;;  %v773_v9 = vpop.f32.mrf.mxu0 }
 0x106   : > { %v1194_v7 = vld [vmem:[#allocation2 + $0x11] sm:$0xff]  ;;  %1162 = vst.msk [vmem:[#allocation3] sm:$0xf] %vm1161_vm4, %v9031_v2  ;;  %v9034_v10 = vpack.c.bf16 %v1014_v6, %v1014_v6  ;;  %v951_v13 = vmax.f32 %v919_v4, 0.0  ;;  %v924_v17 = vadd.f32 %v11364_v33, %v885_v5  ;;  %v883_v18 = vmul.f32 %v11359_v31, %v773_v9 }
 0x107   : > { %v1375_v8 = vld [vmem:[#allocation2 + $0x12] sm:$0xff]  ;;  %v9063_v11 = vpack.c.bf16 %v1194_v7, %v1194_v7  ;;  %986 = vst.msk [vmem:[#allocation2 + $0x38] sm:$0xff] %vm978_vm3, %v953_v3  ;;  %v1012_v14 = vld [vmem:[#allocation2 + $0x8] sm:$0xff]  ;;  %v9772_v19 = vpop.f32.mrf.mxu0 }
 0x108   : > { %v9093_v12 = vpack.c.bf16 %v1375_v8, %v1375_v8  ;;  %v1192_v15 = vld [vmem:[#allocation2 + $0x1] sm:$0xff]  ;;  %v1193_v16 = vld [vmem:[#allocation2 + $0x9] sm:$0xff]  ;;  %1165 = vst.msk [vmem:[#allocation3 + $0xc] sm:$0xf] %vm1161_vm4, %v9034_v10  ;;  %v9032_v20 = vpack.c.bf16 %v1012_v14, %v1012_v14  ;;  %v886_v26 = vmul.f32 %v9772_v19, %v11359_v31  ;;  %v956_v30 = vmax.f32 %v924_v17, 0.0  ;;  %v10777_v6 = vld [vmem:[%s13181_s4 + $0x78] sm:$0xff]  }
 0x109   : > { %1345 = vst.msk [vmem:[#allocation3 + $0x80] sm:$0xf] %vm1161_vm4, %v9063_v11  ;;  %v9061_v21 = vpack.c.bf16 %v1192_v15, %v1192_v15  ;;  %v9062_v22 = vpack.c.bf16 %v1193_v16, %v1193_v16  ;;  %v1373_v23 = vld [vmem:[#allocation2 + $0x2] sm:$0xff]  ;;  %v1374_v25 = vld [vmem:[#allocation2 + $0xa] sm:$0xff]  ;;  %v922_v32 = vadd.f32 %v11364_v33, %v883_v18  ;;  %v776_v34 = vpop.f32.mrf.mxu0 }
 0x10a   : > { %1526 = vst.msk [vmem:[#allocation3 + $0xf8] sm:$0xf] %vm1161_vm4, %v9093_v12  ;;  %v9091_v27 = vpack.c.bf16 %v1373_v23, %v1373_v23  ;;  %v9092_v28 = vpack.c.bf16 %v1374_v25, %v1374_v25  ;;  %v1017_v29 = vld [vmem:[#allocation2 + $0x30] sm:$0xff]  ;;  %1163 = vst.msk [vmem:[#allocation3 + $0x4] sm:$0xf] %vm1161_vm4, %v9032_v20  ;;  %v925_v36 = vadd.f32 %v11364_v33, %v886_v26 }
 0x10b   : > { %984 = vst.msk [vmem:[#allocation2 + $0x28] sm:$0xff] %vm978_vm3, %v951_v13  ;;  %v9037_v35 = vpack.c.bf16 %v1017_v29, %v1017_v29  ;;  %v884_v37 = vmul.f32 %v11359_v31, %v776_v34  ;;  %989 = vst.msk [vmem:[#allocation2 + $0x50] sm:$0xff] %vm978_vm3, %v956_v30  ;;  %v954_v41 = vmax.f32 %v922_v32, 0.0  ;;  %v9775_v42 = vpop.f32.mrf.mxu0  ;;  %v10758_v20 = vld [vmem:[%s13181_s4 + $0x50] sm:$0xff]  }
 0x10c   : > { %1343 = vst.msk [vmem:[#allocation3 + $0x78] sm:$0xf] %vm1161_vm4, %v9061_v21  ;;  %1344 = vst.msk [vmem:[#allocation3 + $0x7c] sm:$0xf] %vm1161_vm4, %v9062_v22  ;;  %v1015_v38 = vld [vmem:[#allocation2 + $0x20] sm:$0xff]  ;;  %v957_v46 = vmax.f32 %v925_v36, 0.0  ;;  %v889_v51 = vmul.f32 %v9775_v42, %v11359_v31 }
 0x10d   : > { %1524 = vst.msk [vmem:[#allocation3 + $0xf0] sm:$0xf] %vm1161_vm4, %v9091_v27  ;;  %1525 = vst.msk [vmem:[#allocation3 + $0xf4] sm:$0xf] %vm1161_vm4, %v9092_v28  ;;  %v1195_v39 = vld [vmem:[#allocation2 + $0x19] sm:$0xff]  ;;  %v9035_v43 = vpack.c.bf16 %v1015_v38, %v1015_v38  ;;  %v923_v50 = vadd.f32 %v11364_v33, %v884_v37  ;;  %v789_v52 = vpop.f32.mrf.mxu0 }
 0x10e   : > { %v1376_v40 = vld [vmem:[#allocation2 + $0x1a] sm:$0xff]  ;;  %1168 = vst.msk [vmem:[#allocation3 + $0x18] sm:$0xf] %vm1161_vm4, %v9037_v35  ;;  %v9064_v44 = vpack.c.bf16 %v1195_v39, %v1195_v39  ;;  %v1198_v48 = vld [vmem:[#allocation2 + $0x31] sm:$0xff]  ;;  %v887_v56 = vmul.f32 %v11359_v31, %v789_v52  ;;  %v928_v62 = vadd.f32 %v11364_v33, %v889_v51  ;;  %v10781_v51 = vld [vmem:[%s13181_s4 + $0x68] sm:$0xff]  }
 0x10f   : > { %v9094_v45 = vpack.c.bf16 %v1376_v40, %v1376_v40  ;;  %v1018_v47 = vld [vmem:[#allocation2 + $0x38] sm:$0xff]  ;;  %987 = vst.msk [vmem:[#allocation2 + $0x40] sm:$0xff] %vm978_vm3, %v954_v41  ;;  %v9067_v54 = vpack.c.bf16 %v1198_v48, %v1198_v48  ;;  %990 = vst.msk [vmem:[#allocation2 + $0x58] sm:$0xff] %vm978_vm3, %v957_v46  ;;  %v955_v61 = vmax.f32 %v923_v50, 0.0  ;;  %v9776_v63 = vpop.f32.mrf.mxu0  ;;  %v10778_v41 = vld [vmem:[%s13181_s4 + $0x70] sm:$0xff]  }
 0x110   : > { %v1379_v49 = vld [vmem:[#allocation2 + $0x32] sm:$0xff]  ;;  %1166 = vst.msk [vmem:[#allocation3 + $0x10] sm:$0xf] %vm1161_vm4, %v9035_v43  ;;  %1346 = vst.msk [vmem:[#allocation3 + $0x84] sm:$0xf] %vm1161_vm4, %v9064_v44  ;;  %v9038_v53 = vpack.c.bf16 %v1018_v47, %v1018_v47  ;;  %v926_v5 = vadd.f32 %v11364_v33, %v887_v56  ;;  %v960_v9 = vmax.f32 %v928_v62, 0.0  ;;  %v890_v11 = vmul.f32 %v9776_v63, %v11359_v31 }
 0x111   : > { %1527 = vst.msk [vmem:[#allocation3 + $0xfc] sm:$0xf] %vm1161_vm4, %v9094_v45  ;;  %v9097_v55 = vpack.c.bf16 %v1379_v49, %v1379_v49  ;;  %1349 = vst.msk [vmem:[#allocation3 + $0x90] sm:$0xf] %vm1161_vm4, %v9067_v54  ;;  %v792_v12 = vpop.f32.mrf.mxu0  ;;  %v10750_v15 = vld [vmem:[#allocation3] sm:$0xff]   ;;  %v10765_v46 = vld [vmem:[%s13181_s4 + $0x48] sm:$0xff]  }
 0x112   : > { %v1016_v58 = vld [vmem:[#allocation2 + $0x28] sm:$0xff]  ;;  %1169 = vst.msk [vmem:[#allocation3 + $0x1c] sm:$0xf] %vm1161_vm4, %v9038_v53  ;;  %v1021_v13 = vld [vmem:[#allocation2 + $0x50] sm:$0xff]  ;;  %v958_v14 = vmax.f32 %v926_v5, 0.0  ;;  %v888_v16 = vmul.f32 %v11359_v31, %v792_v12  ;;  %v929_v18 = vadd.f32 %v11364_v33, %v890_v11  ;;  %9862 = vmatmul.mubr.msk.bf16.vlgmr.msra.gmra.mxu0 %vm978_vm3, %v10750_v15  ;;  %v10772_v11 = vld [vmem:[%s13181_s4 + $0x40] sm:$0xff]  }
 0x113   : > { %v1196_v59 = vld [vmem:[#allocation2 + $0x21] sm:$0xff]  ;;  %v1197_v60 = vld [vmem:[#allocation2 + $0x29] sm:$0xff]  ;;  %1530 = vst.msk [vmem:[#allocation3 + $0x108] sm:$0xf] %vm1161_vm4, %v9097_v55  ;;  %v9036_v0 = vpack.c.bf16 %v1016_v58, %v1016_v58  ;;  %v10749_v10 = vld [vmem:[#allocation3 + $0x78] sm:$0xff]   ;;  %v9041_v17 = vpack.c.bf16 %v1021_v13, %v1021_v13  ;;  %v9779_v19 = vpop.f32.mrf.mxu0  ;;  %9865 = vmatprep.mubr.msk.bf16.mxu0 %vm11131_vm2, %v13196_v24  ;;  %9974 = vmatpush3.bf16.msra.mxu0 %v10777_v6 }
 0x114   : > { %v9065_v1 = vpack.c.bf16 %v1196_v59, %v1196_v59  ;;  %v9066_v2 = vpack.c.bf16 %v1197_v60, %v1197_v60  ;;  %v1377_v3 = vld [vmem:[#allocation2 + $0x22] sm:$0xff]  ;;  %v1378_v4 = vld [vmem:[#allocation2 + $0x2a] sm:$0xff]  ;;  %988 = vst.msk [vmem:[#allocation2 + $0x48] sm:$0xff] %vm978_vm3, %v955_v61  ;;  %993 = vst.msk [vmem:[#allocation2 + $0x70] sm:$0xff] %vm978_vm3, %v960_v9  ;;  %9802 = vmatmul.mubr.msk.bf16.vlgmr.msra.gmra.mxu1 %vm978_vm3, %v10749_v10  ;;  %v927_v25 = vadd.f32 %v11364_v33, %v888_v16 }
 0x115   : > { %v9095_v7 = vpack.c.bf16 %v1377_v3, %v1377_v3  ;;  %v9096_v8 = vpack.c.bf16 %v1378_v4, %v1378_v4  ;;  %1167 = vst.msk [vmem:[#allocation3 + $0x14] sm:$0xf] %vm1161_vm4, %v9036_v0  ;;  %9914 = vmatpush3.bf16.msra.mxu1 %v10751_v57  ;;  %v893_v26 = vmul.f32 %v9779_v19, %v11359_v31  ;;  %1172 = vst.msk [vmem:[#allocation3 + $0x28] sm:$0xf] %vm1161_vm4, %v9041_v17  ;;  %v805_v36 = vpop.f32.mrf.mxu0  ;;  %v10753_v62 = vld [vmem:[#allocation3 + $0x8] sm:$0xff]   ;;  %v10782_v16 = vld [vmem:[%s13181_s4 + $0x60] sm:$0xff]  }
 0x116   : > { %1347 = vst.msk [vmem:[#allocation3 + $0x88] sm:$0xf] %vm1161_vm4, %v9065_v1  ;;  %1348 = vst.msk [vmem:[#allocation3 + $0x8c] sm:$0xf] %vm1161_vm4, %v9066_v2  ;;  %v1019_v21 = vld [vmem:[#allocation2 + $0x40] sm:$0xff]  ;;  %v1022_v30 = vld [vmem:[#allocation2 + $0x58] sm:$0xff]  ;;  %9805 = vmatprep.mubr.msk.bf16.mxu1 %vm11131_vm2, %v13196_v24  ;;  %9915 = vmatprep.subr.bf16.mxu1 %v13196_v24  ;;  %v891_v44 = vmul.f32 %v11359_v31, %v805_v36 }
 0x117   : > { %1528 = vst.msk [vmem:[#allocation3 + $0x100] sm:$0xf] %vm1161_vm4, %v9095_v7  ;;  %1529 = vst.msk [vmem:[#allocation3 + $0x104] sm:$0xf] %vm1161_vm4, %v9096_v8  ;;  %v1199_v22 = vld [vmem:[#allocation2 + $0x39] sm:$0xff]  ;;  %v9039_v27 = vpack.c.bf16 %v1019_v21, %v1019_v21  ;;  %v1202_v32 = vld [vmem:[#allocation2 + $0x51] sm:$0xff]  ;;  %v9042_v37 = vpack.c.bf16 %v1022_v30, %v1022_v30  ;;  %v932_v43 = vadd.f32 %v11364_v33, %v893_v26  ;;  %v9780_v45 = vpop.f32.mrf.mxu0  ;;  %9975 = vmatprep.subr.bf16.mxu0 %v13196_v24 }
 0x118   : > { %v1380_v23 = vld [vmem:[#allocation2 + $0x3a] sm:$0xff]  ;;  %991 = vst.msk [vmem:[#allocation2 + $0x60] sm:$0xff] %vm978_vm3, %v958_v14  ;;  %v9068_v28 = vpack.c.bf16 %v1199_v22, %v1199_v22  ;;  %v1383_v34 = vld [vmem:[#allocation2 + $0x52] sm:$0xff]  ;;  %v961_v35 = vmax.f32 %v929_v18, 0.0  ;;  %v9071_v38 = vpack.c.bf16 %v1202_v32, %v1202_v32  ;;  %v959_v40 = vmax.f32 %v927_v25, 0.0  ;;  %9976 = vmatpush3.bf16.msra.mxu0 %v10778_v41 }
 0x119   : > { %v9098_v29 = vpack.c.bf16 %v1380_v23, %v1380_v23  ;;  %v9101_v39 = vpack.c.bf16 %v1383_v34, %v1383_v34  ;;  %1170 = vst.msk [vmem:[#allocation3 + $0x20] sm:$0xf] %vm1161_vm4, %v9039_v27  ;;  %v10752_v42 = vld [vmem:[#allocation3 + $0x80] sm:$0xff]   ;;  %1173 = vst.msk [vmem:[#allocation3 + $0x2c] sm:$0xf] %vm1161_vm4, %v9042_v37  ;;  %v894_v50 = vmul.f32 %v9780_v45, %v11359_v31  ;;  %9916 = vmatpush3.bf16.msra.mxu1 %v10758_v20  ;;  %v808_v58 = vpop.f32.mrf.mxu0 }
 0x11a   : > { %1350 = vst.msk [vmem:[#allocation3 + $0x94] sm:$0xf] %vm1161_vm4, %v9068_v28  ;;  %1353 = vst.msk [vmem:[#allocation3 + $0xa0] sm:$0xf] %vm1161_vm4, %v9071_v38  ;;  %v964_v57 = vmax.f32 %v932_v43, 0.0  ;;  %9917 = vmatprep.subr.bf16.mxu1 %v13196_v24  ;;  %v930_v63 = vadd.f32 %v11364_v33, %v891_v44  ;;  %v892_v5 = vmul.f32 %v11359_v31, %v808_v58  ;;  %9977 = vmatprep.subr.bf16.mxu0 %v13196_v24 }
 0x11b   : > { %1531 = vst.msk [vmem:[#allocation3 + $0x10c] sm:$0xf] %vm1161_vm4, %v9098_v29  ;;  %1534 = vst.msk [vmem:[#allocation3 + $0x118] sm:$0xf] %vm1161_vm4, %v9101_v39  ;;  %v1020_v47 = vld [vmem:[#allocation2 + $0x48] sm:$0xff]  ;;  %v1025_v61 = vld [vmem:[#allocation2 + $0x70] sm:$0xff]  ;;  %v933_v0 = vadd.f32 %v11364_v33, %v894_v50  ;;  %v9783_v6 = vpop.f32.mrf.mxu0  ;;  %9866 = vmatmul.mubr.msk.bf16.gmra.mxu0 %vm978_vm3, %v10753_v62 }
 0x11c   : > { %994 = vst.msk [vmem:[#allocation2 + $0x78] sm:$0xff] %vm978_vm3, %v961_v35  ;;  %v1200_v48 = vld [vmem:[#allocation2 + $0x41] sm:$0xff]  ;;  %v1201_v49 = vld [vmem:[#allocation2 + $0x49] sm:$0xff]  ;;  %992 = vst.msk [vmem:[#allocation2 + $0x68] sm:$0xff] %vm978_vm3, %v959_v40  ;;  %v9040_v52 = vpack.c.bf16 %v1020_v47, %v1020_v47  ;;  %v9045_v1 = vpack.c.bf16 %v1025_v61, %v1025_v61  ;;  %9806 = vmatmul.mubr.msk.bf16.gmra.mxu1 %vm978_vm3, %v10752_v42  ;;  %v962_v10 = vmax.f32 %v930_v63, 0.0  ;;  %9869 = vmatprep.mubr.msk.bf16.mxu0 %vm11131_vm2, %v13196_v24 }
 0x11d   : > { %v9069_v53 = vpack.c.bf16 %v1200_v48, %v1200_v48  ;;  %v9070_v54 = vpack.c.bf16 %v1201_v49, %v1201_v49  ;;  %v1381_v55 = vld [vmem:[#allocation2 + $0x42] sm:$0xff]  ;;  %v1382_v56 = vld [vmem:[#allocation2 + $0x4a] sm:$0xff]  ;;  %997 = vst.msk [vmem:[#allocation2 + $0x90] sm:$0xff] %vm978_vm3, %v964_v57  ;;  %9809 = vmatprep.mubr.msk.bf16.mxu1 %vm11131_vm2, %v13196_v24  ;;  %v965_v12 = vmax.f32 %v933_v0, 0.0  ;;  %v931_v13 = vadd.f32 %v11364_v33, %v892_v5  ;;  %v821_v15 = vpop.f32.mrf.mxu0 }
 0x11e   : > { %v9099_v59 = vpack.c.bf16 %v1381_v55, %v1381_v55  ;;  %v9100_v60 = vpack.c.bf16 %v1382_v56, %v1382_v56  ;;  %1171 = vst.msk [vmem:[#allocation3 + $0x24] sm:$0xf] %vm1161_vm4, %v9040_v52  ;;  %1176 = vst.msk [vmem:[#allocation3 + $0x38] sm:$0xf] %vm1161_vm4, %v9045_v1  ;;  %v897_v14 = vmul.f32 %v9783_v6, %v11359_v31  ;;  %9918 = vmatpush3.bf16.msra.mxu1 %v10765_v46  ;;  %v10754_v28 = vld [vmem:[#allocation3 + $0x88] sm:$0xff]   ;;  %v10755_v41 = vld [vmem:[#allocation3 + $0x10] sm:$0xff]  }
 0x11f   : > { %1351 = vst.msk [vmem:[#allocation3 + $0x98] sm:$0xf] %vm1161_vm4, %v9069_v53  ;;  %1352 = vst.msk [vmem:[#allocation3 + $0x9c] sm:$0xf] %vm1161_vm4, %v9070_v54  ;;  %v1023_v2 = vld [vmem:[#allocation2 + $0x60] sm:$0xff]  ;;  %v895_v20 = vmul.f32 %v11359_v31, %v821_v15  ;;  %9919 = vmatprep.subr.bf16.mxu1 %v13196_v24  ;;  %9978 = vmatpush3.bf16.msra.mxu0 %v10781_v51  ;;  %v963_v29 = vmax.f32 %v931_v13, 0.0  ;;  %v9784_v30 = vpop.f32.mrf.mxu0 }
 0x120   : > { %v1203_v3 = vld [vmem:[#allocation2 + $0x59] sm:$0xff]  ;;  %1532 = vst.msk [vmem:[#allocation3 + $0x110] sm:$0xf] %vm1161_vm4, %v9099_v59  ;;  %1533 = vst.msk [vmem:[#allocation3 + $0x114] sm:$0xf] %vm1161_vm4, %v9100_v60  ;;  %v9043_v7 = vpack.c.bf16 %v1023_v2, %v1023_v2  ;;  %9979 = vmatprep.subr.bf16.mxu0 %v13196_v24  ;;  %v936_v38 = vadd.f32 %v11364_v33, %v897_v14  ;;  %v898_v43 = vmul.f32 %v9784_v30, %v11359_v31 }
 0x121   : > { %v1384_v4 = vld [vmem:[#allocation2 + $0x5a] sm:$0xff]  ;;  %v9072_v8 = vpack.c.bf16 %v1203_v3, %v1203_v3  ;;  %995 = vst.msk [vmem:[#allocation2 + $0x80] sm:$0xff] %vm978_vm3, %v962_v10  ;;  %998 = vst.msk [vmem:[#allocation2 + $0x98] sm:$0xff] %vm978_vm3, %v965_v12  ;;  %v934_v42 = vadd.f32 %v11364_v33, %v895_v20  ;;  %v824_v44 = vpop.f32.mrf.mxu0  ;;  %v10756_v5 = vld [vmem:[#allocation3 + $0x90] sm:$0xff]  }
 0x122   : > { %v9102_v9 = vpack.c.bf16 %v1384_v4, %v1384_v4  ;;  %1174 = vst.msk [vmem:[#allocation3 + $0x30] sm:$0xf] %vm1161_vm4, %v9043_v7  ;;  %9920 = vmatpush3.bf16.msra.mxu1 %v10772_v11  ;;  %v968_v46 = vmax.f32 %v936_v38, 0.0  ;;  %v896_v47 = vmul.f32 %v11359_v31, %v824_v44  ;;  %v937_v50 = vadd.f32 %v11364_v33, %v898_v43 }
 0x123   : > { %1354 = vst.msk [vmem:[#allocation3 + $0xa4] sm:$0xf] %vm1161_vm4, %v9072_v8  ;;  %v1026_v17 = vld [vmem:[#allocation2 + $0x78] sm:$0xff]  ;;  %v1024_v25 = vld [vmem:[#allocation2 + $0x68] sm:$0xff]  ;;  %9980 = vmatpush3.bf16.msra.mxu0 %v10782_v16  ;;  %10033 = vmatprep.subr.bf16.mxu1 %v13196_v24  ;;  %v966_v49 = vmax.f32 %v934_v42, 0.0  ;;  %v9787_v51 = vpop.f32.mrf.mxu0 }
 0x124   : > { %1535 = vst.msk [vmem:[#allocation3 + $0x11c] sm:$0xf] %vm1161_vm4, %v9102_v9  ;;  %v1206_v18 = vld [vmem:[#allocation2 + $0x71] sm:$0xff]  ;;  %v9046_v21 = vpack.c.bf16 %v1026_v17, %v1026_v17  ;;  %v1204_v26 = vld [vmem:[#allocation2 + $0x61] sm:$0xff]  ;;  %v1205_v27 = vld [vmem:[#allocation2 + $0x69] sm:$0xff]  ;;  %v9044_v32 = vpack.c.bf16 %v1024_v25, %v1024_v25  ;;  %9810 = vmatmul.mubr.msk.bf16.gmra.mxu1 %vm978_vm3, %v10754_v28  ;;  %10093 = vmatprep.subr.bf16.mxu0 %v13196_v24  ;;  %v969_v57 = vmax.f32 %v937_v50, 0.0 }
 0x125   : > { %v1387_v19 = vld [vmem:[#allocation2 + $0x72] sm:$0xff]  ;;  %v9075_v22 = vpack.c.bf16 %v1206_v18, %v1206_v18  ;;  %v9073_v34 = vpack.c.bf16 %v1204_v26, %v1204_v26  ;;  %v9074_v35 = vpack.c.bf16 %v1205_v27, %v1205_v27  ;;  %v1385_v36 = vld [vmem:[#allocation2 + $0x62] sm:$0xff]  ;;  %v1386_v37 = vld [vmem:[#allocation2 + $0x6a] sm:$0xff]  ;;  %996 = vst.msk [vmem:[#allocation2 + $0x88] sm:$0xff] %vm978_vm3, %v963_v29  ;;  %9870 = vmatmul.mubr.msk.bf16.gmra.mxu0 %vm978_vm3, %v10755_v41  ;;  %v837_v58 = vpop.f32.mrf.mxu0 }
 0x126   : > { %v9105_v23 = vpack.c.bf16 %v1387_v19, %v1387_v19  ;;  %1177 = vst.msk [vmem:[#allocation3 + $0x3c] sm:$0xf] %vm1161_vm4, %v9046_v21  ;;  %v9103_v39 = vpack.c.bf16 %v1385_v36, %v1385_v36  ;;  %v9104_v40 = vpack.c.bf16 %v1386_v37, %v1386_v37  ;;  %1175 = vst.msk [vmem:[#allocation3 + $0x34] sm:$0xf] %vm1161_vm4, %v9044_v32  ;;  %v1029_v45 = vld [vmem:[#allocation2 + $0x90] sm:$0xff]  ;;  %9813 = vmatprep.mubr.msk.bf16.mxu1 %vm11131_vm2, %v13196_v24 }
 0x127   : > { %1357 = vst.msk [vmem:[#allocation3 + $0xb0] sm:$0xf] %vm1161_vm4, %v9075_v22  ;;  %1355 = vst.msk [vmem:[#allocation3 + $0xa8] sm:$0xf] %vm1161_vm4, %v9073_v34  ;;  %v9049_v48 = vpack.c.bf16 %v1029_v45, %v1029_v45  ;;  %v935_v52 = vadd.f32 %v11364_v33, %v896_v47  ;;  %v901_v53 = vmul.f32 %v9787_v51, %v11359_v31  ;;  %9873 = vmatprep.mubr.msk.bf16.mxu0 %vm11131_vm2, %v13196_v24  ;;  %v9788_v7 = vpop.f32.mrf.mxu0  ;;  %v10757_v22 = vld [vmem:[#allocation3 + $0x18] sm:$0xff]  }
 0x128   : > { %1538 = vst.msk [vmem:[#allocation3 + $0x128] sm:$0xf] %vm1161_vm4, %v9105_v23  ;;  %1356 = vst.msk [vmem:[#allocation3 + $0xac] sm:$0xf] %vm1161_vm4, %v9074_v35  ;;  %v1027_v54 = vld [vmem:[#allocation2 + $0x80] sm:$0xff]  ;;  %v1030_v62 = vld [vmem:[#allocation2 + $0x98] sm:$0xff]  ;;  %v899_v11 = vmul.f32 %v11359_v31, %v837_v58  ;;  %v902_v12 = vmul.f32 %v9788_v7, %v11359_v31 }
 0x129   : > { %1536 = vst.msk [vmem:[#allocation3 + $0x120] sm:$0xf] %vm1161_vm4, %v9103_v39  ;;  %1537 = vst.msk [vmem:[#allocation3 + $0x124] sm:$0xf] %vm1161_vm4, %v9104_v40  ;;  %v1207_v55 = vld [vmem:[#allocation2 + $0x79] sm:$0xff]  ;;  %v9047_v59 = vpack.c.bf16 %v1027_v54, %v1027_v54  ;;  %v1210_v63 = vld [vmem:[#allocation2 + $0x91] sm:$0xff]  ;;  %v9050_v2 = vpack.c.bf16 %v1030_v62, %v1030_v62  ;;  %v940_v6 = vadd.f32 %v11364_v33, %v901_v53  ;;  %v840_v19 = vpop.f32.mrf.mxu0 }
 0x12a   : > { %1001 = vst.msk [vmem:[#allocation2 + $0xb0] sm:$0xff] %vm978_vm3, %v968_v46  ;;  %v1388_v56 = vld [vmem:[#allocation2 + $0x7a] sm:$0xff]  ;;  %999 = vst.msk [vmem:[#allocation2 + $0xa0] sm:$0xff] %vm978_vm3, %v966_v49  ;;  %v9076_v60 = vpack.c.bf16 %v1207_v55, %v1207_v55  ;;  %v1391_v0 = vld [vmem:[#allocation2 + $0x92] sm:$0xff]  ;;  %v967_v1 = vmax.f32 %v935_v52, 0.0  ;;  %v9079_v3 = vpack.c.bf16 %v1210_v63, %v1210_v63  ;;  %v938_v23 = vadd.f32 %v11364_v33, %v899_v11 }
 0x12b   : > { %1180 = vst.msk [vmem:[#allocation3 + $0x48] sm:$0xf] %vm1161_vm4, %v9049_v48  ;;  %v9106_v61 = vpack.c.bf16 %v1388_v56, %v1388_v56  ;;  %v9109_v4 = vpack.c.bf16 %v1391_v0, %v1391_v0  ;;  %1178 = vst.msk [vmem:[#allocation3 + $0x40] sm:$0xf] %vm1161_vm4, %v9047_v59  ;;  %v972_v18 = vmax.f32 %v940_v6, 0.0  ;;  %v941_v25 = vadd.f32 %v11364_v33, %v902_v12  ;;  %v9791_v28 = vpop.f32.mrf.mxu0  ;;  %v10759_v48 = vld [vmem:[#allocation3 + $0x98] sm:$0xff]  }
 0x12c   : > { %1002 = vst.msk [vmem:[#allocation2 + $0xb8] sm:$0xff] %vm978_vm3, %v969_v57  ;;  %v1028_v8 = vld [vmem:[#allocation2 + $0x88] sm:$0xff]  ;;  %1000 = vst.msk [vmem:[#allocation2 + $0xa8] sm:$0xff] %vm978_vm3, %v967_v1  ;;  %9814 = vmatmul.mubr.msk.bf16.gmra.mxu1 %vm978_vm3, %v10756_v5  ;;  %v900_v27 = vmul.f32 %v11359_v31, %v840_v19  ;;  %v970_v35 = vmax.f32 %v938_v23, 0.0  ;;  %v905_v37 = vmul.f32 %v9791_v28, %v11359_v31  ;;  %v10761_v12 = vld [vmem:[#allocation3 + $0xa0] sm:$0xff]  }
 0x12d   : > { %1358 = vst.msk [vmem:[#allocation3 + $0xb4] sm:$0xf] %vm1161_vm4, %v9076_v60  ;;  %1539 = vst.msk [vmem:[#allocation3 + $0x12c] sm:$0xf] %vm1161_vm4, %v9106_v61  ;;  %v1208_v9 = vld [vmem:[#allocation2 + $0x81] sm:$0xff]  ;;  %v1209_v10 = vld [vmem:[#allocation2 + $0x89] sm:$0xff]  ;;  %v9048_v13 = vpack.c.bf16 %v1028_v8, %v1028_v8  ;;  %9874 = vmatmul.mubr.msk.bf16.gmra.mxu0 %vm978_vm3, %v10757_v22  ;;  %9817 = vmatprep.mubr.msk.bf16.mxu1 %vm11131_vm2, %v13196_v24  ;;  %v853_v42 = vpop.f32.mrf.mxu0 }
 0x12e   : > { %1181 = vst.msk [vmem:[#allocation3 + $0x4c] sm:$0xf] %vm1161_vm4, %v9050_v2  ;;  %1361 = vst.msk [vmem:[#allocation3 + $0xc0] sm:$0xf] %vm1161_vm4, %v9079_v3  ;;  %v9077_v14 = vpack.c.bf16 %v1208_v9, %v1208_v9  ;;  %v9078_v15 = vpack.c.bf16 %v1209_v10, %v1209_v10  ;;  %v1389_v16 = vld [vmem:[#allocation2 + $0x82] sm:$0xff]  ;;  %v1390_v17 = vld [vmem:[#allocation2 + $0x8a] sm:$0xff]  ;;  %9877 = vmatprep.mubr.msk.bf16.mxu0 %vm11131_vm2, %v13196_v24  ;;  %v939_v41 = vadd.f32 %v11364_v33, %v900_v27 }
 0x12f   : > { %1542 = vst.msk [vmem:[#allocation3 + $0x138] sm:$0xf] %vm1161_vm4, %v9109_v4  ;;  %v9107_v20 = vpack.c.bf16 %v1389_v16, %v1389_v16  ;;  %v9108_v21 = vpack.c.bf16 %v1390_v17, %v1390_v17  ;;  %1179 = vst.msk [vmem:[#allocation3 + $0x44] sm:$0xf] %vm1161_vm4, %v9048_v13  ;;  %v973_v36 = vmax.f32 %v941_v25, 0.0  ;;  %v944_v46 = vadd.f32 %v11364_v33, %v905_v37  ;;  %v10760_v61 = vld [vmem:[#allocation3 + $0x20] sm:$0xff]  }
 0x130   : > { %1359 = vst.msk [vmem:[#allocation3 + $0xb8] sm:$0xf] %vm1161_vm4, %v9077_v14  ;;  %1360 = vst.msk [vmem:[#allocation3 + $0xbc] sm:$0xf] %vm1161_vm4, %v9078_v15  ;;  %v903_v47 = vmul.f32 %v11359_v31, %v853_v42  ;;  %v971_v55 = vmax.f32 %v939_v41, 0.0  ;;  %v10762_v25 = vld [vmem:[#allocation3 + $0x28] sm:$0xff]  }
 0x131   : > { %v1033_v26 = vld [vmem:[#allocation2 + $0xb0] sm:$0xff]  ;;  %1005 = vst.msk [vmem:[#allocation2 + $0xd0] sm:$0xff] %vm978_vm3, %v972_v18  ;;  %v1031_v30 = vld [vmem:[#allocation2 + $0xa0] sm:$0xff]  ;;  %1003 = vst.msk [vmem:[#allocation2 + $0xc0] sm:$0xff] %vm978_vm3, %v970_v35  ;;  %v976_v31 = vmax.f32 %v944_v46, 0.0 }
 0x132   : > { %1540 = vst.msk [vmem:[#allocation3 + $0x130] sm:$0xf] %vm1161_vm4, %v9107_v20  ;;  %1541 = vst.msk [vmem:[#allocation3 + $0x134] sm:$0xf] %vm1161_vm4, %v9108_v21  ;;  %v9053_v29 = vpack.c.bf16 %v1033_v26, %v1033_v26  ;;  %v1211_v32 = vld [vmem:[#allocation2 + $0x99] sm:$0xff]  ;;  %v9051_v38 = vpack.c.bf16 %v1031_v30, %v1031_v30  ;;  %v942_v0 = vadd.f32 %v11364_v33, %v903_v47  ;;  %v10764_v37 = vld [vmem:[#allocation3 + $0x30] sm:$0xff]  }
 0x133   : > { %v1392_v34 = vld [vmem:[#allocation2 + $0x9a] sm:$0xff]  ;;  %v9080_v39 = vpack.c.bf16 %v1211_v32, %v1211_v32  ;;  %v1214_v44 = vld [vmem:[#allocation2 + $0xb1] sm:$0xff]  ;;  %1006 = vst.msk [vmem:[#allocation2 + $0xd8] sm:$0xff] %vm978_vm3, %v973_v36  ;;  %v1032_v52 = vld [vmem:[#allocation2 + $0xa8] sm:$0xff] }
 0x134   : > { %v9110_v40 = vpack.c.bf16 %v1392_v34, %v1392_v34  ;;  %1184 = vst.msk [vmem:[#allocation3 + $0x58] sm:$0xf] %vm1161_vm4, %v9053_v29  ;;  %v1034_v43 = vld [vmem:[#allocation2 + $0xb8] sm:$0xff]  ;;  %1182 = vst.msk [vmem:[#allocation3 + $0x50] sm:$0xf] %vm1161_vm4, %v9051_v38  ;;  %v9083_v50 = vpack.c.bf16 %v1214_v44, %v1214_v44  ;;  %v1212_v53 = vld [vmem:[#allocation2 + $0xa1] sm:$0xff]  ;;  %v9052_v56 = vpack.c.bf16 %v1032_v52, %v1032_v52  ;;  %9818 = vmatmul.mubr.msk.bf16.gmra.mxu1 %vm978_vm3, %v10759_v48 }
 0x135   : > { %v1395_v45 = vld [vmem:[#allocation2 + $0xb2] sm:$0xff]  ;;  %1362 = vst.msk [vmem:[#allocation3 + $0xc4] sm:$0xf] %vm1161_vm4, %v9080_v39  ;;  %v9054_v49 = vpack.c.bf16 %v1034_v43, %v1034_v43  ;;  %v1213_v54 = vld [vmem:[#allocation2 + $0xa9] sm:$0xff]  ;;  %v9081_v57 = vpack.c.bf16 %v1212_v53, %v1212_v53  ;;  %v974_v3 = vmax.f32 %v942_v0, 0.0  ;;  %9878 = vmatmul.mubr.msk.bf16.gmra.mxu0 %vm978_vm3, %v10760_v61  ;;  %9821 = vmatprep.mubr.msk.bf16.mxu1 %vm11131_vm2, %v13196_v24 }
 0x136   : > { %1543 = vst.msk [vmem:[#allocation3 + $0x13c] sm:$0xf] %vm1161_vm4, %v9110_v40  ;;  %v9113_v51 = vpack.c.bf16 %v1395_v45, %v1395_v45  ;;  %v9082_v58 = vpack.c.bf16 %v1213_v54, %v1213_v54  ;;  %v1393_v59 = vld [vmem:[#allocation2 + $0xa2] sm:$0xff]  ;;  %v1394_v60 = vld [vmem:[#allocation2 + $0xaa] sm:$0xff]  ;;  %1365 = vst.msk [vmem:[#allocation3 + $0xd0] sm:$0xf] %vm1161_vm4, %v9083_v50  ;;  %9881 = vmatprep.mubr.msk.bf16.mxu0 %vm11131_vm2, %v13196_v24  ;;  %v9792_v40 = vpop.f32.mrf.mxu0 }
 0x137   : > { %1185 = vst.msk [vmem:[#allocation3 + $0x5c] sm:$0xf] %vm1161_vm4, %v9054_v49  ;;  %v9111_v62 = vpack.c.bf16 %v1393_v59, %v1393_v59  ;;  %v9112_v63 = vpack.c.bf16 %v1394_v60, %v1394_v60  ;;  %1183 = vst.msk [vmem:[#allocation3 + $0x54] sm:$0xf] %vm1161_vm4, %v9052_v56  ;;  %v10763_v36 = vld [vmem:[#allocation3 + $0xa8] sm:$0xff]   ;;  %v10766_v38 = vld [vmem:[#allocation3 + $0xb0] sm:$0xff]  }
 0x138   : > { %1546 = vst.msk [vmem:[#allocation3 + $0x148] sm:$0xf] %vm1161_vm4, %v9113_v51  ;;  %1363 = vst.msk [vmem:[#allocation3 + $0xc8] sm:$0xf] %vm1161_vm4, %v9081_v57  ;;  %v1037_v1 = vld [vmem:[#allocation2 + $0xd0] sm:$0xff]  ;;  %v1035_v33 = vld [vmem:[#allocation2 + $0xc0] sm:$0xff]  ;;  %v856_v42 = vpop.f32.mrf.mxu0 }
 0x139   : > { %1004 = vst.msk [vmem:[#allocation2 + $0xc8] sm:$0xff] %vm978_vm3, %v971_v55  ;;  %1009 = vst.msk [vmem:[#allocation2 + $0xf0] sm:$0xff] %vm978_vm3, %v976_v31  ;;  %v9057_v2 = vpack.c.bf16 %v1037_v1, %v1037_v1  ;;  %v1215_v4 = vld [vmem:[#allocation2 + $0xb9] sm:$0xff]  ;;  %v9055_v6 = vpack.c.bf16 %v1035_v33, %v1035_v33  ;;  %v10771_v50 = vld [vmem:[#allocation3 + $0x48] sm:$0xff]  }
 0x13a   : > { %1364 = vst.msk [vmem:[#allocation3 + $0xcc] sm:$0xf] %vm1161_vm4, %v9082_v58  ;;  %1544 = vst.msk [vmem:[#allocation3 + $0x140] sm:$0xf] %vm1161_vm4, %v9111_v62  ;;  %v1396_v5 = vld [vmem:[#allocation2 + $0xba] sm:$0xff]  ;;  %v9084_v7 = vpack.c.bf16 %v1215_v4, %v1215_v4  ;;  %v1218_v10 = vld [vmem:[#allocation2 + $0xd1] sm:$0xff] }
 0x13b   : > { %1545 = vst.msk [vmem:[#allocation3 + $0x144] sm:$0xf] %vm1161_vm4, %v9112_v63  ;;  %1188 = vst.msk [vmem:[#allocation3 + $0x68] sm:$0xf] %vm1161_vm4, %v9057_v2  ;;  %v9114_v8 = vpack.c.bf16 %v1396_v5, %v1396_v5  ;;  %v1038_v9 = vld [vmem:[#allocation2 + $0xd8] sm:$0xff]  ;;  %v9087_v14 = vpack.c.bf16 %v1218_v10, %v1218_v10  ;;  %v10769_v47 = vld [vmem:[#allocation3 + $0x40] sm:$0xff]  }
 0x13c   : > { %1007 = vst.msk [vmem:[#allocation2 + $0xe0] sm:$0xff] %vm978_vm3, %v974_v3  ;;  %v1399_v11 = vld [vmem:[#allocation2 + $0xd2] sm:$0xff]  ;;  %v9058_v13 = vpack.c.bf16 %v1038_v9, %v1038_v9  ;;  %9822 = vmatmul.mubr.msk.bf16.gmra.mxu1 %vm978_vm3, %v10761_v12  ;;  %v11066_v41 = vld [vmem:[%s13179_s2] ss:$0 sm:$0xff]  ;;  %v10784_v33 = vld [vmem:[#allocation3 + $0x8] sm:$0xff]  }
 0x13d   : > { %v9117_v15 = vpack.c.bf16 %v1399_v11, %v1399_v11  ;;  %1186 = vst.msk [vmem:[#allocation3 + $0x60] sm:$0xf] %vm1161_vm4, %v9055_v6  ;;  %1366 = vst.msk [vmem:[#allocation3 + $0xd4] sm:$0xf] %vm1161_vm4, %v9084_v7  ;;  %9882 = vmatmul.mubr.msk.bf16.gmra.mxu0 %vm978_vm3, %v10762_v25  ;;  %9825 = vmatprep.mubr.msk.bf16.mxu1 %vm11131_vm2, %v13196_v24  ;;  %v10767_v39 = vld [vmem:[#allocation3 + $0x38] sm:$0xff]   ;;  %v904_v44 = vmul.f32 %v11066_v41, %v856_v42  ;;  %v10770_v49 = vld [vmem:[#allocation3 + $0xc0] sm:$0xff]  }
 0x13e   : > { %1547 = vst.msk [vmem:[#allocation3 + $0x14c] sm:$0xf] %vm1161_vm4, %v9114_v8  ;;  %1189 = vst.msk [vmem:[#allocation3 + $0x6c] sm:$0xf] %vm1161_vm4, %v9058_v13  ;;  %9885 = vmatprep.mubr.msk.bf16.mxu0 %vm11131_vm2, %v13196_v24  ;;  %v11067_v43 = vld [vmem:[%s13180_s3] ss:$0 sm:$0xff] }
 0x13f   : > { %1369 = vst.msk [vmem:[#allocation3 + $0xe0] sm:$0xf] %vm1161_vm4, %v9087_v14  ;;  %1550 = vst.msk [vmem:[#allocation3 + $0x158] sm:$0xf] %vm1161_vm4, %v9117_v15  ;;  %v10768_v45 = vld [vmem:[#allocation3 + $0xb8] sm:$0xff]   ;;  %v943_v46 = vadd.f32 %v11067_v43, %v904_v44  ;;  %v10774_v61 = vld [vmem:[#allocation3 + $0x50] sm:$0xff]  }
 0x140   : > { %v1036_v16 = vld [vmem:[#allocation2 + $0xc8] sm:$0xff]  ;;  %v10776_v63 = vld [vmem:[#allocation3 + $0x58] sm:$0xff]   ;;  %v10783_v3 = vld [vmem:[#allocation3 + $0xf0] sm:$0xff]  }
 0x141   : > { %v1216_v17 = vld [vmem:[#allocation2 + $0xc1] sm:$0xff]  ;;  %v1217_v18 = vld [vmem:[#allocation2 + $0xc9] sm:$0xff]  ;;  %v9056_v19 = vpack.c.bf16 %v1036_v16, %v1036_v16  ;;  %v975_v48 = vmax.f32 %v943_v46, 0.0  ;;  %v10785_v2 = vld [vmem:[%s13181_s4 + $0x98] sm:$0xff]  }
 0x142   : > { %v9085_v20 = vpack.c.bf16 %v1216_v17, %v1216_v17  ;;  %v9086_v21 = vpack.c.bf16 %v1217_v18, %v1217_v18  ;;  %v1397_v22 = vld [vmem:[#allocation2 + $0xc2] sm:$0xff]  ;;  %v1398_v23 = vld [vmem:[#allocation2 + $0xca] sm:$0xff]  ;;  %v10811_v4 = vld [vmem:[%s13181_s4 + $0xb8] sm:$0xff]  }
 0x143   : > { %v9115_v26 = vpack.c.bf16 %v1397_v22, %v1397_v22  ;;  %v9116_v27 = vpack.c.bf16 %v1398_v23, %v1398_v23  ;;  %1187 = vst.msk [vmem:[#allocation3 + $0x64] sm:$0xf] %vm1161_vm4, %v9056_v19  ;;  %v1039_v28 = vld [vmem:[#allocation2 + $0xe0] sm:$0xff]  ;;  %v10773_v31 = vld [vmem:[#allocation3 + $0xc8] sm:$0xff]   ;;  %v10792_v5 = vld [vmem:[%s13181_s4 + $0x90] sm:$0xff]  }
 0x144   : > { %1367 = vst.msk [vmem:[#allocation3 + $0xd8] sm:$0xf] %vm1161_vm4, %v9085_v20  ;;  %1368 = vst.msk [vmem:[#allocation3 + $0xdc] sm:$0xf] %vm1161_vm4, %v9086_v21  ;;  %v1219_v29 = vld [vmem:[#allocation2 + $0xd9] sm:$0xff]  ;;  %v9059_v32 = vpack.c.bf16 %v1039_v28, %v1039_v28  ;;  %9826 = vmatmul.mubr.msk.bf16.gmra.mxu1 %vm978_vm3, %v10763_v36  ;;  %v10775_v62 = vld [vmem:[#allocation3 + $0xd0] sm:$0xff]  }
 0x145   : > { %1548 = vst.msk [vmem:[#allocation3 + $0x150] sm:$0xf] %vm1161_vm4, %v9115_v26  ;;  %1549 = vst.msk [vmem:[#allocation3 + $0x154] sm:$0xf] %vm1161_vm4, %v9116_v27  ;;  %v1400_v30 = vld [vmem:[#allocation2 + $0xda] sm:$0xff]  ;;  %v9088_v34 = vpack.c.bf16 %v1219_v29, %v1219_v29  ;;  %9886 = vmatmul.mubr.msk.bf16.gmra.mxu0 %vm978_vm3, %v10764_v37  ;;  %9829 = vmatprep.mubr.msk.bf16.mxu1 %vm11131_vm2, %v13196_v24  ;;  %v10812_v6 = vld [vmem:[%s13181_s4 + $0xb0] sm:$0xff]  }
 0x146   : > { %v9118_v35 = vpack.c.bf16 %v1400_v30, %v1400_v30  ;;  %1190 = vst.msk [vmem:[#allocation3 + $0x70] sm:$0xf] %vm1161_vm4, %v9059_v32  ;;  %9889 = vmatprep.mubr.msk.bf16.mxu0 %vm11131_vm2, %v13196_v24  ;;  %v10786_v7 = vld [vmem:[#allocation3 + $0xf8] sm:$0xff]   ;;  %v10787_v8 = vld [vmem:[#allocation3 + $0x10] sm:$0xff]   ;;  %v10799_v9 = vld [vmem:[%s13181_s4 + $0x88] sm:$0xff]  }
 0x147   : > { %1370 = vst.msk [vmem:[#allocation3 + $0xe4] sm:$0xf] %vm1161_vm4, %v9088_v34  ;;  %v10815_v10 = vld [vmem:[%s13181_s4 + $0xa8] sm:$0xff]   ;;  %v10806_v11 = vld [vmem:[%s13181_s4 + $0x80] sm:$0xff]   ;;  %v10789_v14 = vld [vmem:[#allocation3 + $0x18] sm:$0xff]  }
 0x148   : > { %1551 = vst.msk [vmem:[#allocation3 + $0x15c] sm:$0xf] %vm1161_vm4, %v9118_v35  ;;  %v10816_v12 = vld [vmem:[%s13181_s4 + $0xa0] sm:$0xff]   ;;  %v10790_v15 = vld [vmem:[#allocation3 + $0x108] sm:$0xff]   ;;  %v10793_v17 = vld [vmem:[#allocation3 + $0x110] sm:$0xff]  }
 0x149   : > { %1008 = vst.msk [vmem:[#allocation2 + $0xe8] sm:$0xff] %vm978_vm3, %v975_v48  ;;  %v10788_v13 = vld [vmem:[#allocation3 + $0x100] sm:$0xff]   ;;  %v10794_v18 = vld [vmem:[#allocation3 + $0x28] sm:$0xff]   ;;  %v10795_v19 = vld [vmem:[#allocation3 + $0x118] sm:$0xff]  }
 0x14a   : > { %v10780_v1 = vld [vmem:[#allocation3 + $0x60] sm:$0xff]   ;;  %v10796_v20 = vld [vmem:[#allocation3 + $0x30] sm:$0xff]   ;;  %v10798_v22 = vld [vmem:[#allocation3 + $0x38] sm:$0xff]  }
 0x14b   : > { %v10779_v0 = vld [vmem:[#allocation3 + $0xd8] sm:$0xff]   ;;  %v10791_v16 = vld [vmem:[#allocation3 + $0x20] sm:$0xff]   ;;  %v10800_v23 = vld [vmem:[#allocation3 + $0x128] sm:$0xff]  }
 0x14c   : > { %9830 = vmatmul.mubr.msk.bf16.gmra.mxu1 %vm978_vm3, %v10766_v38  ;;  %v10797_v21 = vld [vmem:[#allocation3 + $0x120] sm:$0xff]   ;;  %v10802_v26 = vld [vmem:[#allocation3 + $0x130] sm:$0xff]   ;;  %v10803_v27 = vld [vmem:[#allocation3 + $0x48] sm:$0xff]  }
 0x14d   : > { %9890 = vmatmul.mubr.msk.bf16.gmra.mxu0 %vm978_vm3, %v10767_v39  ;;  %9833 = vmatprep.mubr.msk.bf16.mxu1 %vm11131_vm2, %v13196_v24  ;;  %v10801_v25 = vld [vmem:[#allocation3 + $0x40] sm:$0xff]   ;;  %v10804_v28 = vld [vmem:[#allocation3 + $0x138] sm:$0xff]   ;;  %v10805_v29 = vld [vmem:[#allocation3 + $0x50] sm:$0xff]  }
 0x14e   : > { %9893 = vmatprep.mubr.msk.bf16.mxu0 %vm11131_vm2, %v13196_v24  ;;  %v10807_v30 = vld [vmem:[#allocation3 + $0x140] sm:$0xff]   ;;  %v10808_v32 = vld [vmem:[#allocation3 + $0x58] sm:$0xff]   ;;  %v10809_v34 = vld [vmem:[#allocation3 + $0x148] sm:$0xff]  }
 0x14f   : > { %v10810_v35 = vld [vmem:[#allocation3 + $0x60] sm:$0xff]  }
 0x150   : > { %v1040_v51 = vld [vmem:[#allocation2 + $0xe8] sm:$0xff] }
 0x151   : > { %v1220_v52 = vld [vmem:[#allocation2 + $0xe1] sm:$0xff]  ;;  %v1221_v53 = vld [vmem:[#allocation2 + $0xe9] sm:$0xff]  ;;  %v9060_v54 = vpack.c.bf16 %v1040_v51, %v1040_v51 }
 0x152   : > { %v9089_v55 = vpack.c.bf16 %v1220_v52, %v1220_v52  ;;  %v9090_v56 = vpack.c.bf16 %v1221_v53, %v1221_v53  ;;  %v1401_v57 = vld [vmem:[#allocation2 + $0xe2] sm:$0xff]  ;;  %v1402_v58 = vld [vmem:[#allocation2 + $0xea] sm:$0xff] }
 0x153   : > { %v9119_v59 = vpack.c.bf16 %v1401_v57, %v1401_v57  ;;  %v9120_v60 = vpack.c.bf16 %v1402_v58, %v1402_v58  ;;  %1191 = vst.msk [vmem:[#allocation3 + $0x74] sm:$0xf] %vm1161_vm4, %v9060_v54  ;;  %v10817_v58 = vld [vmem:[#allocation3 + $0x80] sm:$0xff]  }
 0x154   : > { %9834 = vmatmul.mubr.msk.bf16.gmra.mxu1 %vm978_vm3, %v10768_v45  ;;  %1371 = vst.msk [vmem:[#allocation3 + $0xe8] sm:$0xf] %vm1161_vm4, %v9089_v55  ;;  %1372 = vst.msk [vmem:[#allocation3 + $0xec] sm:$0xf] %vm1161_vm4, %v9090_v56  ;;  %v10813_v45 = vld [vmem:[#allocation3 + $0x150] sm:$0xff]   ;;  %v10819_v55 = vld [vmem:[%s13181_s4 + $0xd8] sm:$0xff]  }
 0x155   : > { %9894 = vmatmul.mubr.msk.bf16.gmra.mxu0 %vm978_vm3, %v10769_v47  ;;  %9837 = vmatprep.mubr.msk.bf16.mxu1 %vm11131_vm2, %v13196_v24  ;;  %1552 = vst.msk [vmem:[#allocation3 + $0x160] sm:$0xf] %vm1161_vm4, %v9119_v59  ;;  %1553 = vst.msk [vmem:[#allocation3 + $0x164] sm:$0xf] %vm1161_vm4, %v9120_v60  ;;  %v10814_v47 = vld [vmem:[#allocation3 + $0x68] sm:$0xff]   ;;  %v10818_v60 = vld [vmem:[#allocation3 + $0xf8] sm:$0xff]  }
 0x156   : > { %9897 = vmatprep.mubr.msk.bf16.mxu0 %vm11131_vm2, %v13196_v24 }
 0x15c   : > { %9838 = vmatmul.mubr.msk.bf16.gmra.mxu1 %vm978_vm3, %v10770_v49 }
 0x15d   : > { %9898 = vmatmul.mubr.msk.bf16.gmra.mxu0 %vm978_vm3, %v10771_v50  ;;  %9841 = vmatprep.mubr.msk.bf16.mxu1 %vm11131_vm2, %v13196_v24 }
 0x15e   : > { %9901 = vmatprep.mubr.msk.bf16.mxu0 %vm11131_vm2, %v13196_v24 }
 0x164   : > { %9842 = vmatmul.mubr.msk.bf16.gmra.mxu1 %vm978_vm3, %v10773_v31  ;;  %v10845_v31 = vld [vmem:[%s13181_s4 + $0xf8] sm:$0xff]  }
 0x165   : > { %9902 = vmatmul.mubr.msk.bf16.gmra.mxu0 %vm978_vm3, %v10774_v61  ;;  %9845 = vmatprep.mubr.msk.bf16.mxu1 %vm11131_vm2, %v13196_v24 }
 0x166   : > { %9905 = vmatprep.mubr.msk.bf16.mxu0 %vm11131_vm2, %v13196_v24 }
 0x16c   : > { %9846 = vmatmul.mubr.msk.bf16.gmra.mxu1 %vm978_vm3, %v10775_v62 }
 0x16d   : > { %9906 = vmatmul.mubr.msk.bf16.gmra.mxu0 %vm978_vm3, %v10776_v63  ;;  %9849 = vmatprep.mubr.msk.bf16.mxu1 %vm11131_vm2, %v13196_v24  ;;  %v10826_v63 = vld [vmem:[%s13181_s4 + $0xd0] sm:$0xff]  }
 0x16e   : > { %9909 = vmatprep.mubr.msk.bf16.mxu0 %vm11131_vm2, %v13196_v24 }
 0x174   : > { %9850 = vmatmul.mubr.msk.bf16.gmra.mxu1 %vm978_vm3, %v10779_v0 }
 0x175   : > { %9910 = vmatmul.mubr.msk.bf16.gmra.mxu0 %vm978_vm3, %v10780_v1  ;;  %9921 = vmatprep.mubr.msk.bf16.mxu1 %vm11131_vm2, %v13196_v24 }
 0x176   : > { %9981 = vmatprep.mubr.msk.bf16.mxu0 %vm11131_vm2, %v13196_v24 }
 0x17c   : > { %9922 = vmatmul.mubr.msk.bf16.vlgmr.msra.gmra.mxu1 %vm978_vm3, %v10783_v3  ;;  %v10846_v3 = vld [vmem:[%s13181_s4 + $0xf0] sm:$0xff]  }
 0x17d   : > { %9982 = vmatmul.mubr.msk.bf16.vlgmr.msra.gmra.mxu0 %vm978_vm3, %v10784_v33  ;;  %10034 = vmatpush3.bf16.msra.mxu1 %v10785_v2 }
 0x17e   : > { %9925 = vmatprep.mubr.msk.bf16.mxu1 %vm11131_vm2, %v13196_v24  ;;  %9985 = vmatprep.mubr.msk.bf16.mxu0 %vm11131_vm2, %v13196_v24 }
 0x17f   : > { %10035 = vmatprep.subr.bf16.mxu1 %v13196_v24  ;;  %10094 = vmatpush3.bf16.msra.mxu0 %v10811_v4 }
 0x180   : > { %10095 = vmatprep.subr.bf16.mxu0 %v13196_v24 }
 0x181   : > { %10036 = vmatpush3.bf16.msra.mxu1 %v10792_v5 }
 0x182   : > { %10037 = vmatprep.subr.bf16.mxu1 %v13196_v24 }
 0x183   : > { %10096 = vmatpush3.bf16.msra.mxu0 %v10812_v6 }
 0x184   : > { %9926 = vmatmul.mubr.msk.bf16.gmra.mxu1 %vm978_vm3, %v10786_v7  ;;  %10097 = vmatprep.subr.bf16.mxu0 %v13196_v24  ;;  %v10820_v7 = vld [vmem:[#allocation3 + $0x88] sm:$0xff]  }
 0x185   : > { %9986 = vmatmul.mubr.msk.bf16.gmra.mxu0 %vm978_vm3, %v10787_v8  ;;  %9929 = vmatprep.mubr.msk.bf16.mxu1 %vm11131_vm2, %v13196_v24  ;;  %v10833_v8 = vld [vmem:[%s13181_s4 + $0xc8] sm:$0xff]  }
 0x186   : > { %9989 = vmatprep.mubr.msk.bf16.mxu0 %vm11131_vm2, %v13196_v24  ;;  %10038 = vmatpush3.bf16.msra.mxu1 %v10799_v9 }
 0x187   : > { %10039 = vmatprep.subr.bf16.mxu1 %v13196_v24  ;;  %10098 = vmatpush3.bf16.msra.mxu0 %v10815_v10  ;;  %v10821_v10 = vld [vmem:[#allocation3 + $0x100] sm:$0xff]  }
 0x188   : > { %10099 = vmatprep.subr.bf16.mxu0 %v13196_v24 }
 0x18a   : > { %10040 = vmatpush3.bf16.msra.mxu1 %v10806_v11  ;;  %v10849_v11 = vld [vmem:[%s13181_s4 + $0xe8] sm:$0xff]  }
 0x18b   : > { %10100 = vmatpush3.bf16.msra.mxu0 %v10816_v12  ;;  %10153 = vmatprep.subr.bf16.mxu1 %v13196_v24 }
 0x18c   : > { %9930 = vmatmul.mubr.msk.bf16.gmra.mxu1 %vm978_vm3, %v10788_v13  ;;  %10213 = vmatprep.subr.bf16.mxu0 %v13196_v24 }
 0x18d   : > { %9990 = vmatmul.mubr.msk.bf16.gmra.mxu0 %vm978_vm3, %v10789_v14  ;;  %9933 = vmatprep.mubr.msk.bf16.mxu1 %vm11131_vm2, %v13196_v24 }
 0x18e   : > { %9993 = vmatprep.mubr.msk.bf16.mxu0 %vm11131_vm2, %v13196_v24 }
 0x194   : > { %9934 = vmatmul.mubr.msk.bf16.gmra.mxu1 %vm978_vm3, %v10790_v15 }
 0x195   : > { %9994 = vmatmul.mubr.msk.bf16.gmra.mxu0 %vm978_vm3, %v10791_v16  ;;  %9937 = vmatprep.mubr.msk.bf16.mxu1 %vm11131_vm2, %v13196_v24  ;;  %v10840_v16 = vld [vmem:[%s13181_s4 + $0xc0] sm:$0xff]  }
 0x196   : > { %9997 = vmatprep.mubr.msk.bf16.mxu0 %vm11131_vm2, %v13196_v24 }
 0x19c   : > { %9938 = vmatmul.mubr.msk.bf16.gmra.mxu1 %vm978_vm3, %v10793_v17 }
 0x19d   : > { %9998 = vmatmul.mubr.msk.bf16.gmra.mxu0 %vm978_vm3, %v10794_v18  ;;  %9941 = vmatprep.mubr.msk.bf16.mxu1 %vm11131_vm2, %v13196_v24  ;;  %v10850_v18 = vld [vmem:[%s13181_s4 + $0xe0] sm:$0xff]  }
 0x19e   : > { %10001 = vmatprep.mubr.msk.bf16.mxu0 %vm11131_vm2, %v13196_v24 }
 0x1a4   : > { %9942 = vmatmul.mubr.msk.bf16.gmra.mxu1 %vm978_vm3, %v10795_v19 }
 0x1a5   : > { %10002 = vmatmul.mubr.msk.bf16.gmra.mxu0 %vm978_vm3, %v10796_v20  ;;  %9945 = vmatprep.mubr.msk.bf16.mxu1 %vm11131_vm2, %v13196_v24 }
 0x1a6   : > { %10005 = vmatprep.mubr.msk.bf16.mxu0 %vm11131_vm2, %v13196_v24 }
 0x1ac   : > { %9946 = vmatmul.mubr.msk.bf16.gmra.mxu1 %vm978_vm3, %v10797_v21 }
 0x1ad   : > { %10006 = vmatmul.mubr.msk.bf16.gmra.mxu0 %vm978_vm3, %v10798_v22  ;;  %9949 = vmatprep.mubr.msk.bf16.mxu1 %vm11131_vm2, %v13196_v24 }
 0x1ae   : > { %10009 = vmatprep.mubr.msk.bf16.mxu0 %vm11131_vm2, %v13196_v24 }
 0x1b4   : > { %9950 = vmatmul.mubr.msk.bf16.gmra.mxu1 %vm978_vm3, %v10800_v23  ;;  %v10822_v23 = vld [vmem:[#allocation3 + $0x90] sm:$0xff]  }
 0x1b5   : > { %10010 = vmatmul.mubr.msk.bf16.gmra.mxu0 %vm978_vm3, %v10801_v25  ;;  %9953 = vmatprep.mubr.msk.bf16.mxu1 %vm11131_vm2, %v13196_v24 }
 0x1b6   : > { %10013 = vmatprep.mubr.msk.bf16.mxu0 %vm11131_vm2, %v13196_v24 }
 0x1bc   : > { %9954 = vmatmul.mubr.msk.bf16.gmra.mxu1 %vm978_vm3, %v10802_v26  ;;  %v10823_v26 = vld [vmem:[#allocation3 + $0x108] sm:$0xff]  }
 0x1bd   : > { %10014 = vmatmul.mubr.msk.bf16.gmra.mxu0 %vm978_vm3, %v10803_v27  ;;  %9957 = vmatprep.mubr.msk.bf16.mxu1 %vm11131_vm2, %v13196_v24 }
 0x1be   : > { %10017 = vmatprep.mubr.msk.bf16.mxu0 %vm11131_vm2, %v13196_v24 }
 0x1c4   : > { %9958 = vmatmul.mubr.msk.bf16.gmra.mxu1 %vm978_vm3, %v10804_v28 }
 0x1c5   : > { %10018 = vmatmul.mubr.msk.bf16.gmra.mxu0 %vm978_vm3, %v10805_v29  ;;  %9961 = vmatprep.mubr.msk.bf16.mxu1 %vm11131_vm2, %v13196_v24 }
 0x1c6   : > { %10021 = vmatprep.mubr.msk.bf16.mxu0 %vm11131_vm2, %v13196_v24 }
 0x1cc   : > { %9962 = vmatmul.mubr.msk.bf16.gmra.mxu1 %vm978_vm3, %v10807_v30 }
 0x1cd   : > { %10022 = vmatmul.mubr.msk.bf16.gmra.mxu0 %vm978_vm3, %v10808_v32  ;;  %9965 = vmatprep.mubr.msk.bf16.mxu1 %vm11131_vm2, %v13196_v24 }
 0x1ce   : > { %10025 = vmatprep.mubr.msk.bf16.mxu0 %vm11131_vm2, %v13196_v24 }
 0x1d2   : > { %v2050_v37 = vpop.f32.mrf.mxu0 }
 0x1d4   : > { %v1785_v36 = vpop.f32.mrf.mxu1  ;;  %9966 = vmatmul.mubr.msk.bf16.gmra.mxu1 %vm978_vm3, %v10809_v34  ;;  %v9863_v40 = vpop.f32.mrf.mxu0 }
 0x1d5   : > { %10026 = vmatmul.mubr.msk.bf16.gmra.mxu0 %vm978_vm3, %v10810_v35  ;;  %9969 = vmatprep.mubr.msk.bf16.mxu1 %vm11131_vm2, %v13196_v24  ;;  %v11765_v38 = vadd.f32 %v2050_v37, %v1785_v36 }
 0x1d6   : > { %v9803_v39 = vpop.f32.mrf.mxu1  ;;  %10029 = vmatprep.mubr.msk.bf16.mxu0 %vm11131_vm2, %v13196_v24  ;;  %v2053_v42 = vpop.f32.mrf.mxu0 }
 0x1d7   : > { %v10824_v39 = vld [vmem:[#allocation3 + $0x98] sm:$0xff]  }
 0x1d8   : > { %v1788_v41 = vpop.f32.mrf.mxu1  ;;  %v9864_v46 = vpop.f32.mrf.mxu0 }
 0x1d9   : > { %v11769_v43 = vadd.f32 %v2053_v42, %v1788_v41  ;;  %v10825_v41 = vld [vmem:[#allocation3 + $0x110] sm:$0xff]  }
 0x1da   : > { %v9804_v44 = vpop.f32.mrf.mxu1 }
 0x1db   : > { %v2058_v49 = vpop.f32.mrf.mxu0 }
 0x1dc   : > { %v1793_v48 = vpop.f32.mrf.mxu1  ;;  %9970 = vmatmul.mubr.msk.bf16.gmra.mxu1 %vm978_vm3, %v10813_v45 }
 0x1dd   : > { %10030 = vmatmul.mubr.msk.bf16.gmra.mxu0 %vm978_vm3, %v10814_v47  ;;  %10041 = vmatprep.mubr.msk.bf16.mxu1 %vm11131_vm2, %v13196_v24  ;;  %v11775_v50 = vadd.f32 %v2058_v49, %v1793_v48  ;;  %v9867_v52 = vpop.f32.mrf.mxu0 }
 0x1de   : > { %v9807_v51 = vpop.f32.mrf.mxu1  ;;  %10101 = vmatprep.mubr.msk.bf16.mxu0 %vm11131_vm2, %v13196_v24 }
 0x1df   : > { %v2061_v54 = vpop.f32.mrf.mxu0 }
 0x1e0   : > { %v1796_v53 = vpop.f32.mrf.mxu1 }
 0x1e1   : > { %v11782_v56 = vadd.f32 %v2061_v54, %v1796_v53  ;;  %v9868_v59 = vpop.f32.mrf.mxu0  ;;  %v10827_v53 = vld [vmem:[#allocation3 + $0xa0] sm:$0xff]  }
 0x1e2   : > { %v9808_v57 = vpop.f32.mrf.mxu1 }
 0x1e4   : > { %v1801_v61 = vpop.f32.mrf.mxu1  ;;  %10042 = vmatmul.mubr.msk.bf16.vlgmr.msra.gmra.mxu1 %vm978_vm3, %v10817_v58 }
 0x1e5   : > { %v2066_v62 = vpop.f32.mrf.mxu0  ;;  %10102 = vmatmul.mubr.msk.bf16.vlgmr.msra.gmra.mxu0 %vm978_vm3, %v10818_v60  ;;  %10154 = vmatpush3.bf16.msra.mxu1 %v10819_v55  ;;  %v10828_v55 = vld [vmem:[#allocation3 + $0x118] sm:$0xff]  }
 0x1e6   : > { %v11792_v0 = vadd.f32 %v2066_v62, %v1801_v61  ;;  %v9811_v1 = vpop.f32.mrf.mxu1  ;;  %10045 = vmatprep.mubr.msk.bf16.mxu1 %vm11131_vm2, %v13196_v24  ;;  %10105 = vmatprep.mubr.msk.bf16.mxu0 %vm11131_vm2, %v13196_v24 }
 0x1e7   : > { %v9871_v2 = vpop.f32.mrf.mxu0  ;;  %10155 = vmatprep.subr.bf16.mxu1 %v13196_v24  ;;  %10214 = vmatpush3.bf16.msra.mxu0 %v10845_v31 }
 0x1e8   : > { %v1804_v33 = vpop.f32.mrf.mxu1  ;;  %10215 = vmatprep.subr.bf16.mxu0 %v13196_v24  ;;  %v10829_v2 = vld [vmem:[#allocation3 + $0xa8] sm:$0xff]  }
 0x1e9   : > { %v2069_v4 = vpop.f32.mrf.mxu0  ;;  %10156 = vmatpush3.bf16.msra.mxu1 %v10826_v63 }
 0x1ea   : > { %v11803_v5 = vadd.f32 %v2069_v4, %v1804_v33  ;;  %v9812_v6 = vpop.f32.mrf.mxu1  ;;  %10157 = vmatprep.subr.bf16.mxu1 %v13196_v24  ;;  %v10830_v33 = vld [vmem:[#allocation3 + $0x120] sm:$0xff]  }
 0x1eb   : > { %v9872_v9 = vpop.f32.mrf.mxu0  ;;  %10216 = vmatpush3.bf16.msra.mxu0 %v10846_v3 }
 0x1ec   : > { %v1809_v12 = vpop.f32.mrf.mxu1  ;;  %10046 = vmatmul.mubr.msk.bf16.gmra.mxu1 %vm978_vm3, %v10820_v7  ;;  %10217 = vmatprep.subr.bf16.mxu0 %v13196_v24 }
 0x1ed   : > { %v2074_v13 = vpop.f32.mrf.mxu0  ;;  %10106 = vmatmul.mubr.msk.bf16.gmra.mxu0 %vm978_vm3, %v10821_v10  ;;  %10049 = vmatprep.mubr.msk.bf16.mxu1 %vm11131_vm2, %v13196_v24 }
 0x1ee   : > { %v11817_v14 = vadd.f32 %v2074_v13, %v1809_v12  ;;  %v9815_v15 = vpop.f32.mrf.mxu1  ;;  %10109 = vmatprep.mubr.msk.bf16.mxu0 %vm11131_vm2, %v13196_v24  ;;  %10158 = vmatpush3.bf16.msra.mxu1 %v10833_v8 }
 0x1ef   : > { %v9875_v17 = vpop.f32.mrf.mxu0  ;;  %10159 = vmatprep.subr.bf16.mxu1 %v13196_v24  ;;  %10218 = vmatpush3.bf16.msra.mxu0 %v10849_v11  ;;  %v10831_v15 = vld [vmem:[#allocation3 + $0xb0] sm:$0xff]  }
 0x1f0   : > { %v1812_v19 = vpop.f32.mrf.mxu1  ;;  %10219 = vmatprep.subr.bf16.mxu0 %v13196_v24  ;;  %v10832_v17 = vld [vmem:[#allocation3 + $0x128] sm:$0xff]  }
 0x1f1   : > { %v2077_v20 = vpop.f32.mrf.mxu0 }
 0x1f2   : > { %v11829_v21 = vadd.f32 %v2077_v20, %v1812_v19  ;;  %v9816_v22 = vpop.f32.mrf.mxu1  ;;  %10160 = vmatpush3.bf16.msra.mxu1 %v10840_v16 }
 0x1f3   : > { %v9876_v25 = vpop.f32.mrf.mxu0  ;;  %10220 = vmatpush3.bf16.msra.mxu0 %v10850_v18  ;;  %10273 = vmatprep.subr.bf16.mxu1 %v13196_v24 }
 0x1f4   : > { %v1817_v27 = vpop.f32.mrf.mxu1  ;;  %10050 = vmatmul.mubr.msk.bf16.gmra.mxu1 %vm978_vm3, %v10822_v23 }
 0x1f5   : > { %v2082_v28 = vpop.f32.mrf.mxu0  ;;  %10110 = vmatmul.mubr.msk.bf16.gmra.mxu0 %vm978_vm3, %v10823_v26  ;;  %10053 = vmatprep.mubr.msk.bf16.mxu1 %vm11131_vm2, %v13196_v24 }
 0x1f6   : > { %v11836_v29 = vadd.f32 %v2082_v28, %v1817_v27  ;;  %v9819_v30 = vpop.f32.mrf.mxu1  ;;  %10113 = vmatprep.mubr.msk.bf16.mxu0 %vm11131_vm2, %v13196_v24 }
 0x1f7   : > { %v9879_v32 = vpop.f32.mrf.mxu0  ;;  %v10834_v30 = vld [vmem:[#allocation3 + $0xb8] sm:$0xff]  }
 0x1f8   : > { %v1820_v34 = vpop.f32.mrf.mxu1 }
 0x1f9   : > { %v2085_v35 = vpop.f32.mrf.mxu0 }
 0x1fa   : > { %v11840_v36 = vadd.f32 %v2085_v35, %v1820_v34  ;;  %v9820_v37 = vpop.f32.mrf.mxu1  ;;  %v10835_v34 = vld [vmem:[#allocation3 + $0x130] sm:$0xff]  }
 0x1fb   : > { %v9880_v40 = vpop.f32.mrf.mxu0 }
 0x1fc   : > { %v1825_v42 = vpop.f32.mrf.mxu1  ;;  %10054 = vmatmul.mubr.msk.bf16.gmra.mxu1 %vm978_vm3, %v10824_v39 }
 0x1fd   : > { %v2090_v44 = vpop.f32.mrf.mxu0  ;;  %10114 = vmatmul.mubr.msk.bf16.gmra.mxu0 %vm978_vm3, %v10825_v41  ;;  %10057 = vmatprep.mubr.msk.bf16.mxu1 %vm11131_vm2, %v13196_v24 }
 0x1fe   : > { %v11846_v45 = vadd.f32 %v2090_v44, %v1825_v42  ;;  %v9823_v46 = vpop.f32.mrf.mxu1  ;;  %10117 = vmatprep.mubr.msk.bf16.mxu0 %vm11131_vm2, %v13196_v24 }
 0x1ff   : > { %v9883_v47 = vpop.f32.mrf.mxu0 }
 0x200   : > { %v1828_v48 = vpop.f32.mrf.mxu1 }
 0x201   : > { %v2093_v49 = vpop.f32.mrf.mxu0 }
 0x202   : > { %v11850_v51 = vadd.f32 %v2093_v49, %v1828_v48  ;;  %v9824_v52 = vpop.f32.mrf.mxu1  ;;  %v10836_v48 = vld [vmem:[#allocation3 + $0xc0] sm:$0xff]  }
 0x203   : > { %v9884_v54 = vpop.f32.mrf.mxu0  ;;  %v10837_v52 = vld [vmem:[#allocation3 + $0x138] sm:$0xff]  }
 0x204   : > { %v1833_v57 = vpop.f32.mrf.mxu1  ;;  %10058 = vmatmul.mubr.msk.bf16.gmra.mxu1 %vm978_vm3, %v10827_v53 }
 0x205   : > { %v2098_v58 = vpop.f32.mrf.mxu0  ;;  %10118 = vmatmul.mubr.msk.bf16.gmra.mxu0 %vm978_vm3, %v10828_v55  ;;  %10061 = vmatprep.mubr.msk.bf16.mxu1 %vm11131_vm2, %v13196_v24 }
 0x206   : > { %v11856_v59 = vadd.f32 %v2098_v58, %v1833_v57  ;;  %v9827_v60 = vpop.f32.mrf.mxu1  ;;  %10121 = vmatprep.mubr.msk.bf16.mxu0 %vm11131_vm2, %v13196_v24 }
 0x207   : > { %v9887_v31 = vpop.f32.mrf.mxu0 }
 0x208   : > { %v1836_v61 = vpop.f32.mrf.mxu1 }
 0x209   : > { %v2101_v62 = vpop.f32.mrf.mxu0 }
 0x20a   : > { %v11860_v63 = vadd.f32 %v2101_v62, %v1836_v61  ;;  %v9828_v1 = vpop.f32.mrf.mxu1 }
 0x20b   : > { %v9888_v3 = vpop.f32.mrf.mxu0  ;;  %v10838_v1 = vld [vmem:[#allocation3 + $0xc8] sm:$0xff]  }
 0x20c   : > { %v1841_v4 = vpop.f32.mrf.mxu1  ;;  %10062 = vmatmul.mubr.msk.bf16.gmra.mxu1 %vm978_vm3, %v10829_v2  ;;  %v10839_v3 = vld [vmem:[#allocation3 + $0x140] sm:$0xff]  }
 0x20d   : > { %v2106_v6 = vpop.f32.mrf.mxu0  ;;  %10122 = vmatmul.mubr.msk.bf16.gmra.mxu0 %vm978_vm3, %v10830_v33  ;;  %10065 = vmatprep.mubr.msk.bf16.mxu1 %vm11131_vm2, %v13196_v24 }
 0x20e   : > { %v11866_v7 = vadd.f32 %v2106_v6, %v1841_v4  ;;  %v9831_v8 = vpop.f32.mrf.mxu1  ;;  %10125 = vmatprep.mubr.msk.bf16.mxu0 %vm11131_vm2, %v13196_v24 }
 0x20f   : > { %v9891_v9 = vpop.f32.mrf.mxu0 }
 0x210   : > { %v1844_v10 = vpop.f32.mrf.mxu1 }
 0x211   : > { %v2109_v11 = vpop.f32.mrf.mxu0 }
 0x212   : > { %v11870_v12 = vadd.f32 %v2109_v11, %v1844_v10  ;;  %v9832_v13 = vpop.f32.mrf.mxu1 }
 0x213   : > { %v9892_v16 = vpop.f32.mrf.mxu0 }
 0x214   : > { %v1849_v18 = vpop.f32.mrf.mxu1  ;;  %10066 = vmatmul.mubr.msk.bf16.gmra.mxu1 %vm978_vm3, %v10831_v15  ;;  %v10841_v16 = vld [vmem:[#allocation3 + $0xd0] sm:$0xff]  }
 0x215   : > { %v2114_v19 = vpop.f32.mrf.mxu0  ;;  %10126 = vmatmul.mubr.msk.bf16.gmra.mxu0 %vm978_vm3, %v10832_v17  ;;  %10069 = vmatprep.mubr.msk.bf16.mxu1 %vm11131_vm2, %v13196_v24 }
 0x216   : > { %v11876_v20 = vadd.f32 %v2114_v19, %v1849_v18  ;;  %v9835_v22 = vpop.f32.mrf.mxu1  ;;  %10129 = vmatprep.mubr.msk.bf16.mxu0 %vm11131_vm2, %v13196_v24  ;;  %v10842_v18 = vld [vmem:[#allocation3 + $0x148] sm:$0xff]  }
 0x217   : > { %v9895_v23 = vpop.f32.mrf.mxu0 }
 0x218   : > { %v1852_v25 = vpop.f32.mrf.mxu1 }
 0x219   : > { %v2117_v26 = vpop.f32.mrf.mxu0 }
 0x21a   : > { %v11880_v27 = vadd.f32 %v2117_v26, %v1852_v25  ;;  %v9836_v28 = vpop.f32.mrf.mxu1 }
 0x21b   : > { %v9896_v32 = vpop.f32.mrf.mxu0 }
 0x21c   : > { %v1857_v35 = vpop.f32.mrf.mxu1  ;;  %10070 = vmatmul.mubr.msk.bf16.gmra.mxu1 %vm978_vm3, %v10834_v30 }
 0x21d   : > { %v2122_v37 = vpop.f32.mrf.mxu0  ;;  %10130 = vmatmul.mubr.msk.bf16.gmra.mxu0 %vm978_vm3, %v10835_v34  ;;  %10073 = vmatprep.mubr.msk.bf16.mxu1 %vm11131_vm2, %v13196_v24  ;;  %v10843_v34 = vld [vmem:[#allocation3 + $0xd8] sm:$0xff]  }
 0x21e   : > { %v11886_v39 = vadd.f32 %v2122_v37, %v1857_v35  ;;  %v9839_v40 = vpop.f32.mrf.mxu1  ;;  %10133 = vmatprep.mubr.msk.bf16.mxu0 %vm11131_vm2, %v13196_v24  ;;  %v10844_v37 = vld [vmem:[#allocation3 + $0x150] sm:$0xff]  }
 0x21f   : > { %v9899_v41 = vpop.f32.mrf.mxu0 }
 0x220   : > { %v1860_v42 = vpop.f32.mrf.mxu1 }
 0x221   : > { %v2125_v44 = vpop.f32.mrf.mxu0 }
 0x222   : > { %v11890_v46 = vadd.f32 %v2125_v44, %v1860_v42  ;;  %v9840_v47 = vpop.f32.mrf.mxu1 }
 0x223   : > { %v9900_v49 = vpop.f32.mrf.mxu0 }
 0x224   : > { %v1865_v53 = vpop.f32.mrf.mxu1  ;;  %10074 = vmatmul.mubr.msk.bf16.gmra.mxu1 %vm978_vm3, %v10836_v48 }
 0x225   : > { %v2130_v54 = vpop.f32.mrf.mxu0  ;;  %10134 = vmatmul.mubr.msk.bf16.gmra.mxu0 %vm978_vm3, %v10837_v52  ;;  %10077 = vmatprep.mubr.msk.bf16.mxu1 %vm11131_vm2, %v13196_v24 }
 0x226   : > { %v11896_v55 = vadd.f32 %v2130_v54, %v1865_v53  ;;  %v9843_v57 = vpop.f32.mrf.mxu1  ;;  %10137 = vmatprep.mubr.msk.bf16.mxu0 %vm11131_vm2, %v13196_v24 }
 0x227   : > { %v9903_v58 = vpop.f32.mrf.mxu0  ;;  %v10847_v57 = vld [vmem:[#allocation3 + $0xe0] sm:$0xff]  }
 0x228   : > { %v1868_v60 = vpop.f32.mrf.mxu1 }
 0x229   : > { %v2133_v31 = vpop.f32.mrf.mxu0 }
 0x22a   : > { %v11900_v61 = vadd.f32 %v2133_v31, %v1868_v60  ;;  %v9844_v62 = vpop.f32.mrf.mxu1  ;;  %v10848_v60 = vld [vmem:[#allocation3 + $0x158] sm:$0xff]  }
 0x22b   : > { %v9904_v2 = vpop.f32.mrf.mxu0 }
 0x22c   : > { %v1873_v33 = vpop.f32.mrf.mxu1  ;;  %10078 = vmatmul.mubr.msk.bf16.gmra.mxu1 %vm978_vm3, %v10838_v1 }
 0x22d   : > { %v2138_v4 = vpop.f32.mrf.mxu0  ;;  %10138 = vmatmul.mubr.msk.bf16.gmra.mxu0 %vm978_vm3, %v10839_v3  ;;  %10081 = vmatprep.mubr.msk.bf16.mxu1 %vm11131_vm2, %v13196_v24 }
 0x22e   : > { %v11906_v6 = vadd.f32 %v2138_v4, %v1873_v33  ;;  %v9847_v8 = vpop.f32.mrf.mxu1  ;;  %10141 = vmatprep.mubr.msk.bf16.mxu0 %vm11131_vm2, %v13196_v24 }
 0x22f   : > { %v9907_v9 = vpop.f32.mrf.mxu0 }
 0x230   : > { %v1876_v10 = vpop.f32.mrf.mxu1 }
 0x231   : > { %v2141_v11 = vpop.f32.mrf.mxu0 }
 0x232   : > { %v11910_v13 = vadd.f32 %v2141_v11, %v1876_v10  ;;  %v9848_v15 = vpop.f32.mrf.mxu1  ;;  %v10851_v10 = vld [vmem:[#allocation3 + $0x10] sm:$0xff]  }
 0x233   : > { %v9908_v17 = vpop.f32.mrf.mxu0 }
 0x234   : > { %v1881_v19 = vpop.f32.mrf.mxu1  ;;  %10082 = vmatmul.mubr.msk.bf16.gmra.mxu1 %vm978_vm3, %v10841_v16  ;;  %v10852_v16 = vld [vmem:[#allocation3 + $0x88] sm:$0xff]  }
 0x235   : > { %v2146_v22 = vpop.f32.mrf.mxu0  ;;  %10142 = vmatmul.mubr.msk.bf16.gmra.mxu0 %vm978_vm3, %v10842_v18  ;;  %10085 = vmatprep.mubr.msk.bf16.mxu1 %vm11131_vm2, %v13196_v24 }
 0x236   : > { %v11916_v23 = vadd.f32 %v2146_v22, %v1881_v19  ;;  %v9851_v25 = vpop.f32.mrf.mxu1  ;;  %10145 = vmatprep.mubr.msk.bf16.mxu0 %vm11131_vm2, %v13196_v24 }
 0x237   : > { %v9911_v26 = vpop.f32.mrf.mxu0 }
 0x238   : > { %v1884_v28 = vpop.f32.mrf.mxu1 }
 0x239   : > { %v2149_v30 = vpop.f32.mrf.mxu0 }
 0x23a   : > { %v9852_v32 = vpop.f32.mrf.mxu1 }
 0x23b   : > { %v9912_v35 = vpop.f32.mrf.mxu0 }
 0x23c   : > { %v2350_v40 = vpop.f32.mrf.mxu1  ;;  %10086 = vmatmul.mubr.msk.bf16.gmra.mxu1 %vm978_vm3, %v10843_v34  ;;  %v10854_v34 = vld [vmem:[#allocation3 + $0x18] sm:$0xff]   ;;  %v10867_v35 = vld [vmem:[%s13181_s4 + $0x108] sm:$0xff]  }
 0x23d   : > { %v2453_v41 = vadd.f32 %v2350_v40, %v11765_v38  ;;  %v2676_v42 = vpop.f32.mrf.mxu0  ;;  %10146 = vmatmul.mubr.msk.bf16.gmra.mxu0 %vm978_vm3, %v10844_v37  ;;  %10089 = vmatprep.mubr.msk.bf16.mxu1 %vm11131_vm2, %v13196_v24 }
 0x23e   : > { %v9923_v44 = vpop.f32.mrf.mxu1  ;;  %10149 = vmatprep.mubr.msk.bf16.mxu0 %vm11131_vm2, %v13196_v24 }
 0x23f   : > { %v11927_v47 = vadd.f32 %v2676_v42, %v2453_v41  ;;  %v9983_v48 = vpop.f32.mrf.mxu0  ;;  %v10855_v41 = vld [vmem:[#allocation3 + $0x90] sm:$0xff]  }
 0x240   : > { %v2353_v49 = vpop.f32.mrf.mxu1 }
 0x241   : > { %v2454_v52 = vadd.f32 %v2353_v49, %v11769_v43  ;;  %v2679_v53 = vpop.f32.mrf.mxu0  ;;  %v10874_v49 = vld [vmem:[%s13181_s4 + $0x100] sm:$0xff]  }
 0x242   : > { %v9924_v54 = vpop.f32.mrf.mxu1 }
 0x243   : > { %v11930_v38 = vadd.f32 %v2679_v53, %v2454_v52  ;;  %v9984_v58 = vpop.f32.mrf.mxu0 }
 0x244   : > { %v2358_v31 = vpop.f32.mrf.mxu1  ;;  %10090 = vmatmul.mubr.msk.bf16.gmra.mxu1 %vm978_vm3, %v10847_v57 }
 0x245   : > { %v2455_v62 = vadd.f32 %v2358_v31, %v11775_v50  ;;  %v2684_v1 = vpop.f32.mrf.mxu0  ;;  %10150 = vmatmul.mubr.msk.bf16.gmra.mxu0 %vm978_vm3, %v10848_v60  ;;  %10161 = vmatprep.mubr.msk.bf16.mxu1 %vm11131_vm2, %v13196_v24  ;;  %v10853_v50 = vld [vmem:[%s13181_s4 + $0x118] sm:$0xff]   ;;  %v10856_v60 = vld [vmem:[#allocation3 + $0x20] sm:$0xff]  }
 0x246   : > { %v9927_v2 = vpop.f32.mrf.mxu1  ;;  %10221 = vmatprep.mubr.msk.bf16.mxu0 %vm11131_vm2, %v13196_v24 }
 0x247   : > { %v11939_v43 = vadd.f32 %v2684_v1, %v2455_v62  ;;  %v9987_v3 = vpop.f32.mrf.mxu0  ;;  %v10857_v1 = vld [vmem:[#allocation3 + $0x98] sm:$0xff]  }
 0x248   : > { %v2361_v33 = vpop.f32.mrf.mxu1 }
 0x249   : > { %v2456_v4 = vadd.f32 %v2361_v33, %v11782_v56  ;;  %v2687_v8 = vpop.f32.mrf.mxu0  ;;  %v10860_v56 = vld [vmem:[%s13181_s4 + $0x110] sm:$0xff]  }
 0x24a   : > { %v9928_v9 = vpop.f32.mrf.mxu1 }
 0x24b   : > { %v11945_v11 = vadd.f32 %v2687_v8, %v2456_v4  ;;  %v9988_v15 = vpop.f32.mrf.mxu0 }
 0x24c   : > { %v2366_v17 = vpop.f32.mrf.mxu1  ;;  %10162 = vmatmul.mubr.msk.bf16.vlgmr.msra.gmra.mxu1 %vm978_vm3, %v10851_v10 }
 0x24d   : > { %v2457_v18 = vadd.f32 %v2366_v17, %v11792_v0  ;;  %v2692_v19 = vpop.f32.mrf.mxu0  ;;  %10222 = vmatmul.mubr.msk.bf16.vlgmr.msra.gmra.mxu0 %vm978_vm3, %v10852_v16  ;;  %10274 = vmatpush3.bf16.msra.mxu1 %v10853_v50  ;;  %v10858_v16 = vld [vmem:[#allocation3 + $0x28] sm:$0xff]  }
 0x24e   : > { %v9931_v22 = vpop.f32.mrf.mxu1  ;;  %10165 = vmatprep.mubr.msk.bf16.mxu1 %vm11131_vm2, %v13196_v24  ;;  %10225 = vmatprep.mubr.msk.bf16.mxu0 %vm11131_vm2, %v13196_v24 }
 0x24f   : > { %v11957_v25 = vadd.f32 %v2692_v19, %v2457_v18  ;;  %v9991_v26 = vpop.f32.mrf.mxu0  ;;  %10275 = vmatprep.subr.bf16.mxu1 %v13196_v24  ;;  %v10859_v18 = vld [vmem:[#allocation3 + $0xa0] sm:$0xff]  }
 0x250   : > { %v2369_v0 = vpop.f32.mrf.mxu1 }
 0x251   : > { %v2458_v28 = vadd.f32 %v2369_v0, %v11803_v5  ;;  %v2695_v30 = vpop.f32.mrf.mxu0  ;;  %10276 = vmatpush3.bf16.msra.mxu1 %v10860_v56 }
 0x252   : > { %v9932_v32 = vpop.f32.mrf.mxu1  ;;  %10277 = vmatprep.subr.bf16.mxu1 %v13196_v24 }
 0x253   : > { %v11965_v37 = vadd.f32 %v2695_v30, %v2458_v28  ;;  %v9992_v40 = vpop.f32.mrf.mxu0 }
 0x254   : > { %v2374_v42 = vpop.f32.mrf.mxu1  ;;  %10166 = vmatmul.mubr.msk.bf16.gmra.mxu1 %vm978_vm3, %v10854_v34 }
 0x255   : > { %v2459_v44 = vadd.f32 %v2374_v42, %v11817_v14  ;;  %v2700_v5 = vpop.f32.mrf.mxu0  ;;  %10226 = vmatmul.mubr.msk.bf16.gmra.mxu0 %vm978_vm3, %v10855_v41  ;;  %10169 = vmatprep.mubr.msk.bf16.mxu1 %vm11131_vm2, %v13196_v24  ;;  %v10862_v41 = vld [vmem:[#allocation3 + $0xa8] sm:$0xff]  }
 0x256   : > { %v9935_v48 = vpop.f32.mrf.mxu1  ;;  %10229 = vmatprep.mubr.msk.bf16.mxu0 %vm11131_vm2, %v13196_v24  ;;  %10278 = vmatpush3.bf16.msra.mxu1 %v10867_v35  ;;  %v10861_v35 = vld [vmem:[#allocation3 + $0x30] sm:$0xff]  }
 0x257   : > { %v11977_v52 = vadd.f32 %v2700_v5, %v2459_v44  ;;  %v9995_v53 = vpop.f32.mrf.mxu0  ;;  %10279 = vmatprep.subr.bf16.mxu1 %v13196_v24 }
 0x258   : > { %v2377_v14 = vpop.f32.mrf.mxu1 }
 0x259   : > { %v2460_v54 = vadd.f32 %v2377_v14, %v11829_v21  ;;  %v2703_v57 = vpop.f32.mrf.mxu0 }
 0x25a   : > { %v9936_v58 = vpop.f32.mrf.mxu1  ;;  %10280 = vmatpush3.bf16.msra.mxu1 %v10874_v49 }
 0x25b   : > { %v11981_v31 = vadd.f32 %v2703_v57, %v2460_v54  ;;  %v9996_v62 = vpop.f32.mrf.mxu0  ;;  %v10863_v58 = vld [vmem:[#allocation3 + $0x38] sm:$0xff]  }
 0x25c   : > { %v2382_v2 = vpop.f32.mrf.mxu1  ;;  %10170 = vmatmul.mubr.msk.bf16.gmra.mxu1 %vm978_vm3, %v10856_v60  ;;  %v10864_v62 = vld [vmem:[#allocation3 + $0xb0] sm:$0xff]  }
 0x25d   : > { %v2461_v3 = vadd.f32 %v2382_v2, %v11836_v29  ;;  %v2708_v33 = vpop.f32.mrf.mxu0  ;;  %10230 = vmatmul.mubr.msk.bf16.gmra.mxu0 %vm978_vm3, %v10857_v1  ;;  %10173 = vmatprep.mubr.msk.bf16.mxu1 %vm11131_vm2, %v13196_v24 }
 0x25e   : > { %v9939_v21 = vpop.f32.mrf.mxu1  ;;  %10233 = vmatprep.mubr.msk.bf16.mxu0 %vm11131_vm2, %v13196_v24 }
 0x25f   : > { %v11990_v4 = vadd.f32 %v2708_v33, %v2461_v3  ;;  %v9999_v8 = vpop.f32.mrf.mxu0 }
 0x260   : > { %v2385_v50 = vpop.f32.mrf.mxu1 }
 0x261   : > { %v2462_v9 = vadd.f32 %v2385_v50, %v11840_v36  ;;  %v2711_v10 = vpop.f32.mrf.mxu0 }
 0x262   : > { %v9940_v15 = vpop.f32.mrf.mxu1 }
 0x263   : > { %v11993_v29 = vadd.f32 %v2711_v10, %v2462_v9  ;;  %v10000_v17 = vpop.f32.mrf.mxu0  ;;  %v10865_v15 = vld [vmem:[#allocation3 + $0x40] sm:$0xff]  }
 0x264   : > { %v2390_v19 = vpop.f32.mrf.mxu1  ;;  %10174 = vmatmul.mubr.msk.bf16.gmra.mxu1 %vm978_vm3, %v10858_v16  ;;  %v10866_v17 = vld [vmem:[#allocation3 + $0xb8] sm:$0xff]  }
 0x265   : > { %v2463_v56 = vadd.f32 %v2390_v19, %v11846_v45  ;;  %v2716_v22 = vpop.f32.mrf.mxu0  ;;  %10234 = vmatmul.mubr.msk.bf16.gmra.mxu0 %vm978_vm3, %v10859_v18  ;;  %10177 = vmatprep.mubr.msk.bf16.mxu1 %vm11131_vm2, %v13196_v24 }
 0x266   : > { %v9943_v26 = vpop.f32.mrf.mxu1  ;;  %10237 = vmatprep.mubr.msk.bf16.mxu0 %vm11131_vm2, %v13196_v24 }
 0x267   : > { %v12002_v36 = vadd.f32 %v2716_v22, %v2463_v56  ;;  %v10003_v0 = vpop.f32.mrf.mxu0 }
 0x268   : > { %v2393_v28 = vpop.f32.mrf.mxu1 }
 0x269   : > { %v2464_v30 = vadd.f32 %v2393_v28, %v11850_v51  ;;  %v2719_v32 = vpop.f32.mrf.mxu0 }
 0x26a   : > { %v9944_v34 = vpop.f32.mrf.mxu1 }
 0x26b   : > { %v12005_v45 = vadd.f32 %v2719_v32, %v2464_v30  ;;  %v10004_v40 = vpop.f32.mrf.mxu0  ;;  %v10868_v34 = vld [vmem:[#allocation3 + $0x48] sm:$0xff]  }
 0x26c   : > { %v2398_v42 = vpop.f32.mrf.mxu1  ;;  %10178 = vmatmul.mubr.msk.bf16.gmra.mxu1 %vm978_vm3, %v10861_v35  ;;  %v10869_v40 = vld [vmem:[#allocation3 + $0xc0] sm:$0xff]  }
 0x26d   : > { %v2465_v44 = vadd.f32 %v2398_v42, %v11856_v59  ;;  %v2724_v5 = vpop.f32.mrf.mxu0  ;;  %10238 = vmatmul.mubr.msk.bf16.gmra.mxu0 %vm978_vm3, %v10862_v41  ;;  %10181 = vmatprep.mubr.msk.bf16.mxu1 %vm11131_vm2, %v13196_v24 }
 0x26e   : > { %v9947_v48 = vpop.f32.mrf.mxu1  ;;  %10241 = vmatprep.mubr.msk.bf16.mxu0 %vm11131_vm2, %v13196_v24 }
 0x26f   : > { %v12014_v51 = vadd.f32 %v2724_v5, %v2465_v44  ;;  %v10007_v49 = vpop.f32.mrf.mxu0 }
 0x270   : > { %v2401_v53 = vpop.f32.mrf.mxu1 }
 0x271   : > { %v2466_v14 = vadd.f32 %v2401_v53, %v11860_v63  ;;  %v2727_v54 = vpop.f32.mrf.mxu0 }
 0x272   : > { %v9948_v57 = vpop.f32.mrf.mxu1 }
 0x273   : > { %v12017_v59 = vadd.f32 %v2727_v54, %v2466_v14  ;;  %v10008_v60 = vpop.f32.mrf.mxu0  ;;  %v10870_v57 = vld [vmem:[#allocation3 + $0x50] sm:$0xff]  }
 0x274   : > { %v2406_v1 = vpop.f32.mrf.mxu1  ;;  %10182 = vmatmul.mubr.msk.bf16.gmra.mxu1 %vm978_vm3, %v10863_v58  ;;  %v10871_v60 = vld [vmem:[#allocation3 + $0xc8] sm:$0xff]  }
 0x275   : > { %v2467_v2 = vadd.f32 %v2406_v1, %v11866_v7  ;;  %v2732_v3 = vpop.f32.mrf.mxu0  ;;  %10242 = vmatmul.mubr.msk.bf16.gmra.mxu0 %vm978_vm3, %v10864_v62  ;;  %10185 = vmatprep.mubr.msk.bf16.mxu1 %vm11131_vm2, %v13196_v24 }
 0x276   : > { %v9951_v33 = vpop.f32.mrf.mxu1  ;;  %10245 = vmatprep.mubr.msk.bf16.mxu0 %vm11131_vm2, %v13196_v24 }
 0x277   : > { %v12026_v63 = vadd.f32 %v2732_v3, %v2467_v2  ;;  %v10011_v21 = vpop.f32.mrf.mxu0 }
 0x278   : > { %v2409_v8 = vpop.f32.mrf.mxu1 }
 0x279   : > { %v2468_v50 = vadd.f32 %v2409_v8, %v11870_v12  ;;  %v2735_v9 = vpop.f32.mrf.mxu0 }
 0x27a   : > { %v9952_v10 = vpop.f32.mrf.mxu1 }
 0x27b   : > { %v12029_v7 = vadd.f32 %v2735_v9, %v2468_v50  ;;  %v10012_v16 = vpop.f32.mrf.mxu0  ;;  %v10872_v10 = vld [vmem:[#allocation3 + $0x58] sm:$0xff]  }
 0x27c   : > { %v2414_v18 = vpop.f32.mrf.mxu1  ;;  %10186 = vmatmul.mubr.msk.bf16.gmra.mxu1 %vm978_vm3, %v10865_v15  ;;  %v10873_v16 = vld [vmem:[#allocation3 + $0xd0] sm:$0xff]  }
 0x27d   : > { %v2469_v19 = vadd.f32 %v2414_v18, %v11876_v20  ;;  %v2740_v56 = vpop.f32.mrf.mxu0  ;;  %10246 = vmatmul.mubr.msk.bf16.gmra.mxu0 %vm978_vm3, %v10866_v17  ;;  %10189 = vmatprep.mubr.msk.bf16.mxu1 %vm11131_vm2, %v13196_v24 }
 0x27e   : > { %v9955_v22 = vpop.f32.mrf.mxu1  ;;  %10249 = vmatprep.mubr.msk.bf16.mxu0 %vm11131_vm2, %v13196_v24 }
 0x27f   : > { %v12038_v12 = vadd.f32 %v2740_v56, %v2469_v19  ;;  %v10015_v26 = vpop.f32.mrf.mxu0 }
 0x280   : > { %v2417_v0 = vpop.f32.mrf.mxu1 }
 0x281   : > { %v2470_v28 = vadd.f32 %v2417_v0, %v11880_v27  ;;  %v2743_v30 = vpop.f32.mrf.mxu0 }
 0x282   : > { %v9956_v32 = vpop.f32.mrf.mxu1 }
 0x283   : > { %v12041_v20 = vadd.f32 %v2743_v30, %v2470_v28  ;;  %v10016_v35 = vpop.f32.mrf.mxu0  ;;  %v10875_v32 = vld [vmem:[#allocation3 + $0x60] sm:$0xff]  }
 0x284   : > { %v2422_v41 = vpop.f32.mrf.mxu1  ;;  %10190 = vmatmul.mubr.msk.bf16.gmra.mxu1 %vm978_vm3, %v10868_v34  ;;  %v10876_v35 = vld [vmem:[#allocation3 + $0xd8] sm:$0xff]  }
 0x285   : > { %v2471_v42 = vadd.f32 %v2422_v41, %v11886_v39  ;;  %v2748_v44 = vpop.f32.mrf.mxu0  ;;  %10250 = vmatmul.mubr.msk.bf16.gmra.mxu0 %vm978_vm3, %v10869_v40  ;;  %10193 = vmatprep.mubr.msk.bf16.mxu1 %vm11131_vm2, %v13196_v24 }
 0x286   : > { %v9959_v5 = vpop.f32.mrf.mxu1  ;;  %10253 = vmatprep.mubr.msk.bf16.mxu0 %vm11131_vm2, %v13196_v24 }
 0x287   : > { %v12050_v27 = vadd.f32 %v2748_v44, %v2471_v42  ;;  %v10019_v48 = vpop.f32.mrf.mxu0 }
 0x288   : > { %v2425_v49 = vpop.f32.mrf.mxu1 }
 0x289   : > { %v2472_v53 = vadd.f32 %v2425_v49, %v11890_v46  ;;  %v2751_v14 = vpop.f32.mrf.mxu0 }
 0x28a   : > { %v9960_v54 = vpop.f32.mrf.mxu1 }
 0x28b   : > { %v12053_v39 = vadd.f32 %v2751_v14, %v2472_v53  ;;  %v10020_v58 = vpop.f32.mrf.mxu0  ;;  %v10877_v14 = vld [vmem:[#allocation3 + $0x68] sm:$0xff]  }
 0x28c   : > { %v2430_v62 = vpop.f32.mrf.mxu1  ;;  %10194 = vmatmul.mubr.msk.bf16.gmra.mxu1 %vm978_vm3, %v10870_v57  ;;  %v10878_v57 = vld [vmem:[#allocation3 + $0xe0] sm:$0xff]  }
 0x28d   : > { %v2473_v1 = vadd.f32 %v2430_v62, %v11896_v55  ;;  %v2756_v2 = vpop.f32.mrf.mxu0  ;;  %10254 = vmatmul.mubr.msk.bf16.gmra.mxu0 %vm978_vm3, %v10871_v60  ;;  %10197 = vmatprep.mubr.msk.bf16.mxu1 %vm11131_vm2, %v13196_v24 }
 0x28e   : > { %v9963_v3 = vpop.f32.mrf.mxu1  ;;  %10257 = vmatprep.mubr.msk.bf16.mxu0 %vm11131_vm2, %v13196_v24 }
 0x28f   : > { %v12062_v46 = vadd.f32 %v2756_v2, %v2473_v1  ;;  %v10023_v33 = vpop.f32.mrf.mxu0 }
 0x290   : > { %v2433_v21 = vpop.f32.mrf.mxu1 }
 0x291   : > { %v2474_v8 = vadd.f32 %v2433_v21, %v11900_v61  ;;  %v2759_v50 = vpop.f32.mrf.mxu0 }
 0x292   : > { %v9964_v9 = vpop.f32.mrf.mxu1 }
 0x293   : > { %v12065_v55 = vadd.f32 %v2759_v50, %v2474_v8  ;;  %v10024_v15 = vpop.f32.mrf.mxu0  ;;  %v10879_v50 = vld [vmem:[#allocation3 + $0x70] sm:$0xff]  }
 0x294   : > { %v2438_v17 = vpop.f32.mrf.mxu1  ;;  %10198 = vmatmul.mubr.msk.bf16.gmra.mxu1 %vm978_vm3, %v10872_v10  ;;  %v10880_v10 = vld [vmem:[#allocation3 + $0xe8] sm:$0xff]  }
 0x295   : > { %v2475_v18 = vadd.f32 %v2438_v17, %v11906_v6  ;;  %v2764_v19 = vpop.f32.mrf.mxu0  ;;  %10258 = vmatmul.mubr.msk.bf16.gmra.mxu0 %vm978_vm3, %v10873_v16  ;;  %10201 = vmatprep.mubr.msk.bf16.mxu1 %vm11131_vm2, %v13196_v24 }
 0x296   : > { %v9967_v56 = vpop.f32.mrf.mxu1  ;;  %10261 = vmatprep.mubr.msk.bf16.mxu0 %vm11131_vm2, %v13196_v24 }
 0x297   : > { %v12074_v61 = vadd.f32 %v2764_v19, %v2475_v18  ;;  %v10027_v22 = vpop.f32.mrf.mxu0 }
 0x298   : > { %v2441_v26 = vpop.f32.mrf.mxu1 }
 0x299   : > { %v2476_v0 = vadd.f32 %v2441_v26, %v11910_v13  ;;  %v2767_v28 = vpop.f32.mrf.mxu0 }
 0x29a   : > { %v9968_v30 = vpop.f32.mrf.mxu1 }
 0x29b   : > { %v12077_v6 = vadd.f32 %v2767_v28, %v2476_v0  ;;  %v10028_v34 = vpop.f32.mrf.mxu0  ;;  %v10881_v28 = vld [vmem:[#allocation3 + $0x100] sm:$0xff]  }
 0x29c   : > { %v2446_v40 = vpop.f32.mrf.mxu1  ;;  %10202 = vmatmul.mubr.msk.bf16.gmra.mxu1 %vm978_vm3, %v10875_v32 }
 0x29d   : > { %v2477_v41 = vadd.f32 %v2446_v40, %v11916_v23  ;;  %v2772_v42 = vpop.f32.mrf.mxu0  ;;  %10262 = vmatmul.mubr.msk.bf16.gmra.mxu0 %vm978_vm3, %v10876_v35  ;;  %10205 = vmatprep.mubr.msk.bf16.mxu1 %vm11131_vm2, %v13196_v24 }
 0x29e   : > { %v9971_v44 = vpop.f32.mrf.mxu1  ;;  %10265 = vmatprep.mubr.msk.bf16.mxu0 %vm11131_vm2, %v13196_v24 }
 0x29f   : > { %v12086_v13 = vadd.f32 %v2772_v42, %v2477_v41  ;;  %v10031_v5 = vpop.f32.mrf.mxu0 }
 0x2a0   : > { %v2449_v48 = vpop.f32.mrf.mxu1 }
 0x2a1   : > { %v2775_v49 = vpop.f32.mrf.mxu0 }
 0x2a2   : > { %v9972_v53 = vpop.f32.mrf.mxu1  ;;  %v10882_v49 = vld [vmem:[#allocation3 + $0x108] sm:$0xff]  }
 0x2a3   : > { %v10032_v54 = vpop.f32.mrf.mxu0 }
 0x2a4   : > { %v3002_v23 = vpop.f32.mrf.mxu1  ;;  %10206 = vmatmul.mubr.msk.bf16.gmra.mxu1 %vm978_vm3, %v10877_v14 }
 0x2a5   : > { %v3105_v58 = vadd.f32 %v3002_v23, %v11927_v47  ;;  %v3328_v60 = vpop.f32.mrf.mxu0  ;;  %10266 = vmatmul.mubr.msk.bf16.gmra.mxu0 %vm978_vm3, %v10878_v57  ;;  %10209 = vmatprep.mubr.msk.bf16.mxu1 %vm11131_vm2, %v13196_v24 }
 0x2a6   : > { %v10043_v62 = vpop.f32.mrf.mxu1  ;;  %10269 = vmatprep.mubr.msk.bf16.mxu0 %vm11131_vm2, %v13196_v24 }
 0x2a7   : > { %v12095_v1 = vadd.f32 %v3328_v60, %v3105_v58  ;;  %v10103_v2 = vpop.f32.mrf.mxu0 }
 0x2a8   : > { %v3005_v3 = vpop.f32.mrf.mxu1 }
 0x2a9   : > { %v3106_v33 = vadd.f32 %v3005_v3, %v11930_v38  ;;  %v3331_v21 = vpop.f32.mrf.mxu0 }
 0x2aa   : > { %v10044_v8 = vpop.f32.mrf.mxu1 }
 0x2ab   : > { %v12098_v47 = vadd.f32 %v3331_v21, %v3106_v33  ;;  %v10104_v9 = vpop.f32.mrf.mxu0  ;;  %v10883_v33 = vld [vmem:[#allocation3 + $0x110] sm:$0xff]  }
 0x2ac   : > { %v3010_v15 = vpop.f32.mrf.mxu1  ;;  %10210 = vmatmul.mubr.msk.bf16.gmra.mxu1 %vm978_vm3, %v10879_v50 }
 0x2ad   : > { %v3107_v16 = vadd.f32 %v3010_v15, %v11939_v43  ;;  %v3336_v17 = vpop.f32.mrf.mxu0  ;;  %10270 = vmatmul.mubr.msk.bf16.gmra.mxu0 %vm978_vm3, %v10880_v10  ;;  %10281 = vmatprep.mubr.msk.bf16.mxu1 %vm11131_vm2, %v13196_v24 }
 0x2ae   : > { %v10047_v18 = vpop.f32.mrf.mxu1 }
 0x2af   : > { %v12105_v38 = vadd.f32 %v3336_v17, %v3107_v16  ;;  %v10107_v19 = vpop.f32.mrf.mxu0 }
 0x2b0   : > { %v3013_v56 = vpop.f32.mrf.mxu1 }
 0x2b1   : > { %v3108_v22 = vadd.f32 %v3013_v56, %v11945_v11  ;;  %v3339_v26 = vpop.f32.mrf.mxu0  ;;  %v10884_v56 = vld [vmem:[#allocation3 + $0x118] sm:$0xff]  }
 0x2b2   : > { %v10048_v0 = vpop.f32.mrf.mxu1 }
 0x2b3   : > { %v12108_v30 = vadd.f32 %v3339_v26, %v3108_v22  ;;  %v10108_v32 = vpop.f32.mrf.mxu0 }
 0x2b4   : > { %v3018_v43 = vpop.f32.mrf.mxu1  ;;  %10282 = vmatmul.mubr.msk.bf16.vlgmr.msra.gmra.mxu1 %vm978_vm3, %v10881_v28 }
 0x2b5   : > { %v3109_v34 = vadd.f32 %v3018_v43, %v11957_v25  ;;  %v3344_v35 = vpop.f32.mrf.mxu0  ;;  %10285 = vmatprep.mubr.msk.bf16.mxu1 %vm11131_vm2, %v13196_v24 }
 0x2b6   : > { %v10051_v40 = vpop.f32.mrf.mxu1 }
 0x2b7   : > { %v12114_v41 = vadd.f32 %v3344_v35, %v3109_v34  ;;  %v10111_v42 = vpop.f32.mrf.mxu0 }
 0x2b8   : > { %v3021_v11 = vpop.f32.mrf.mxu1 }
 0x2b9   : > { %v3110_v44 = vadd.f32 %v3021_v11, %v11965_v37  ;;  %v3347_v5 = vpop.f32.mrf.mxu0  ;;  %v10885_v11 = vld [vmem:[#allocation3 + $0x120] sm:$0xff]  }
 0x2ba   : > { %v10052_v48 = vpop.f32.mrf.mxu1 }
 0x2bb   : > { %v12117_v53 = vadd.f32 %v3347_v5, %v3110_v44  ;;  %v10112_v14 = vpop.f32.mrf.mxu0 }
 0x2bc   : > { %v3026_v54 = vpop.f32.mrf.mxu1  ;;  %10286 = vmatmul.mubr.msk.bf16.gmra.mxu1 %vm978_vm3, %v10882_v49 }
 0x2bd   : > { %v3111_v25 = vadd.f32 %v3026_v54, %v11977_v52  ;;  %v3352_v57 = vpop.f32.mrf.mxu0  ;;  %10289 = vmatprep.mubr.msk.bf16.mxu1 %vm11131_vm2, %v13196_v24 }
 0x2be   : > { %v10055_v23 = vpop.f32.mrf.mxu1 }
 0x2bf   : > { %v12123_v58 = vadd.f32 %v3352_v57, %v3111_v25  ;;  %v10115_v60 = vpop.f32.mrf.mxu0 }
 0x2c0   : > { %v3029_v37 = vpop.f32.mrf.mxu1 }
 0x2c1   : > { %v3112_v62 = vadd.f32 %v3029_v37, %v11981_v31  ;;  %v3355_v2 = vpop.f32.mrf.mxu0  ;;  %v10886_v37 = vld [vmem:[#allocation3 + $0x128] sm:$0xff]  }
 0x2c2   : > { %v10056_v3 = vpop.f32.mrf.mxu1 }
 0x2c3   : > { %v12126_v21 = vadd.f32 %v3355_v2, %v3112_v62  ;;  %v10116_v8 = vpop.f32.mrf.mxu0 }
 0x2c4   : > { %v3034_v50 = vpop.f32.mrf.mxu1  ;;  %10290 = vmatmul.mubr.msk.bf16.gmra.mxu1 %vm978_vm3, %v10883_v33 }
 0x2c5   : > { %v3113_v52 = vadd.f32 %v3034_v50, %v11990_v4  ;;  %v3360_v9 = vpop.f32.mrf.mxu0  ;;  %10293 = vmatprep.mubr.msk.bf16.mxu1 %vm11131_vm2, %v13196_v24 }
 0x2c6   : > { %v10059_v10 = vpop.f32.mrf.mxu1 }
 0x2c7   : > { %v12132_v15 = vadd.f32 %v3360_v9, %v3113_v52  ;;  %v10119_v16 = vpop.f32.mrf.mxu0 }
 0x2c8   : > { %v3037_v31 = vpop.f32.mrf.mxu1 }
 0x2c9   : > { %v3114_v17 = vadd.f32 %v3037_v31, %v11993_v29  ;;  %v3363_v18 = vpop.f32.mrf.mxu0 }
 0x2ca   : > { %v10060_v19 = vpop.f32.mrf.mxu1 }
 0x2cb   : > { %v12135_v22 = vadd.f32 %v3363_v18, %v3114_v17  ;;  %v10120_v26 = vpop.f32.mrf.mxu0  ;;  %v10887_v17 = vld [vmem:[#allocation3 + $0x130] sm:$0xff]  }
 0x2cc   : > { %v3042_v0 = vpop.f32.mrf.mxu1  ;;  %10294 = vmatmul.mubr.msk.bf16.gmra.mxu1 %vm978_vm3, %v10884_v56 }
 0x2cd   : > { %v3115_v4 = vadd.f32 %v3042_v0, %v12002_v36  ;;  %v3368_v28 = vpop.f32.mrf.mxu0  ;;  %10297 = vmatprep.mubr.msk.bf16.mxu1 %vm11131_vm2, %v13196_v24 }
 0x2ce   : > { %v10063_v32 = vpop.f32.mrf.mxu1 }
 0x2cf   : > { %v12141_v43 = vadd.f32 %v3368_v28, %v3115_v4  ;;  %v10123_v34 = vpop.f32.mrf.mxu0 }
 0x2d0   : > { %v3045_v29 = vpop.f32.mrf.mxu1 }
 0x2d1   : > { %v3116_v35 = vadd.f32 %v3045_v29, %v12005_v45  ;;  %v3371_v40 = vpop.f32.mrf.mxu0 }
 0x2d2   : > { %v10064_v42 = vpop.f32.mrf.mxu1 }
 0x2d3   : > { %v12144_v44 = vadd.f32 %v3371_v40, %v3116_v35  ;;  %v10124_v5 = vpop.f32.mrf.mxu0  ;;  %v10888_v40 = vld [vmem:[#allocation3 + $0x138] sm:$0xff]  }
 0x2d4   : > { %v3050_v48 = vpop.f32.mrf.mxu1  ;;  %10298 = vmatmul.mubr.msk.bf16.gmra.mxu1 %vm978_vm3, %v10885_v11 }
 0x2d5   : > { %v3117_v36 = vadd.f32 %v3050_v48, %v12014_v51  ;;  %v3376_v49 = vpop.f32.mrf.mxu0  ;;  %10301 = vmatprep.mubr.msk.bf16.mxu1 %vm11131_vm2, %v13196_v24  ;;  %v10894_v51 = vld [vmem:[%s13184_s7 + $0x78] sm:$0xff]  }
 0x2d6   : > { %v10067_v14 = vpop.f32.mrf.mxu1  ;;  %10333 = vmatprep.subr.bf16.mxu0 %v10894_v51 }
 0x2d7   : > { %v12150_v54 = vadd.f32 %v3376_v49, %v3117_v36  ;;  %v10127_v25 = vpop.f32.mrf.mxu0  ;;  %10334 = vmatpush3.bf16.msra.mxu0 %v10894_v51 }
 0x2d8   : > { %v3053_v45 = vpop.f32.mrf.mxu1 }
 0x2d9   : > { %v3118_v57 = vadd.f32 %v3053_v45, %v12017_v59  ;;  %v3379_v23 = vpop.f32.mrf.mxu0 }
 0x2da   : > { %v10068_v60 = vpop.f32.mrf.mxu1 }
 0x2db   : > { %v12153_v62 = vadd.f32 %v3379_v23, %v3118_v57  ;;  %v10128_v2 = vpop.f32.mrf.mxu0  ;;  %v10889_v23 = vld [vmem:[#allocation3 + $0x140] sm:$0xff]  }
 0x2dc   : > { %v3058_v3 = vpop.f32.mrf.mxu1  ;;  %10302 = vmatmul.mubr.msk.bf16.gmra.mxu1 %vm978_vm3, %v10886_v37 }
 0x2dd   : > { %v3119_v33 = vadd.f32 %v3058_v3, %v12026_v63  ;;  %v3384_v8 = vpop.f32.mrf.mxu0  ;;  %10305 = vmatprep.mubr.msk.bf16.mxu1 %vm11131_vm2, %v13196_v24 }
 0x2de   : > { %v10071_v59 = vpop.f32.mrf.mxu1 }
 0x2df   : > { %v12162_v50 = vadd.f32 %v3384_v8, %v3119_v33  ;;  %v10131_v52 = vpop.f32.mrf.mxu0 }
 0x2e0   : > { %v3061_v9 = vpop.f32.mrf.mxu1 }
 0x2e1   : > { %v3120_v10 = vadd.f32 %v3061_v9, %v12029_v7  ;;  %v3387_v16 = vpop.f32.mrf.mxu0  ;;  %v10895_v7 = vld [vmem:[%s13184_s7 + $0x70] sm:$0xff]  }
 0x2e2   : > { %v10072_v31 = vpop.f32.mrf.mxu1  ;;  %10335 = vmatprep.subr.bf16.mxu0 %v10895_v7 }
 0x2e3   : > { %v12165_v18 = vadd.f32 %v3387_v16, %v3120_v10  ;;  %v10132_v19 = vpop.f32.mrf.mxu0  ;;  %10336 = vmatpush3.bf16.msra.mxu0 %v10895_v7  ;;  %v10890_v16 = vld [vmem:[#allocation3 + $0x148] sm:$0xff]  }
 0x2e4   : > { %v3066_v63 = vpop.f32.mrf.mxu1  ;;  %10306 = vmatmul.mubr.msk.bf16.gmra.mxu1 %vm978_vm3, %v10887_v17 }
 0x2e5   : > { %v3121_v56 = vadd.f32 %v3066_v63, %v12038_v12  ;;  %v3392_v26 = vpop.f32.mrf.mxu0  ;;  %10309 = vmatprep.mubr.msk.bf16.mxu1 %vm11131_vm2, %v13196_v24 }
 0x2e6   : > { %v10075_v0 = vpop.f32.mrf.mxu1 }
 0x2e7   : > { %v12171_v4 = vadd.f32 %v3392_v26, %v3121_v56  ;;  %v10135_v28 = vpop.f32.mrf.mxu0 }
 0x2e8   : > { %v3069_v32 = vpop.f32.mrf.mxu1 }
 0x2e9   : > { %v3122_v34 = vadd.f32 %v3069_v32, %v12041_v20  ;;  %v3395_v29 = vpop.f32.mrf.mxu0 }
 0x2ea   : > { %v10076_v35 = vpop.f32.mrf.mxu1 }
 0x2eb   : > { %v12177_v12 = vadd.f32 %v3395_v29, %v3122_v34  ;;  %v10136_v42 = vpop.f32.mrf.mxu0  ;;  %v10891_v34 = vld [vmem:[#allocation3 + $0x150] sm:$0xff]  }
 0x2ec   : > { %v3074_v11 = vpop.f32.mrf.mxu1  ;;  %10310 = vmatmul.mubr.msk.bf16.gmra.mxu1 %vm978_vm3, %v10888_v40 }
 0x2ed   : > { %v3123_v5 = vadd.f32 %v3074_v11, %v12050_v27  ;;  %v3400_v48 = vpop.f32.mrf.mxu0  ;;  %10313 = vmatprep.mubr.msk.bf16.mxu1 %vm11131_vm2, %v13196_v24  ;;  %v10896_v27 = vld [vmem:[%s13184_s7 + $0x68] sm:$0xff]  }
 0x2ee   : > { %v10079_v36 = vpop.f32.mrf.mxu1  ;;  %10337 = vmatprep.subr.bf16.mxu0 %v10896_v27 }
 0x2ef   : > { %v12183_v49 = vadd.f32 %v3400_v48, %v3123_v5  ;;  %v10139_v20 = vpop.f32.mrf.mxu0  ;;  %10338 = vmatpush3.bf16.msra.mxu0 %v10896_v27 }
 0x2f0   : > { %v3077_v14 = vpop.f32.mrf.mxu1 }
 0x2f1   : > { %v3124_v25 = vadd.f32 %v3077_v14, %v12053_v39  ;;  %v3403_v45 = vpop.f32.mrf.mxu0  ;;  %v10892_v14 = vld [vmem:[#allocation3 + $0x158] sm:$0xff]  }
 0x2f2   : > { %v10080_v57 = vpop.f32.mrf.mxu1 }
 0x2f3   : > { %v12186_v60 = vadd.f32 %v3403_v45, %v3124_v25  ;;  %v10140_v37 = vpop.f32.mrf.mxu0  ;;  %v10898_v57 = vld [vmem:[%s13184_s7 + $0x60] sm:$0xff]  }
 0x2f4   : > { %v3082_v2 = vpop.f32.mrf.mxu1  ;;  %10314 = vmatmul.mubr.msk.bf16.gmra.mxu1 %vm978_vm3, %v10889_v23  ;;  %10339 = vmatprep.subr.bf16.mxu0 %v10898_v57 }
 0x2f5   : > { %v3125_v51 = vadd.f32 %v3082_v2, %v12062_v46  ;;  %v3408_v3 = vpop.f32.mrf.mxu0  ;;  %10317 = vmatprep.mubr.msk.bf16.mxu1 %vm11131_vm2, %v13196_v24  ;;  %10340 = vmatpush3.bf16.msra.mxu0 %v10898_v57 }
 0x2f6   : > { %v10083_v39 = vpop.f32.mrf.mxu1 }
 0x2f7   : > { %v12195_v33 = vadd.f32 %v3408_v3, %v3125_v51  ;;  %v10143_v8 = vpop.f32.mrf.mxu0  ;;  %v10899_v39 = vld [vmem:[%s13184_s7 + $0x30] sm:$0xff]  }
 0x2f8   : > { %v3085_v59 = vpop.f32.mrf.mxu1 }
 0x2f9   : > { %v3126_v52 = vadd.f32 %v3085_v59, %v12065_v55  ;;  %v3411_v9 = vpop.f32.mrf.mxu0 }
 0x2fa   : > { %v10084_v10 = vpop.f32.mrf.mxu1 }
 0x2fb   : > { %v12198_v31 = vadd.f32 %v3411_v9, %v3126_v52  ;;  %v10144_v17 = vpop.f32.mrf.mxu0  ;;  %v10893_v52 = vld [vmem:[#allocation3 + $0x160] sm:$0xff]  }
 0x2fc   : > { %v3090_v46 = vpop.f32.mrf.mxu1  ;;  %10318 = vmatmul.mubr.msk.bf16.gmra.mxu1 %vm978_vm3, %v10890_v16 }
 0x2fd   : > { %v3127_v19 = vadd.f32 %v3090_v46, %v12074_v61  ;;  %v3416_v63 = vpop.f32.mrf.mxu0  ;;  %10321 = vmatprep.mubr.msk.bf16.mxu1 %vm11131_vm2, %v13196_v24 }
 0x2fe   : > { %v10087_v56 = vpop.f32.mrf.mxu1 }
 0x2ff   : > { %v12204_v26 = vadd.f32 %v3416_v63, %v3127_v19  ;;  %v10147_v0 = vpop.f32.mrf.mxu0 }
 0x300   : > { %v3093_v55 = vpop.f32.mrf.mxu1 }
 0x301   : > { %v3128_v28 = vadd.f32 %v3093_v55, %v12077_v6  ;;  %v3419_v7 = vpop.f32.mrf.mxu0  ;;  %v10901_v55 = vld [vmem:[%s13184_s7 + $0x20] sm:$0xff]  }
 0x302   : > { %v10088_v32 = vpop.f32.mrf.mxu1 }
 0x303   : > { %v12207_v29 = vadd.f32 %v3419_v7, %v3128_v28  ;;  %v10148_v35 = vpop.f32.mrf.mxu0 }
 0x304   : > { %v3098_v40 = vpop.f32.mrf.mxu1  ;;  %10322 = vmatmul.mubr.msk.bf16.gmra.mxu1 %vm978_vm3, %v10891_v34 }
 0x305   : > { %v3129_v61 = vadd.f32 %v3098_v40, %v12086_v13  ;;  %v3424_v42 = vpop.f32.mrf.mxu0  ;;  %10325 = vmatprep.mubr.msk.bf16.mxu1 %vm11131_vm2, %v13196_v24  ;;  %v10897_v13 = vld [vmem:[%s13184_s7 + $0x38] sm:$0xff]  }
 0x306   : > { %v10091_v11 = vpop.f32.mrf.mxu1  ;;  %10369 = vmatprep.subr.bf16.mxu1 %v10897_v13  ;;  %v10902_v40 = vld [vmem:[%s13184_s7 + $0x58] sm:$0xff]  }
 0x307   : > { %v12213_v5 = vadd.f32 %v3424_v42, %v3129_v61  ;;  %v10151_v48 = vpop.f32.mrf.mxu0  ;;  %10370 = vmatpush3.bf16.msra.mxu1 %v10897_v13  ;;  %v10903_v61 = vld [vmem:[%s13184_s7 + $0x18] sm:$0xff]   ;;  %10341 = vmatprep.subr.bf16.mxu0 %v10902_v40 }
 0x308   : > { %v3101_v6 = vpop.f32.mrf.mxu1  ;;  %10371 = vmatprep.subr.bf16.mxu1 %v10899_v39  ;;  %10342 = vmatpush3.bf16.msra.mxu0 %v10902_v40 }
 0x309   : > { %v3427_v36 = vpop.f32.mrf.mxu0 }
 0x30a   : > { %v10092_v20 = vpop.f32.mrf.mxu1 }
 0x30b   : > { %v10152_v25 = vpop.f32.mrf.mxu0  ;;  %10372 = vmatpush3.bf16.msra.mxu1 %v10899_v39  ;;  %v10904_v20 = vld [vmem:[%s13184_s7 + $0x10] sm:$0xff]   ;;  %v10906_v39 = vld [vmem:[%s13184_s7 + $0x8] sm:$0xff]  }
 0x30c   : > { %v3654_v45 = vpop.f32.mrf.mxu1  ;;  %10326 = vmatmul.mubr.msk.bf16.gmra.mxu1 %vm978_vm3, %v10892_v14 }
 0x30d   : > { %v3757_v23 = vadd.f32 %v3654_v45, %v12095_v1  ;;  %v3980_v37 = vpop.f32.mrf.mxu0  ;;  %10329 = vmatprep.mubr.msk.bf16.mxu1 %vm11131_vm2, %v13196_v24 }
 0x30e   : > { %v10163_v27 = vpop.f32.mrf.mxu1 }
 0x30f   : > { %v12225_v2 = vadd.f32 %v3980_v37, %v3757_v23  ;;  %v10223_v51 = vpop.f32.mrf.mxu0 }
 0x310   : > { %v3657_v3 = vpop.f32.mrf.mxu1 }
 0x311   : > { %v3758_v8 = vadd.f32 %v3657_v3, %v12098_v47  ;;  %v3983_v1 = vpop.f32.mrf.mxu0  ;;  %v10900_v47 = vld [vmem:[%s13184_s7 + $0x28] sm:$0xff]  }
 0x312   : > { %v10164_v59 = vpop.f32.mrf.mxu1  ;;  %10373 = vmatprep.subr.bf16.mxu1 %v10900_v47 }
 0x313   : > { %v12231_v9 = vadd.f32 %v3983_v1, %v3758_v8  ;;  %v10224_v10 = vpop.f32.mrf.mxu0  ;;  %10374 = vmatpush3.bf16.msra.mxu1 %v10900_v47  ;;  %v10908_v1 = vld [vmem:[%s13184_s7 + $0x48] sm:$0xff]  }
 0x314   : > { %v3662_v16 = vpop.f32.mrf.mxu1  ;;  %10330 = vmatmul.mubr.msk.bf16.gmra.mxu1 %vm978_vm3, %v10893_v52  ;;  %10375 = vmatprep.subr.bf16.mxu1 %v10901_v55 }
 0x315   : > { %v3759_v17 = vadd.f32 %v3662_v16, %v12105_v38  ;;  %v3988_v46 = vpop.f32.mrf.mxu0 }
 0x316   : > { %v10167_v19 = vpop.f32.mrf.mxu1 }
 0x317   : > { %v12235_v63 = vadd.f32 %v3988_v46, %v3759_v17  ;;  %v10227_v56 = vpop.f32.mrf.mxu0  ;;  %10376 = vmatpush3.bf16.msra.mxu1 %v10901_v55  ;;  %v10911_v19 = vld [vmem:[%s13184_s7 + $0x40] sm:$0xff]  }
 0x318   : > { %v3665_v0 = vpop.f32.mrf.mxu1  ;;  %10377 = vmatprep.subr.bf16.mxu1 %v10903_v61 }
 0x319   : > { %v3760_v28 = vadd.f32 %v3665_v0, %v12108_v30  ;;  %v3991_v7 = vpop.f32.mrf.mxu0 }
 0x31a   : > { %v10168_v32 = vpop.f32.mrf.mxu1 }
 0x31b   : > { %v12244_v38 = vadd.f32 %v3991_v7, %v3760_v28  ;;  %v10228_v34 = vpop.f32.mrf.mxu0  ;;  %10378 = vmatpush3.bf16.msra.mxu1 %v10903_v61 }
 0x31c   : > { %v3670_v35 = vpop.f32.mrf.mxu1  ;;  %10379 = vmatprep.subr.bf16.mxu1 %v10904_v20 }
 0x31d   : > { %v3761_v42 = vadd.f32 %v3670_v35, %v12114_v41  ;;  %v3996_v30 = vpop.f32.mrf.mxu0 }
 0x31e   : > { %v10171_v11 = vpop.f32.mrf.mxu1 }
 0x31f   : > { %v12253_v48 = vadd.f32 %v3996_v30, %v3761_v42  ;;  %v10231_v6 = vpop.f32.mrf.mxu0  ;;  %10380 = vmatpush3.bf16.msra.mxu1 %v10904_v20 }
 0x320   : > { %v3673_v36 = vpop.f32.mrf.mxu1  ;;  %10381 = vmatprep.subr.bf16.mxu1 %v10906_v39 }
 0x321   : > { %v3762_v14 = vadd.f32 %v3673_v36, %v12117_v53  ;;  %v3999_v25 = vpop.f32.mrf.mxu0  ;;  %v10905_v53 = vld [vmem:[%s13184_s7 + $0x50] sm:$0xff]  }
 0x322   : > { %v10172_v45 = vpop.f32.mrf.mxu1  ;;  %10343 = vmatprep.subr.bf16.mxu0 %v10905_v53 }
 0x323   : > { %v12259_v41 = vadd.f32 %v3999_v25, %v3762_v14  ;;  %v10232_v13 = vpop.f32.mrf.mxu0  ;;  %10344 = vmatpush3.bf16.msra.mxu0 %v10905_v53  ;;  %10382 = vmatpush3.bf16.msra.mxu1 %v10906_v39 }
 0x324   : > { %v3678_v57 = vpop.f32.mrf.mxu1  ;;  %10345 = vmatprep.subr.bf16.mxu0 %v10908_v1 }
 0x325   : > { %v3763_v23 = vadd.f32 %v3678_v57, %v12123_v58  ;;  %v4004_v37 = vpop.f32.mrf.mxu0  ;;  %v10910_v58 = vld [vmem:[%s13184_s7] sm:$0xff]  }
 0x326   : > { %v10175_v27 = vpop.f32.mrf.mxu1  ;;  %10383 = vmatprep.subr.bf16.mxu1 %v10910_v58 }
 0x327   : > { %v12262_v51 = vadd.f32 %v4004_v37, %v3763_v23  ;;  %v10235_v3 = vpop.f32.mrf.mxu0  ;;  %10346 = vmatpush3.bf16.msra.mxu0 %v10908_v1  ;;  %10384 = vmatpush3.bf16.msra.mxu1 %v10910_v58 }
 0x328   : > { %v3681_v8 = vpop.f32.mrf.mxu1  ;;  %10347 = vmatprep.subr.bf16.mxu0 %v10911_v19 }
 0x329   : > { %v3764_v59 = vadd.f32 %v3681_v8, %v12126_v21  ;;  %v4007_v52 = vpop.f32.mrf.mxu0 }
 0x32a   : > { %v10176_v10 = vpop.f32.mrf.mxu1 }
 0x32b   : > { %v12277_v16 = vadd.f32 %v4007_v52, %v3764_v59  ;;  %v10236_v17 = vpop.f32.mrf.mxu0  ;;  %10348 = vmatpush3.bf16.msra.mxu0 %v10911_v19 }
 0x32c   : > { %v3686_v46 = vpop.f32.mrf.mxu1 }
 0x32d   : > { %v3765_v56 = vadd.f32 %v3686_v46, %v12132_v15  ;;  %v4012_v47 = vpop.f32.mrf.mxu0 }
 0x32e   : > { %v10179_v21 = vpop.f32.mrf.mxu1 }
 0x32f   : > { %v12283_v0 = vadd.f32 %v4012_v47, %v3765_v56  ;;  %v10239_v55 = vpop.f32.mrf.mxu0 }
 0x330   : > { %v3689_v28 = vpop.f32.mrf.mxu1 }
 0x331   : > { %v3766_v7 = vadd.f32 %v3689_v28, %v12135_v22  ;;  %v4015_v32 = vpop.f32.mrf.mxu0 }
 0x332   : > { %v10180_v34 = vpop.f32.mrf.mxu1 }
 0x333   : > { %v12286_v35 = vadd.f32 %v4015_v32, %v3766_v7  ;;  %v10240_v40 = vpop.f32.mrf.mxu0 }
 0x334   : > { %v3694_v61 = vpop.f32.mrf.mxu1 }
 0x335   : > { %v3767_v15 = vadd.f32 %v3694_v61, %v12141_v43  ;;  %v4020_v42 = vpop.f32.mrf.mxu0  ;;  %v12312_v61 = vld [vmem:[%s13184_s7 + $0xb8] sm:$0xff]  }
 0x336   : > { %v10183_v30 = vpop.f32.mrf.mxu1  ;;  %10405 = vmatprep.subr.bf16.mxu0 %v12312_v61 }
 0x337   : > { %v12289_v11 = vadd.f32 %v4020_v42, %v3767_v15  ;;  %v10243_v6 = vpop.f32.mrf.mxu0 }
 0x338   : > { %v3697_v36 = vpop.f32.mrf.mxu1 }
 0x339   : > { %v3768_v20 = vadd.f32 %v3697_v36, %v12144_v44  ;;  %v4023_v14 = vpop.f32.mrf.mxu0 }
 0x33a   : > { %v10184_v25 = vpop.f32.mrf.mxu1 }
 0x33b   : > { %v12292_v22 = vadd.f32 %v4023_v14, %v3768_v20  ;;  %v10244_v45 = vpop.f32.mrf.mxu0 }
 0x33c   : > { %v3702_v13 = vpop.f32.mrf.mxu1 }
 0x33d   : > { %v3769_v57 = vadd.f32 %v3702_v13, %v12150_v54  ;;  %v4028_v23 = vpop.f32.mrf.mxu0  ;;  %v12324_v13 = vld [vmem:[%s13184_s7 + $0xf8] sm:$0xff]  }
 0x33e   : > { %v10187_v37 = vpop.f32.mrf.mxu1  ;;  %10441 = vmatprep.subr.bf16.mxu1 %v12324_v13 }
 0x33f   : > { %v12295_v27 = vadd.f32 %v4028_v23, %v3769_v57  ;;  %v10247_v43 = vpop.f32.mrf.mxu0 }
 0x340   : > { %v3705_v3 = vpop.f32.mrf.mxu1 }
 0x341   : > { %v3770_v53 = vadd.f32 %v3705_v3, %v12153_v62  ;;  %v4031_v39 = vpop.f32.mrf.mxu0 }
 0x342   : > { %v10188_v8 = vpop.f32.mrf.mxu1 }
 0x343   : > { %v12298_v1 = vadd.f32 %v4031_v39, %v3770_v53  ;;  %v10248_v44 = vpop.f32.mrf.mxu0 }
 0x344   : > { %v3710_v58 = vpop.f32.mrf.mxu1 }
 0x345   : > { %v3771_v59 = vadd.f32 %v3710_v58, %v12162_v50  ;;  %v4036_v52 = vpop.f32.mrf.mxu0 }
 0x346   : > { %v10191_v10 = vpop.f32.mrf.mxu1 }
 0x347   : > { %v12301_v17 = vadd.f32 %v4036_v52, %v3771_v59  ;;  %v10251_v54 = vpop.f32.mrf.mxu0 }
 0x348   : > { %v3713_v46 = vpop.f32.mrf.mxu1 }
 0x349   : > { %v3772_v19 = vadd.f32 %v3713_v46, %v12165_v18  ;;  %v4039_v56 = vpop.f32.mrf.mxu0 }
 0x34a   : > { %v10192_v47 = vpop.f32.mrf.mxu1 }
 0x34b   : > { %v12304_v21 = vadd.f32 %v4039_v56, %v3772_v19  ;;  %v10252_v62 = vpop.f32.mrf.mxu0 }
 0x34c   : > { %v3718_v55 = vpop.f32.mrf.mxu1 }
 0x34d   : > { %v3773_v28 = vadd.f32 %v3718_v55, %v12171_v4  ;;  %v4044_v7 = vpop.f32.mrf.mxu0 }
 0x34e   : > { %v10195_v32 = vpop.f32.mrf.mxu1 }
 0x34f   : > { %v12307_v34 = vadd.f32 %v4044_v7, %v3773_v28  ;;  %v10255_v50 = vpop.f32.mrf.mxu0 }
 0x350   : > { %v3721_v40 = vpop.f32.mrf.mxu1 }
 0x351   : > { %v3774_v18 = vadd.f32 %v3721_v40, %v12177_v12  ;;  %v4047_v15 = vpop.f32.mrf.mxu0 }
 0x352   : > { %v10196_v42 = vpop.f32.mrf.mxu1 }
 0x353   : > { %v12316_v30 = vadd.f32 %v4047_v15, %v3774_v18  ;;  %v10256_v4 = vpop.f32.mrf.mxu0 }
 0x354   : > { %v3726_v6 = vpop.f32.mrf.mxu1 }
 0x355   : > { %v3775_v36 = vadd.f32 %v3726_v6, %v12183_v49  ;;  %v4052_v20 = vpop.f32.mrf.mxu0 }
 0x356   : > { %v10199_v14 = vpop.f32.mrf.mxu1 }
 0x357   : > { %v12319_v25 = vadd.f32 %v4052_v20, %v3775_v36  ;;  %v10259_v45 = vpop.f32.mrf.mxu0 }
 0x358   : > { %v3729_v12 = vpop.f32.mrf.mxu1 }
 0x359   : > { %v3776_v57 = vadd.f32 %v3729_v12, %v12186_v60  ;;  %v4055_v23 = vpop.f32.mrf.mxu0 }
 0x35a   : > { %v10200_v37 = vpop.f32.mrf.mxu1 }
 0x35b   : > { %v12328_v43 = vadd.f32 %v4055_v23, %v3776_v57  ;;  %v10260_v49 = vpop.f32.mrf.mxu0 }
 0x35c   : > { %v3734_v3 = vpop.f32.mrf.mxu1 }
 0x35d   : > { %v3777_v53 = vadd.f32 %v3734_v3, %v12195_v33  ;;  %v4060_v39 = vpop.f32.mrf.mxu0 }
 0x35e   : > { %v10203_v8 = vpop.f32.mrf.mxu1 }
 0x35f   : > { %v12331_v44 = vadd.f32 %v4060_v39, %v3777_v53  ;;  %v10263_v58 = vpop.f32.mrf.mxu0 }
 0x360   : > { %v3737_v59 = vpop.f32.mrf.mxu1 }
 0x361   : > { %v3778_v52 = vadd.f32 %v3737_v59, %v12198_v31  ;;  %v4063_v10 = vpop.f32.mrf.mxu0 }
 0x362   : > { %v10204_v60 = vpop.f32.mrf.mxu1 }
 0x363   : > { %v12334_v54 = vadd.f32 %v4063_v10, %v3778_v52  ;;  %v10264_v46 = vpop.f32.mrf.mxu0 }
 0x364   : > { %v3742_v19 = vpop.f32.mrf.mxu1 }
 0x365   : > { %v3779_v56 = vadd.f32 %v3742_v19, %v12204_v26  ;;  %v4068_v47 = vpop.f32.mrf.mxu0 }
 0x366   : > { %v10207_v62 = vpop.f32.mrf.mxu1 }
 0x367   : > { %v12337_v55 = vadd.f32 %v4068_v47, %v3779_v56  ;;  %v10267_v33 = vpop.f32.mrf.mxu0 }
 0x368   : > { %v3745_v28 = vpop.f32.mrf.mxu1 }
 0x369   : > { %v3780_v7 = vadd.f32 %v3745_v28, %v12207_v29  ;;  %v4071_v32 = vpop.f32.mrf.mxu0  ;;  %v12348_v29 = vld [vmem:[%s13182_s5] ss:$0 sm:$0xff] }
 0x36a   : > { %v10208_v50 = vpop.f32.mrf.mxu1 }
 0x36b   : > { %v12340_v40 = vadd.f32 %v4071_v32, %v3780_v7  ;;  %v10268_v31 = vpop.f32.mrf.mxu0 }
 0x36c   : > { %v3750_v18 = vpop.f32.mrf.mxu1 }
 0x36d   : > { %v3781_v15 = vadd.f32 %v3750_v18, %v12213_v5  ;;  %v4076_v42 = vpop.f32.mrf.mxu0  ;;  %v12354_v5 = vld [vmem:[%s13183_s6] ss:$0 sm:$0xff] }
 0x36e   : > { %v10211_v4 = vpop.f32.mrf.mxu1 }
 0x36f   : > { %v12343_v6 = vadd.f32 %v4076_v42, %v3781_v15  ;;  %v10271_v26 = vpop.f32.mrf.mxu0 }
 0x370   : > { %v3753_v36 = vpop.f32.mrf.mxu1 }
 0x371   : > { %v4079_v20 = vpop.f32.mrf.mxu0 }
 0x372   : > { %v10212_v14 = vpop.f32.mrf.mxu1 }
 0x373   : > { %v10272_v45 = vpop.f32.mrf.mxu0 }
 0x374   : > { %v4306_v12 = vpop.f32.mrf.mxu1 }
 0x375   : > { %v4409_v57 = vadd.f32 %v4306_v12, %v12225_v2 }
 0x376   : > { %v10283_v23 = vpop.f32.mrf.mxu1 }
 0x377   : > { %v4442_v37 = vmul.f32 %v12348_v29, %v4409_v57 }
 0x378   : > { %v4309_v49 = vpop.f32.mrf.mxu1 }
 0x379   : > { %v4475_v3 = vadd.f32 %v12354_v5, %v4442_v37  ;;  %v4410_v53 = vadd.f32 %v4309_v49, %v12231_v9 }
 0x37a   : > { %v10284_v39 = vpop.f32.mrf.mxu1 }
 0x37b   : > { %v4501_v8 = vmax.f32 %v4475_v3, 0.0  ;;  %v4443_v58 = vmul.f32 %v12348_v29, %v4410_v53 }
 0x37c   : > { %v4314_v59 = vpop.f32.mrf.mxu1 }
 0x37d   : > { %4527 = vst [vmem:[#allocation4] sm:$0xff] %v4501_v8  ;;  %v4476_v2 = vadd.f32 %v12354_v5, %v4443_v58  ;;  %v4411_v52 = vadd.f32 %v4314_v59, %v12235_v63 }
 0x37e   : > { %v10287_v10 = vpop.f32.mrf.mxu1 }
 0x37f   : > { %v4502_v60 = vmax.f32 %v4476_v2, 0.0  ;;  %v4444_v46 = vmul.f32 %v12348_v29, %v4411_v52  ;;  %v10927_v10 = vld [vmem:[%s13184_s7 + $0xf0] sm:$0xff]  }
 0x380   : > { %v4317_v19 = vpop.f32.mrf.mxu1 }
 0x381   : > { %4528 = vst [vmem:[#allocation4 + $0x8] sm:$0xff] %v4502_v60  ;;  %v4477_v56 = vadd.f32 %v12354_v5, %v4444_v46  ;;  %v4412_v9 = vadd.f32 %v4317_v19, %v12244_v38  ;;  %v9196_v47 = vpack.c.bf16 %v4502_v60, %v4501_v8 }
 0x382   : > { %v10288_v62 = vpop.f32.mrf.mxu1 }
 0x383   : > { %v4503_v33 = vmax.f32 %v4477_v56, 0.0  ;;  %v4445_v28 = vmul.f32 %v12348_v29, %v4412_v9  ;;  %9197 = vst [vmem:[#allocation5] sm:$0xff] %v9196_v47  }
 0x384   : > { %v4322_v7 = vpop.f32.mrf.mxu1 }
 0x385   : > { %4529 = vst [vmem:[#allocation4 + $0x10] sm:$0xff] %v4503_v33  ;;  %v4478_v63 = vadd.f32 %v12354_v5, %v4445_v28  ;;  %v4413_v32 = vadd.f32 %v4322_v7, %v12253_v48 }
 0x386   : > { %v10291_v50 = vpop.f32.mrf.mxu1 }
 0x387   : > { %v4504_v31 = vmax.f32 %v4478_v63, 0.0  ;;  %v4446_v18 = vmul.f32 %v12348_v29, %v4413_v32  ;;  %v10930_v32 = vld [vmem:[%s13184_s7 + $0xe8] sm:$0xff]  }
 0x388   : > { %v4325_v15 = vpop.f32.mrf.mxu1  ;;  %v4697_v20 = vld [vmem:[#allocation4 + $0x1] sm:$0xff] }
 0x389   : > { %4530 = vst [vmem:[#allocation4 + $0x18] sm:$0xff] %v4504_v31  ;;  %v9201_v42 = vpack.c.bf16 %v4504_v31, %v4503_v33  ;;  %v4479_v38 = vadd.f32 %v12354_v5, %v4446_v18  ;;  %v4414_v4 = vadd.f32 %v4325_v15, %v12259_v41  ;;  %v4842_v12 = vld [vmem:[#allocation4 + $0x2] sm:$0xff] }
 0x38a   : > { %v10292_v26 = vpop.f32.mrf.mxu1  ;;  %v10907_v36 = vld [vmem:[#allocation5] sm:$0xff]  }
 0x38b   : > { %9373 = vst [vmem:[#allocation5 + $0x8] sm:$0xff] %v9201_v42   ;;  %v4505_v14 = vmax.f32 %v4479_v38, 0.0  ;;  %v4447_v45 = vmul.f32 %v12348_v29, %v4414_v4  ;;  %10385 = vmatprep.mubr.bf16.mxu1 %v10907_v36  ;;  %v10933_v4 = vld [vmem:[%s13184_s7 + $0xe0] sm:$0xff]  }
 0x38c   : > { %v4698_v48 = vld [vmem:[#allocation4 + $0x9] sm:$0xff]  ;;  %v4330_v23 = vpop.f32.mrf.mxu1 }
 0x38d   : > { %v4843_v57 = vld [vmem:[#allocation4 + $0xa] sm:$0xff]  ;;  %4531 = vst [vmem:[#allocation4 + $0x20] sm:$0xff] %v4505_v14  ;;  %v4480_v37 = vadd.f32 %v12354_v5, %v4447_v45  ;;  %v4415_v49 = vadd.f32 %v4330_v23, %v12262_v51  ;;  %v9256_v3 = vpack.c.bf16 %v4698_v48, %v4697_v20 }
 0x38e   : > { %v9316_v53 = vpack.c.bf16 %v4843_v57, %v4842_v12  ;;  %v10295_v41 = vpop.f32.mrf.mxu1 }
 0x38f   : > { %v4506_v39 = vmax.f32 %v4480_v37, 0.0  ;;  %v4448_v8 = vmul.f32 %v12348_v29, %v4415_v49  ;;  %9257 = vst [vmem:[#allocation5 + $0x60] sm:$0xff] %v9256_v3   ;;  %v10924_v3 = vld [vmem:[%s13184_s7 + $0xb0] sm:$0xff]  }
 0x390   : > { %9317 = vst [vmem:[#allocation5 + $0xc0] sm:$0xff] %v9316_v53   ;;  %v4333_v58 = vpop.f32.mrf.mxu1  ;;  %v4699_v46 = vld [vmem:[#allocation4 + $0x11] sm:$0xff] }
 0x391   : > { %4532 = vst [vmem:[#allocation4 + $0x28] sm:$0xff] %v4506_v39  ;;  %v4481_v59 = vadd.f32 %v12354_v5, %v4448_v8  ;;  %v4416_v2 = vadd.f32 %v4333_v58, %v12277_v16  ;;  %v9206_v52 = vpack.c.bf16 %v4506_v39, %v4505_v14  ;;  %v4844_v9 = vld [vmem:[#allocation4 + $0x12] sm:$0xff] }
 0x392   : > { %v10296_v51 = vpop.f32.mrf.mxu1  ;;  %v10912_v60 = vld [vmem:[#allocation5 + $0x8] sm:$0xff]   ;;  %v10936_v53 = vld [vmem:[%s13184_s7 + $0xd8] sm:$0xff]  }
 0x393   : > { %v4507_v19 = vmax.f32 %v4481_v59, 0.0  ;;  %v4449_v56 = vmul.f32 %v12348_v29, %v4416_v2  ;;  %9374 = vst [vmem:[#allocation5 + $0x10] sm:$0xff] %v9206_v52   ;;  %10386 = vmatmul.mubr.bf16.vlgmr.msra.gmra.mxu1 %v10912_v60  ;;  %v10928_v2 = vld [vmem:[%s13184_s7 + $0xa8] sm:$0xff]   ;;  %v10939_v60 = vld [vmem:[%s13184_s7 + $0xd0] sm:$0xff]  }
 0x394   : > { %v4700_v47 = vld [vmem:[#allocation4 + $0x19] sm:$0xff]  ;;  %v4338_v33 = vpop.f32.mrf.mxu1  ;;  %10442 = vmatpush3.bf16.msra.mxu1 %v12324_v13 }
 0x395   : > { %v4845_v62 = vld [vmem:[#allocation4 + $0x1a] sm:$0xff]  ;;  %v9261_v28 = vpack.c.bf16 %v4700_v47, %v4699_v46  ;;  %4533 = vst [vmem:[#allocation4 + $0x30] sm:$0xff] %v4507_v19  ;;  %v4482_v16 = vadd.f32 %v12354_v5, %v4449_v56  ;;  %v4417_v63 = vadd.f32 %v4338_v33, %v12283_v0  ;;  %10443 = vmatprep.subr.bf16.mxu1 %v10927_v10 }
 0x396   : > { %v9321_v7 = vpack.c.bf16 %v4845_v62, %v4844_v9  ;;  %v10299_v50 = vpop.f32.mrf.mxu1  ;;  %v10909_v31 = vld [vmem:[#allocation5 + $0x60] sm:$0xff]  }
 0x397   : > { %9384 = vst [vmem:[#allocation5 + $0x68] sm:$0xff] %v9261_v28   ;;  %v4508_v18 = vmax.f32 %v4482_v16, 0.0  ;;  %v4450_v15 = vmul.f32 %v12348_v29, %v4417_v63  ;;  %10349 = vmatprep.mubr.bf16.mxu0 %v10909_v31 }
 0x398   : > { %9395 = vst [vmem:[#allocation5 + $0xc8] sm:$0xff] %v9321_v7   ;;  %v4341_v42 = vpop.f32.mrf.mxu1  ;;  %10444 = vmatpush3.bf16.msra.mxu1 %v10927_v10  ;;  %v4701_v26 = vld [vmem:[#allocation4 + $0x21] sm:$0xff] }
 0x399   : > { %4534 = vst [vmem:[#allocation4 + $0x38] sm:$0xff] %v4508_v18  ;;  %v9211_v38 = vpack.c.bf16 %v4508_v18, %v4507_v19  ;;  %v4483_v0 = vadd.f32 %v12354_v5, %v4450_v15  ;;  %v4418_v13 = vadd.f32 %v4341_v42, %v12286_v35  ;;  %10445 = vmatprep.subr.bf16.mxu1 %v10930_v32  ;;  %v4846_v14 = vld [vmem:[#allocation4 + $0x22] sm:$0xff] }
 0x39a   : > { %v10300_v36 = vpop.f32.mrf.mxu1  ;;  %v10914_v20 = vld [vmem:[#allocation5 + $0x10] sm:$0xff]  }
 0x39b   : > { %9375 = vst [vmem:[#allocation5 + $0x18] sm:$0xff] %v9211_v38   ;;  %v4509_v45 = vmax.f32 %v4483_v0, 0.0  ;;  %v4451_v12 = vmul.f32 %v12348_v29, %v4418_v13  ;;  %10389 = vmatprep.mubr.bf16.mxu1 %v10914_v20  ;;  %v10941_v42 = vld [vmem:[%s13184_s7 + $0xc8] sm:$0xff]   ;;  %v10934_v38 = vld [vmem:[%s13184_s7 + $0x98] sm:$0xff]  }
 0x39c   : > { %v4702_v48 = vld [vmem:[#allocation4 + $0x29] sm:$0xff]  ;;  %v4346_v23 = vpop.f32.mrf.mxu1  ;;  %10446 = vmatpush3.bf16.msra.mxu1 %v10930_v32  ;;  %v10931_v32 = vld [vmem:[%s13184_s7 + $0xa0] sm:$0xff]  }
 0x39d   : > { %v4847_v57 = vld [vmem:[#allocation4 + $0x2a] sm:$0xff]  ;;  %4535 = vst [vmem:[#allocation4 + $0x40] sm:$0xff] %v4509_v45  ;;  %v4484_v35 = vadd.f32 %v12354_v5, %v4451_v12  ;;  %v4419_v37 = vadd.f32 %v4346_v23, %v12289_v11  ;;  %v9266_v49 = vpack.c.bf16 %v4702_v48, %v4701_v26  ;;  %10447 = vmatprep.subr.bf16.mxu1 %v10933_v4  ;;  %v10945_v26 = vld [vmem:[%s13184_s7 + $0xc0] sm:$0xff]  }
 0x39e   : > { %v9326_v41 = vpack.c.bf16 %v4847_v57, %v4846_v14  ;;  %v10303_v39 = vpop.f32.mrf.mxu1  ;;  %v10913_v8 = vld [vmem:[#allocation5 + $0x68] sm:$0xff]  }
 0x39f   : > { %v4510_v58 = vmax.f32 %v4484_v35, 0.0  ;;  %v4452_v59 = vmul.f32 %v12348_v29, %v4419_v37  ;;  %9385 = vst [vmem:[#allocation5 + $0x70] sm:$0xff] %v9266_v49   ;;  %10350 = vmatmul.mubr.bf16.vlgmr.msra.gmra.mxu0 %v10913_v8 }
 0x3a0   : > { %9396 = vst [vmem:[#allocation5 + $0xd0] sm:$0xff] %v9326_v41   ;;  %v4349_v11 = vpop.f32.mrf.mxu1  ;;  %10406 = vmatpush3.bf16.msra.mxu0 %v12312_v61  ;;  %10448 = vmatpush3.bf16.msra.mxu1 %v10933_v4  ;;  %v4703_v46 = vld [vmem:[#allocation4 + $0x31] sm:$0xff] }
 0x3a1   : > { %4536 = vst [vmem:[#allocation4 + $0x48] sm:$0xff] %v4510_v58  ;;  %v4485_v52 = vadd.f32 %v12354_v5, %v4452_v59  ;;  %v4420_v10 = vadd.f32 %v4349_v11, %v12292_v22  ;;  %v9216_v51 = vpack.c.bf16 %v4510_v58, %v4509_v45  ;;  %10407 = vmatprep.subr.bf16.mxu0 %v10924_v3  ;;  %v4848_v9 = vld [vmem:[#allocation4 + $0x32] sm:$0xff] }
 0x3a2   : > { %v10304_v19 = vpop.f32.mrf.mxu1  ;;  %v10916_v56 = vld [vmem:[#allocation5 + $0x18] sm:$0xff]   ;;  %10449 = vmatprep.subr.bf16.mxu1 %v10936_v53 }
 0x3a3   : > { %v4511_v47 = vmax.f32 %v4485_v52, 0.0  ;;  %v4453_v62 = vmul.f32 %v12348_v29, %v4420_v10  ;;  %9376 = vst [vmem:[#allocation5 + $0x20] sm:$0xff] %v9216_v51   ;;  %10390 = vmatmul.mubr.bf16.gmra.mxu1 %v10916_v56  ;;  %v10942_v10 = vld [vmem:[%s13184_s7 + $0x88] sm:$0xff]  }
 0x3a4   : > { %v4704_v33 = vld [vmem:[#allocation4 + $0x39] sm:$0xff]  ;;  %v4354_v28 = vpop.f32.mrf.mxu1  ;;  %10408 = vmatpush3.bf16.msra.mxu0 %v10924_v3  ;;  %10450 = vmatpush3.bf16.msra.mxu1 %v10936_v53  ;;  %v10938_v3 = vld [vmem:[%s13184_s7 + $0x90] sm:$0xff]  }
 0x3a5   : > { %v4849_v22 = vld [vmem:[#allocation4 + $0x3a] sm:$0xff]  ;;  %v9271_v61 = vpack.c.bf16 %v4704_v33, %v4703_v46  ;;  %4537 = vst [vmem:[#allocation4 + $0x50] sm:$0xff] %v4511_v47  ;;  %v4486_v16 = vadd.f32 %v12354_v5, %v4453_v62  ;;  %v4421_v63 = vadd.f32 %v4354_v28, %v12295_v27  ;;  %10409 = vmatprep.subr.bf16.mxu0 %v10928_v2 }
 0x3a6   : > { %v9331_v7 = vpack.c.bf16 %v4849_v22, %v4848_v9  ;;  %v10307_v50 = vpop.f32.mrf.mxu1  ;;  %v10915_v31 = vld [vmem:[#allocation5 + $0x70] sm:$0xff]   ;;  %10451 = vmatprep.subr.bf16.mxu1 %v10939_v60 }
 0x3a7   : > { %9386 = vst [vmem:[#allocation5 + $0x78] sm:$0xff] %v9271_v61   ;;  %v4512_v18 = vmax.f32 %v4486_v16, 0.0  ;;  %v4454_v15 = vmul.f32 %v12348_v29, %v4421_v63  ;;  %10353 = vmatprep.mubr.bf16.mxu0 %v10915_v31 }
 0x3a8   : > { %9397 = vst [vmem:[#allocation5 + $0xd8] sm:$0xff] %v9331_v7   ;;  %v4357_v27 = vpop.f32.mrf.mxu1  ;;  %10410 = vmatpush3.bf16.msra.mxu0 %v10928_v2  ;;  %v4705_v36 = vld [vmem:[#allocation4 + $0x41] sm:$0xff]  ;;  %10452 = vmatpush3.bf16.msra.mxu1 %v10939_v60  ;;  %v10947_v7 = vld [vmem:[%s13184_s7 + $0x80] sm:$0xff]  }
 0x3a9   : > { %4538 = vst [vmem:[#allocation4 + $0x58] sm:$0xff] %v4512_v18  ;;  %v9221_v0 = vpack.c.bf16 %v4512_v18, %v4511_v47  ;;  %v4487_v13 = vadd.f32 %v12354_v5, %v4454_v15  ;;  %v4422_v4 = vadd.f32 %v4357_v27, %v12298_v1  ;;  %10411 = vmatprep.subr.bf16.mxu0 %v10931_v32  ;;  %v4850_v45 = vld [vmem:[#allocation4 + $0x42] sm:$0xff] }
 0x3aa   : > { %v10308_v20 = vpop.f32.mrf.mxu1  ;;  %v10918_v14 = vld [vmem:[#allocation5 + $0x20] sm:$0xff]   ;;  %10453 = vmatprep.subr.bf16.mxu1 %v10941_v42 }
 0x3ab   : > { %9377 = vst [vmem:[#allocation5 + $0x28] sm:$0xff] %v9221_v0   ;;  %v4513_v12 = vmax.f32 %v4487_v13, 0.0  ;;  %v4455_v48 = vmul.f32 %v12348_v29, %v4422_v4  ;;  %10393 = vmatprep.mubr.bf16.mxu1 %v10918_v14 }
 0x3ac   : > { %v4706_v57 = vld [vmem:[#allocation4 + $0x49] sm:$0xff]  ;;  %v4362_v35 = vpop.f32.mrf.mxu1  ;;  %10412 = vmatpush3.bf16.msra.mxu0 %v10931_v32  ;;  %10454 = vmatpush3.bf16.msra.mxu1 %v10941_v42 }
 0x3ad   : > { %v4851_v23 = vld [vmem:[#allocation4 + $0x4a] sm:$0xff]  ;;  %4539 = vst [vmem:[#allocation4 + $0x60] sm:$0xff] %v4513_v12  ;;  %v4488_v1 = vadd.f32 %v12354_v5, %v4455_v48  ;;  %v4423_v37 = vadd.f32 %v4362_v35, %v12301_v17  ;;  %v9276_v49 = vpack.c.bf16 %v4706_v57, %v4705_v36  ;;  %10413 = vmatprep.subr.bf16.mxu0 %v10934_v38 }
 0x3ae   : > { %v9336_v53 = vpack.c.bf16 %v4851_v23, %v4850_v45  ;;  %v10311_v41 = vpop.f32.mrf.mxu1  ;;  %v10917_v39 = vld [vmem:[#allocation5 + $0x78] sm:$0xff]   ;;  %10455 = vmatprep.subr.bf16.mxu1 %v10945_v26  ;;  %v12440_v17 = vld [vmem:[%s13184_s7 + $0x178] sm:$0xff]  }
 0x3af   : > { %v4514_v8 = vmax.f32 %v4488_v1, 0.0  ;;  %v4456_v58 = vmul.f32 %v12348_v29, %v4423_v37  ;;  %9387 = vst [vmem:[#allocation5 + $0x80] sm:$0xff] %v9276_v49   ;;  %10354 = vmatmul.mubr.bf16.gmra.mxu0 %v10917_v39  ;;  %v12460_v42 = vld [vmem:[%s13184_s7 + $0x138] sm:$0xff]  }
 0x3b0   : > { %9398 = vst [vmem:[#allocation5 + $0xe0] sm:$0xff] %v9336_v53   ;;  %v4365_v59 = vpop.f32.mrf.mxu1  ;;  %10414 = vmatpush3.bf16.msra.mxu0 %v10934_v38  ;;  %v4707_v51 = vld [vmem:[#allocation4 + $0x51] sm:$0xff]  ;;  %10456 = vmatpush3.bf16.msra.mxu1 %v10945_v26 }
 0x3b1   : > { %4540 = vst [vmem:[#allocation4 + $0x68] sm:$0xff] %v4514_v8  ;;  %v4489_v11 = vadd.f32 %v12354_v5, %v4456_v58  ;;  %v4424_v2 = vadd.f32 %v4365_v59, %v12304_v21  ;;  %v9226_v52 = vpack.c.bf16 %v4514_v8, %v4513_v12  ;;  %10415 = vmatprep.subr.bf16.mxu0 %v10938_v3  ;;  %v4852_v19 = vld [vmem:[#allocation4 + $0x52] sm:$0xff] }
 0x3b2   : > { %v10312_v60 = vpop.f32.mrf.mxu1  ;;  %v10920_v46 = vld [vmem:[#allocation5 + $0x28] sm:$0xff]   ;;  %10513 = vmatprep.subr.bf16.mxu1 %v12440_v17 }
 0x3b3   : > { %v4515_v56 = vmax.f32 %v4489_v11, 0.0  ;;  %v4457_v9 = vmul.f32 %v12348_v29, %v4424_v2  ;;  %9378 = vst [vmem:[#allocation5 + $0x30] sm:$0xff] %v9226_v52   ;;  %10394 = vmatmul.mubr.bf16.gmra.mxu1 %v10920_v46 }
 0x3b4   : > { %v4708_v47 = vld [vmem:[#allocation4 + $0x59] sm:$0xff]  ;;  %v4370_v62 = vpop.f32.mrf.mxu1  ;;  %10416 = vmatpush3.bf16.msra.mxu0 %v10938_v3 }
 0x3b5   : > { %v4853_v21 = vld [vmem:[#allocation4 + $0x5a] sm:$0xff]  ;;  %v9281_v33 = vpack.c.bf16 %v4708_v47, %v4707_v51  ;;  %4541 = vst [vmem:[#allocation4 + $0x70] sm:$0xff] %v4515_v56  ;;  %v4490_v28 = vadd.f32 %v12354_v5, %v4457_v9  ;;  %v4425_v61 = vadd.f32 %v4370_v62, %v12307_v34  ;;  %10417 = vmatprep.subr.bf16.mxu0 %v10942_v10 }
 0x3b6   : > { %v9341_v22 = vpack.c.bf16 %v4853_v21, %v4852_v19  ;;  %v10315_v16 = vpop.f32.mrf.mxu1  ;;  %v10919_v63 = vld [vmem:[#allocation5 + $0x80] sm:$0xff]  }
 0x3b7   : > { %9388 = vst [vmem:[#allocation5 + $0x88] sm:$0xff] %v9281_v33   ;;  %v4516_v32 = vmax.f32 %v4490_v28, 0.0  ;;  %v4458_v50 = vmul.f32 %v12348_v29, %v4425_v61  ;;  %10357 = vmatprep.mubr.bf16.mxu0 %v10919_v63 }
 0x3b8   : > { %9399 = vst [vmem:[#allocation5 + $0xe8] sm:$0xff] %v9341_v22   ;;  %v4373_v31 = vpop.f32.mrf.mxu1  ;;  %10418 = vmatpush3.bf16.msra.mxu0 %v10942_v10  ;;  %v4709_v27 = vld [vmem:[#allocation4 + $0x61] sm:$0xff] }
 0x3b9   : > { %4542 = vst [vmem:[#allocation4 + $0x78] sm:$0xff] %v4516_v32  ;;  %v9231_v18 = vpack.c.bf16 %v4516_v32, %v4515_v56  ;;  %v4491_v15 = vadd.f32 %v12354_v5, %v4458_v50  ;;  %v4426_v34 = vadd.f32 %v4373_v31, %v12316_v30  ;;  %10419 = vmatprep.subr.bf16.mxu0 %v10947_v7  ;;  %v4854_v13 = vld [vmem:[#allocation4 + $0x62] sm:$0xff] }
 0x3ba   : > { %v10316_v38 = vpop.f32.mrf.mxu1  ;;  %v10923_v0 = vld [vmem:[#allocation5 + $0x30] sm:$0xff]  }
 0x3bb   : > { %9379 = vst [vmem:[#allocation5 + $0x38] sm:$0xff] %v9231_v18   ;;  %v4517_v4 = vmax.f32 %v4491_v15, 0.0  ;;  %v4459_v26 = vmul.f32 %v12348_v29, %v4426_v34  ;;  %10397 = vmatprep.mubr.bf16.mxu1 %v10923_v0 }
 0x3bc   : > { %v4710_v36 = vld [vmem:[#allocation4 + $0x69] sm:$0xff]  ;;  %v4378_v14 = vpop.f32.mrf.mxu1  ;;  %10420 = vmatpush3.bf16.msra.mxu0 %v10947_v7 }
 0x3bd   : > { %v4855_v20 = vld [vmem:[#allocation4 + $0x6a] sm:$0xff]  ;;  %4543 = vst [vmem:[#allocation4 + $0x80] sm:$0xff] %v4517_v4  ;;  %v4492_v30 = vadd.f32 %v12354_v5, %v4459_v26  ;;  %v4427_v45 = vadd.f32 %v4378_v14, %v12319_v25  ;;  %v9286_v12 = vpack.c.bf16 %v4710_v36, %v4709_v27  ;;  %10477 = vmatprep.subr.bf16.mxu0 %v12460_v42 }
 0x3be   : > { %v9346_v48 = vpack.c.bf16 %v4855_v20, %v4854_v13  ;;  %v10319_v57 = vpop.f32.mrf.mxu1  ;;  %v10922_v23 = vld [vmem:[#allocation5 + $0x88] sm:$0xff]  }
 0x3bf   : > { %v4518_v35 = vmax.f32 %v4492_v30, 0.0  ;;  %v4460_v1 = vmul.f32 %v12348_v29, %v4427_v45  ;;  %9389 = vst [vmem:[#allocation5 + $0x90] sm:$0xff] %v9286_v12   ;;  %10358 = vmatmul.mubr.bf16.gmra.mxu0 %v10922_v23  ;;  %v10943_v20 = vld [vmem:[#allocation5 + $0x8] sm:$0xff]  }
 0x3c0   : > { %9400 = vst [vmem:[#allocation5 + $0xf0] sm:$0xff] %v9346_v48   ;;  %v4381_v37 = vpop.f32.mrf.mxu1  ;;  %v4711_v53 = vld [vmem:[#allocation4 + $0x71] sm:$0xff] }
 0x3c1   : > { %4544 = vst [vmem:[#allocation4 + $0x88] sm:$0xff] %v4518_v35  ;;  %v4493_v49 = vadd.f32 %v12354_v5, %v4460_v1  ;;  %v4428_v3 = vadd.f32 %v4381_v37, %v12328_v43  ;;  %v9236_v25 = vpack.c.bf16 %v4518_v35, %v4517_v4  ;;  %v4856_v8 = vld [vmem:[#allocation4 + $0x72] sm:$0xff] }
 0x3c2   : > { %v10320_v41 = vpop.f32.mrf.mxu1  ;;  %v10929_v39 = vld [vmem:[#allocation5 + $0x38] sm:$0xff]  }
 0x3c3   : > { %v4519_v58 = vmax.f32 %v4493_v49, 0.0  ;;  %v4461_v59 = vmul.f32 %v12348_v29, %v4428_v3  ;;  %9380 = vst [vmem:[#allocation5 + $0x40] sm:$0xff] %v9236_v25   ;;  %10398 = vmatmul.mubr.bf16.gmra.mxu1 %v10929_v39 }
 0x3c4   : > { %v4712_v11 = vld [vmem:[#allocation4 + $0x79] sm:$0xff]  ;;  %v4386_v52 = vpop.f32.mrf.mxu1 }
 0x3c5   : > { %v4857_v2 = vld [vmem:[#allocation4 + $0x7a] sm:$0xff]  ;;  %v9291_v10 = vpack.c.bf16 %v4712_v11, %v4711_v53  ;;  %4545 = vst [vmem:[#allocation4 + $0x90] sm:$0xff] %v4519_v58  ;;  %v4494_v60 = vadd.f32 %v12354_v5, %v4461_v59  ;;  %v4429_v43 = vadd.f32 %v4386_v52, %v12331_v44 }
 0x3c6   : > { %v9351_v51 = vpack.c.bf16 %v4857_v2, %v4856_v8  ;;  %v10323_v46 = vpop.f32.mrf.mxu1  ;;  %v10926_v19 = vld [vmem:[#allocation5 + $0x90] sm:$0xff]   ;;  %v10958_v8 = vld [vmem:[%s13184_s7 + $0x170] sm:$0xff]  }
 0x3c7   : > { %9390 = vst [vmem:[#allocation5 + $0x98] sm:$0xff] %v9291_v10   ;;  %v4520_v56 = vmax.f32 %v4494_v60, 0.0  ;;  %v4462_v9 = vmul.f32 %v12348_v29, %v4429_v43  ;;  %10361 = vmatprep.mubr.bf16.mxu0 %v10926_v19  ;;  %v10948_v11 = vld [vmem:[#allocation5 + $0x10] sm:$0xff]   ;;  %v10949_v2 = vld [vmem:[#allocation5 + $0x18] sm:$0xff]  }
 0x3c8   : > { %9401 = vst [vmem:[#allocation5 + $0xf8] sm:$0xff] %v9351_v51   ;;  %v4389_v47 = vpop.f32.mrf.mxu1  ;;  %v4713_v22 = vld [vmem:[#allocation4 + $0x81] sm:$0xff] }
 0x3c9   : > { %4546 = vst [vmem:[#allocation4 + $0x98] sm:$0xff] %v4520_v56  ;;  %v9241_v21 = vpack.c.bf16 %v4520_v56, %v4519_v58  ;;  %v4495_v62 = vadd.f32 %v12354_v5, %v4462_v9  ;;  %v4430_v33 = vadd.f32 %v4389_v47, %v12334_v54  ;;  %v4858_v7 = vld [vmem:[#allocation4 + $0x82] sm:$0xff]  ;;  %v10946_v56 = vld [vmem:[#allocation5 + $0xc0] sm:$0xff]   ;;  %v10966_v47 = vld [vmem:[%s13184_s7 + $0x160] sm:$0xff]  }
 0x3ca   : > { %v10324_v28 = vpop.f32.mrf.mxu1  ;;  %v10935_v61 = vld [vmem:[#allocation5 + $0x40] sm:$0xff]  }
 0x3cb   : > { %9381 = vst [vmem:[#allocation5 + $0x48] sm:$0xff] %v9241_v21   ;;  %v4521_v44 = vmax.f32 %v4495_v62, 0.0  ;;  %v4463_v16 = vmul.f32 %v12348_v29, %v4430_v33  ;;  %10401 = vmatprep.mubr.bf16.mxu1 %v10935_v61  ;;  %v10953_v9 = vld [vmem:[#allocation5 + $0x20] sm:$0xff]   ;;  %v10956_v21 = vld [vmem:[#allocation5 + $0x28] sm:$0xff]   ;;  %v10954_v28 = vld [vmem:[%s13184_s7 + $0x130] sm:$0xff]  }
 0x3cc   : > { %v4714_v63 = vld [vmem:[#allocation4 + $0x89] sm:$0xff]  ;;  %v4394_v50 = vpop.f32.mrf.mxu1 }
 0x3cd   : > { %v4859_v32 = vld [vmem:[#allocation4 + $0x8a] sm:$0xff]  ;;  %4547 = vst [vmem:[#allocation4 + $0xa0] sm:$0xff] %v4521_v44  ;;  %v4496_v31 = vadd.f32 %v12354_v5, %v4463_v16  ;;  %v4431_v18 = vadd.f32 %v4394_v50, %v12337_v55  ;;  %v9296_v15 = vpack.c.bf16 %v4714_v63, %v4713_v22  ;;  %v10951_v16 = vld [vmem:[#allocation5 + $0xc8] sm:$0xff]   ;;  %v10952_v63 = vld [vmem:[#allocation5 + $0xd0] sm:$0xff]  }
 0x3ce   : > { %v9356_v34 = vpack.c.bf16 %v4859_v32, %v4858_v7  ;;  %v10327_v54 = vpop.f32.mrf.mxu1  ;;  %v10932_v27 = vld [vmem:[#allocation5 + $0x98] sm:$0xff]   ;;  %v10960_v32 = vld [vmem:[%s13184_s7 + $0x128] sm:$0xff]  }
 0x3cf   : > { %v4522_v38 = vmax.f32 %v4496_v31, 0.0  ;;  %v4464_v0 = vmul.f32 %v12348_v29, %v4431_v18  ;;  %9391 = vst [vmem:[#allocation5 + $0xa0] sm:$0xff] %v9296_v15   ;;  %10362 = vmatmul.mubr.bf16.gmra.mxu0 %v10932_v27  ;;  %v10961_v50 = vld [vmem:[#allocation5 + $0x30] sm:$0xff]   ;;  %v10963_v31 = vld [vmem:[#allocation5 + $0x38] sm:$0xff]   ;;  %v10964_v15 = vld [vmem:[%s13184_s7 + $0x120] sm:$0xff]  }
 0x3d0   : > { %9402 = vst [vmem:[#allocation5 + $0x100] sm:$0xff] %v9356_v34   ;;  %v4397_v13 = vpop.f32.mrf.mxu1  ;;  %v4715_v14 = vld [vmem:[#allocation4 + $0x91] sm:$0xff]  ;;  %v10974_v18 = vld [vmem:[%s13184_s7 + $0x150] sm:$0xff]  }
 0x3d1   : > { %4548 = vst [vmem:[#allocation4 + $0xa8] sm:$0xff] %v4522_v38  ;;  %v9246_v4 = vpack.c.bf16 %v4522_v38, %v4521_v44  ;;  %v4497_v26 = vadd.f32 %v12354_v5, %v4464_v0  ;;  %v4432_v36 = vadd.f32 %v4397_v13, %v12340_v40  ;;  %v4860_v45 = vld [vmem:[#allocation4 + $0x92] sm:$0xff]  ;;  %v10957_v34 = vld [vmem:[#allocation5 + $0xd8] sm:$0xff]  }
 0x3d2   : > { %v10328_v55 = vpop.f32.mrf.mxu1  ;;  %v10940_v30 = vld [vmem:[#allocation5 + $0x48] sm:$0xff]   ;;  %v10970_v44 = vld [vmem:[%s13184_s7 + $0x158] sm:$0xff]  }
 0x3d3   : > { %9382 = vst [vmem:[#allocation5 + $0x50] sm:$0xff] %v9246_v4   ;;  %v4523_v12 = vmax.f32 %v4497_v26, 0.0  ;;  %v4465_v48 = vmul.f32 %v12348_v29, %v4432_v36  ;;  %10402 = vmatmul.mubr.bf16.gmra.mxu1 %v10940_v30  ;;  %v10959_v54 = vld [vmem:[#allocation5 + $0xe0] sm:$0xff]   ;;  %v10971_v0 = vld [vmem:[#allocation5 + $0x48] sm:$0xff]   ;;  %v10973_v4 = vld [vmem:[%s13184_s7 + $0x110] sm:$0xff]  }
 0x3d4   : > { %v4716_v57 = vld [vmem:[#allocation4 + $0x99] sm:$0xff]  ;;  %v4402_v35 = vpop.f32.mrf.mxu1  ;;  %10457 = vmatprep.mubr.bf16.mxu1 %v10943_v20  ;;  %v10968_v27 = vld [vmem:[%s13184_s7 + $0x118] sm:$0xff]  }
 0x3d5   : > { %v4861_v23 = vld [vmem:[#allocation4 + $0x9a] sm:$0xff]  ;;  %v9301_v1 = vpack.c.bf16 %v4716_v57, %v4715_v14  ;;  %4549 = vst [vmem:[#allocation4 + $0xb0] sm:$0xff] %v4523_v12  ;;  %v4498_v49 = vadd.f32 %v12354_v5, %v4465_v48  ;;  %v4433_v40 = vadd.f32 %v4402_v35, %v12343_v6  ;;  %v10969_v38 = vld [vmem:[#allocation5 + $0x40] sm:$0xff]   ;;  %v10985_v35 = vld [vmem:[#allocation5 + $0xd8] sm:$0xff]  }
 0x3d6   : > { %v9361_v37 = vpack.c.bf16 %v4861_v23, %v4860_v45  ;;  %v10331_v3 = vpop.f32.mrf.mxu1  ;;  %v10937_v25 = vld [vmem:[#allocation5 + $0xa0] sm:$0xff]   ;;  %v10981_v13 = vld [vmem:[%s13184_s7 + $0x140] sm:$0xff]   ;;  %v10967_v20 = vld [vmem:[#allocation5 + $0xf0] sm:$0xff]  }
 0x3d7   : > { %9392 = vst [vmem:[#allocation5 + $0xa8] sm:$0xff] %v9301_v1   ;;  %v4524_v53 = vmax.f32 %v4498_v49, 0.0  ;;  %v4466_v41 = vmul.f32 %v12348_v29, %v4433_v40  ;;  %10365 = vmatprep.mubr.bf16.mxu0 %v10937_v25  ;;  %v10991_v26 = vld [vmem:[%s13184_s7 + $0x1f8] sm:$0xff]   ;;  %v10965_v36 = vld [vmem:[#allocation5 + $0xe8] sm:$0xff]   ;;  %v10978_v14 = vld [vmem:[%s13184_s7 + $0x108] sm:$0xff]  }
 0x3d8   : > { %9403 = vst [vmem:[#allocation5 + $0x108] sm:$0xff] %v9361_v37   ;;  %v4405_v39 = vpop.f32.mrf.mxu1  ;;  %v4717_v52 = vld [vmem:[#allocation4 + $0xa1] sm:$0xff]  ;;  %v10979_v30 = vld [vmem:[#allocation5 + $0xc8] sm:$0xff]   ;;  %v10975_v48 = vld [vmem:[#allocation5 + $0x100] sm:$0xff]  }
 0x3d9   : > { %4550 = vst [vmem:[#allocation4 + $0xb8] sm:$0xff] %v4524_v53  ;;  %v9251_v58 = vpack.c.bf16 %v4524_v53, %v4523_v12  ;;  %v4499_v59 = vadd.f32 %v12354_v5, %v4466_v41  ;;  %v4862_v10 = vld [vmem:[#allocation4 + $0xa2] sm:$0xff]  ;;  %v10983_v45 = vld [vmem:[%s13184_s7 + $0x100] sm:$0xff]   ;;  %v10986_v23 = vld [vmem:[%s13184_s7 + $0x1b8] sm:$0xff]  }
 0x3da   : > { %v10332_v6 = vpop.f32.mrf.mxu1  ;;  %v10962_v5 = vld [vmem:[%s13184_s7 + $0x168] sm:$0xff]   ;;  %v10972_v12 = vld [vmem:[#allocation5 + $0xf8] sm:$0xff]   ;;  %v10982_v49 = vld [vmem:[#allocation5 + $0x68] sm:$0xff]  }
 0x3db   : > { %9383 = vst [vmem:[#allocation5 + $0x58] sm:$0xff] %v9251_v58   ;;  %v4525_v51 = vmax.f32 %v4499_v59, 0.0  ;;  %10458 = vmatmul.mubr.bf16.vlgmr.msra.gmra.mxu1 %v10948_v11  ;;  %v10976_v55 = vld [vmem:[#allocation5 + $0x50] sm:$0xff]   ;;  %v10994_v1 = vld [vmem:[%s13184_s7 + $0x1f0] sm:$0xff]   ;;  %v10989_v3 = vld [vmem:[#allocation5 + $0xe0] sm:$0xff]  }
 0x3dc   : > { %v4718_v60 = vld [vmem:[#allocation4 + $0xa9] sm:$0xff]  ;;  %10461 = vmatprep.mubr.bf16.mxu1 %v10949_v2  ;;  %10514 = vmatpush3.bf16.msra.mxu1 %v12440_v17  ;;  %v10984_v57 = vld [vmem:[#allocation5 + $0xd0] sm:$0xff]   ;;  %v10992_v25 = vld [vmem:[#allocation5 + $0xe8] sm:$0xff]  }
 0x3dd   : > { %v4863_v43 = vld [vmem:[#allocation4 + $0xaa] sm:$0xff]  ;;  %v9306_v29 = vpack.c.bf16 %v4718_v60, %v4717_v52  ;;  %4551 = vst [vmem:[#allocation4 + $0xc0] sm:$0xff] %v4525_v51  ;;  %10515 = vmatprep.subr.bf16.mxu1 %v10958_v8  ;;  %v10998_v40 = vld [vmem:[%s13184_s7 + $0x1e8] sm:$0xff]   ;;  %v11002_v53 = vld [vmem:[%s13184_s7 + $0x1e0] sm:$0xff]  }
 0x3de   : > { %v9366_v46 = vpack.c.bf16 %v4863_v43, %v4862_v10  ;;  %v10944_v19 = vld [vmem:[#allocation5 + $0xa8] sm:$0xff]   ;;  %v10987_v41 = vld [vmem:[#allocation5 + $0x70] sm:$0xff]   ;;  %v10990_v39 = vld [vmem:[%s13184_s7 + $0x1b0] sm:$0xff]  }
 0x3df   : > { %9393 = vst [vmem:[#allocation5 + $0xb0] sm:$0xff] %v9306_v29   ;;  %10366 = vmatmul.mubr.bf16.gmra.mxu0 %v10944_v19  ;;  %v10980_v37 = vld [vmem:[#allocation5 + $0x108] sm:$0xff]   ;;  %v11006_v58 = vld [vmem:[%s13184_s7 + $0x1d8] sm:$0xff]   ;;  %v10996_v59 = vld [vmem:[%s13184_s7 + $0x1a8] sm:$0xff]  }
 0x3e0   : > { %9404 = vst [vmem:[#allocation5 + $0x110] sm:$0xff] %v9366_v46   ;;  %10421 = vmatprep.mubr.bf16.mxu0 %v10946_v56  ;;  %10516 = vmatpush3.bf16.msra.mxu1 %v10958_v8  ;;  %v4719_v62 = vld [vmem:[#allocation4 + $0xb1] sm:$0xff]  ;;  %v10988_v8 = vld [vmem:[#allocation5 + $0x78] sm:$0xff]   ;;  %v10997_v11 = vld [vmem:[#allocation5 + $0xf0] sm:$0xff]  }
 0x3e1   : > { %10517 = vmatprep.subr.bf16.mxu1 %v10962_v5  ;;  %v4864_v17 = vld [vmem:[#allocation4 + $0xb2] sm:$0xff]  ;;  %v10999_v6 = vld [vmem:[#allocation5 + $0xf8] sm:$0xff]   ;;  %v11013_v60 = vld [vmem:[%s13184_s7 + $0x1c8] sm:$0xff]  }
 0x3e2   : > { %v11010_v2 = vld [vmem:[%s13184_s7 + $0x1d0] sm:$0xff]   ;;  %v10993_v52 = vld [vmem:[#allocation5 + $0x80] sm:$0xff]   ;;  %v11000_v10 = vld [vmem:[%s13184_s7 + $0x1a0] sm:$0xff]  }
 0x3e3   : > { %10462 = vmatmul.mubr.bf16.gmra.mxu1 %v10953_v9  ;;  %v10995_v51 = vld [vmem:[#allocation5 + $0x88] sm:$0xff]   ;;  %v11004_v43 = vld [vmem:[%s13184_s7 + $0x198] sm:$0xff]   ;;  %v11001_v19 = vld [vmem:[#allocation5 + $0x90] sm:$0xff]  }
 0x3e4   : > { %v4720_v33 = vld [vmem:[#allocation4 + $0xb9] sm:$0xff]  ;;  %10465 = vmatprep.mubr.bf16.mxu1 %v10956_v21  ;;  %10518 = vmatpush3.bf16.msra.mxu1 %v10962_v5  ;;  %v11005_v29 = vld [vmem:[#allocation5 + $0x100] sm:$0xff]   ;;  %v11009_v56 = vld [vmem:[%s13184_s7 + $0x190] sm:$0xff]  }
 0x3e5   : > { %v4865_v22 = vld [vmem:[#allocation4 + $0xba] sm:$0xff]  ;;  %v9311_v61 = vpack.c.bf16 %v4720_v33, %v4719_v62  ;;  %10519 = vmatprep.subr.bf16.mxu1 %v10966_v47  ;;  %v11003_v9 = vld [vmem:[#allocation5 + $0x98] sm:$0xff]  }
 0x3e6   : > { %v9371_v7 = vpack.c.bf16 %v4865_v22, %v4864_v17  ;;  %v11007_v46 = vld [vmem:[#allocation5 + $0x108] sm:$0xff]   ;;  %v11014_v21 = vld [vmem:[%s13184_s7 + $0x188] sm:$0xff]   ;;  %v11008_v17 = vld [vmem:[#allocation5 + $0xa0] sm:$0xff]  }
 0x3e7   : > { %9394 = vst [vmem:[#allocation5 + $0xb8] sm:$0xff] %v9311_v61   ;;  %10422 = vmatmul.mubr.bf16.vlgmr.msra.gmra.mxu0 %v10951_v16  ;;  %v11017_v5 = vld [vmem:[%s13184_s7 + $0x1c0] sm:$0xff]   ;;  %v11015_v62 = vld [vmem:[#allocation5 + $0x70] sm:$0xff]   ;;  %v11022_v61 = vld [vmem:[%s13184_s7 + $0x238] sm:$0xff]  }
 0x3e8   : > { %9405 = vst [vmem:[#allocation5 + $0x118] sm:$0xff] %v9371_v7   ;;  %10478 = vmatpush3.bf16.msra.mxu0 %v12460_v42  ;;  %10425 = vmatprep.mubr.bf16.mxu0 %v10952_v63  ;;  %v10977_v42 = vld [vmem:[%s13184_s7 + $0x148] sm:$0xff]   ;;  %v11019_v33 = vld [vmem:[%s13184_s7 + $0x180] sm:$0xff]   ;;  %v11021_v7 = vld [vmem:[#allocation5 + $0x80] sm:$0xff]  }
 0x3e9   : > { %10479 = vmatprep.subr.bf16.mxu0 %v10954_v28  ;;  %10520 = vmatpush3.bf16.msra.mxu1 %v10966_v47  ;;  %v11012_v47 = vld [vmem:[#allocation5 + $0x110] sm:$0xff]   ;;  %v11011_v22 = vld [vmem:[#allocation5 + $0xa8] sm:$0xff]  }
 0x3ea   : > { %10521 = vmatprep.subr.bf16.mxu1 %v10970_v44  ;;  %v11018_v16 = vld [vmem:[#allocation5 + $0x10] sm:$0xff]   ;;  %v11025_v63 = vld [vmem:[#allocation5 + $0x88] sm:$0xff]  }
 0x3eb   : > { %10466 = vmatmul.mubr.bf16.gmra.mxu1 %v10961_v50  ;;  %v11023_v50 = vld [vmem:[#allocation5 + $0x18] sm:$0xff]  }
 0x3ec   : > { %10480 = vmatpush3.bf16.msra.mxu0 %v10954_v28  ;;  %10469 = vmatprep.mubr.bf16.mxu1 %v10963_v31  ;;  %v11020_v28 = vld [vmem:[#allocation5 + $0x78] sm:$0xff]  }
 0x3ed   : > { %10481 = vmatprep.subr.bf16.mxu0 %v10960_v32  ;;  %10522 = vmatpush3.bf16.msra.mxu1 %v10970_v44  ;;  %v11016_v44 = vld [vmem:[#allocation5 + $0xb0] sm:$0xff]   ;;  %v11026_v31 = vld [vmem:[%s13184_s7 + $0x230] sm:$0xff]  }
 0x3ee   : > { %10523 = vmatprep.subr.bf16.mxu1 %v10974_v18 }
 0x3ef   : > { %10426 = vmatmul.mubr.bf16.gmra.mxu0 %v10957_v34  ;;  %v11032_v34 = vld [vmem:[#allocation5 + $0xa0] sm:$0xff]  }
 0x3f0   : > { %10429 = vmatprep.mubr.bf16.mxu0 %v10959_v54  ;;  %10482 = vmatpush3.bf16.msra.mxu0 %v10960_v32  ;;  %v11027_v32 = vld [vmem:[#allocation5 + $0x90] sm:$0xff]   ;;  %v11028_v54 = vld [vmem:[#allocation5 + $0x28] sm:$0xff]  }
 0x3f1   : > { %10483 = vmatprep.subr.bf16.mxu0 %v10964_v15  ;;  %10524 = vmatpush3.bf16.msra.mxu1 %v10974_v18  ;;  %v11024_v18 = vld [vmem:[#allocation5 + $0x20] sm:$0xff]  }
 0x3f2   : > { %10525 = vmatprep.subr.bf16.mxu1 %v10977_v42 }
 0x3f3   : > { %10470 = vmatmul.mubr.bf16.gmra.mxu1 %v10969_v38  ;;  %v11029_v38 = vld [vmem:[#allocation5 + $0x30] sm:$0xff]  }
 0x3f4   : > { %10484 = vmatpush3.bf16.msra.mxu0 %v10964_v15  ;;  %10473 = vmatprep.mubr.bf16.mxu1 %v10971_v0  ;;  %v11030_v15 = vld [vmem:[%s13184_s7 + $0x228] sm:$0xff]   ;;  %v11036_v0 = vld [vmem:[%s13184_s7 + $0x218] sm:$0xff]  }
 0x3f5   : > { %10485 = vmatprep.subr.bf16.mxu0 %v10968_v27  ;;  %10526 = vmatpush3.bf16.msra.mxu1 %v10977_v42  ;;  %v11031_v42 = vld [vmem:[#allocation5 + $0x98] sm:$0xff]  }
 0x3f6   : > { %10527 = vmatprep.subr.bf16.mxu1 %v10981_v13 }
 0x3f7   : > { %10430 = vmatmul.mubr.bf16.gmra.mxu0 %v10965_v36  ;;  %v11040_v36 = vld [vmem:[%s13184_s7 + $0x210] sm:$0xff]  }
 0x3f8   : > { %10433 = vmatprep.mubr.bf16.mxu0 %v10967_v20  ;;  %10486 = vmatpush3.bf16.msra.mxu0 %v10968_v27  ;;  %v11033_v27 = vld [vmem:[%s13184_s7 + $0x220] sm:$0xff]   ;;  %v11035_v20 = vld [vmem:[#allocation5 + $0x40] sm:$0xff]  }
 0x3f9   : > { %10487 = vmatprep.subr.bf16.mxu0 %v10973_v4  ;;  %10528 = vmatpush3.bf16.msra.mxu1 %v10981_v13  ;;  %v11037_v13 = vld [vmem:[#allocation5 + $0xa8] sm:$0xff]  }
 0x3fa   : > { %10585 = vmatprep.subr.bf16.mxu1 %v10991_v26 }
 0x3fb   : > { %10474 = vmatmul.mubr.bf16.gmra.mxu1 %v10976_v55  ;;  %v11043_v55 = vld [vmem:[%s13184_s7 + $0x208] sm:$0xff]  }
 0x3fc   : > { %10488 = vmatpush3.bf16.msra.mxu0 %v10973_v4  ;;  %10529 = vmatprep.mubr.bf16.mxu1 %v10979_v30  ;;  %v11038_v4 = vld [vmem:[#allocation5 + $0xb0] sm:$0xff]   ;;  %v11039_v30 = vld [vmem:[#allocation5 + $0x48] sm:$0xff]  }
 0x3fd   : > { %10489 = vmatprep.subr.bf16.mxu0 %v10978_v14 }
 0x3ff   : > { %10434 = vmatmul.mubr.bf16.gmra.mxu0 %v10972_v12  ;;  %v11041_v12 = vld [vmem:[#allocation5 + $0x50] sm:$0xff]  }
 0x400   : > { %10437 = vmatprep.mubr.bf16.mxu0 %v10975_v48  ;;  %10490 = vmatpush3.bf16.msra.mxu0 %v10978_v14  ;;  %v11042_v14 = vld [vmem:[#allocation5 + $0xb8] sm:$0xff]  }
 0x401   : > { %10491 = vmatprep.subr.bf16.mxu0 %v10983_v45  ;;  %v11044_v48 = vld [vmem:[#allocation5 + $0x58] sm:$0xff]  }
 0x403   : > { %10530 = vmatmul.mubr.bf16.vlgmr.msra.gmra.mxu1 %v10984_v57  ;;  %v11045_v57 = vld [vmem:[#allocation5 + $0xd0] sm:$0xff]  }
 0x404   : > { %10492 = vmatpush3.bf16.msra.mxu0 %v10983_v45  ;;  %10533 = vmatprep.mubr.bf16.mxu1 %v10985_v35  ;;  %v11046_v45 = vld [vmem:[%s13184_s7 + $0x200] sm:$0xff]  }
 0x405   : > { %10549 = vmatprep.subr.bf16.mxu0 %v10986_v23  ;;  %10586 = vmatpush3.bf16.msra.mxu1 %v10991_v26  ;;  %v11034_v26 = vld [vmem:[#allocation5 + $0x38] sm:$0xff]  }
 0x406   : > { %10587 = vmatprep.subr.bf16.mxu1 %v10994_v1 }
 0x407   : > { %10438 = vmatmul.mubr.bf16.gmra.mxu0 %v10980_v37  ;;  %v11048_v37 = vld [vmem:[#allocation5 + $0xe0] sm:$0xff]  }
 0x408   : > { %10493 = vmatprep.mubr.bf16.mxu0 %v10982_v49 }
 0x409   : > { %10588 = vmatpush3.bf16.msra.mxu1 %v10994_v1  ;;  %v11047_v1 = vld [vmem:[#allocation5 + $0xd8] sm:$0xff]  }
 0x40a   : > { %10589 = vmatprep.subr.bf16.mxu1 %v10998_v40 }
 0x40b   : > { %10534 = vmatmul.mubr.bf16.gmra.mxu1 %v10989_v3 }
 0x40c   : > { %10537 = vmatprep.mubr.bf16.mxu1 %v10992_v25 }
 0x40d   : > { %10590 = vmatpush3.bf16.msra.mxu1 %v10998_v40 }
 0x40e   : > { %10591 = vmatprep.subr.bf16.mxu1 %v11002_v53 }
 0x40f   : > { %10494 = vmatmul.mubr.bf16.vlgmr.msra.gmra.mxu0 %v10987_v41 }
 0x410   : > { %10550 = vmatpush3.bf16.msra.mxu0 %v10986_v23  ;;  %10497 = vmatprep.mubr.bf16.mxu0 %v10988_v8 }
 0x411   : > { %10551 = vmatprep.subr.bf16.mxu0 %v10990_v39  ;;  %10592 = vmatpush3.bf16.msra.mxu1 %v11002_v53 }
 0x412   : > { %10593 = vmatprep.subr.bf16.mxu1 %v11006_v58 }
 0x413   : > { %10538 = vmatmul.mubr.bf16.gmra.mxu1 %v10997_v11 }
 0x414   : > { %10552 = vmatpush3.bf16.msra.mxu0 %v10990_v39  ;;  %10541 = vmatprep.mubr.bf16.mxu1 %v10999_v6  ;;  %v11050_v6 = vld [vmem:[#allocation5 + $0xf0] sm:$0xff]  }
 0x415   : > { %10553 = vmatprep.subr.bf16.mxu0 %v10996_v59  ;;  %10594 = vmatpush3.bf16.msra.mxu1 %v11006_v58 }
 0x416   : > { %10595 = vmatprep.subr.bf16.mxu1 %v11010_v2 }
 0x417   : > { %10498 = vmatmul.mubr.bf16.gmra.mxu0 %v10993_v52 }
 0x418   : > { %10501 = vmatprep.mubr.bf16.mxu0 %v10995_v51  ;;  %10554 = vmatpush3.bf16.msra.mxu0 %v10996_v59  ;;  %v11049_v59 = vld [vmem:[#allocation5 + $0xe8] sm:$0xff]   ;;  %v11052_v51 = vld [vmem:[#allocation5 + $0x100] sm:$0xff]  }
 0x419   : > { %10555 = vmatprep.subr.bf16.mxu0 %v11000_v10  ;;  %10596 = vmatpush3.bf16.msra.mxu1 %v11010_v2 }
 0x41a   : > { %10597 = vmatprep.subr.bf16.mxu1 %v11013_v60 }
 0x41b   : > { %10542 = vmatmul.mubr.bf16.gmra.mxu1 %v11005_v29 }
 0x41c   : > { %10556 = vmatpush3.bf16.msra.mxu0 %v11000_v10  ;;  %10545 = vmatprep.mubr.bf16.mxu1 %v11007_v46  ;;  %v11051_v10 = vld [vmem:[#allocation5 + $0xf8] sm:$0xff]  }
 0x41d   : > { %10557 = vmatprep.subr.bf16.mxu0 %v11004_v43  ;;  %10598 = vmatpush3.bf16.msra.mxu1 %v11013_v60 }
 0x41e   : > { %10599 = vmatprep.subr.bf16.mxu1 %v11017_v5 }
 0x41f   : > { %10502 = vmatmul.mubr.bf16.gmra.mxu0 %v11001_v19 }
 0x420   : > { %10505 = vmatprep.mubr.bf16.mxu0 %v11003_v9  ;;  %10558 = vmatpush3.bf16.msra.mxu0 %v11004_v43 }
 0x421   : > { %10559 = vmatprep.subr.bf16.mxu0 %v11009_v56  ;;  %10600 = vmatpush3.bf16.msra.mxu1 %v11017_v5 }
 0x422   : > { %10657 = vmatprep.subr.bf16.mxu1 %v13196_v24 }
 0x423   : > { %10546 = vmatmul.mubr.bf16.gmra.mxu1 %v11012_v47 }
 0x424   : > { %10560 = vmatpush3.bf16.msra.mxu0 %v11009_v56  ;;  %10601 = vmatprep.mubr.bf16.mxu1 %v11015_v62 }
 0x425   : > { %10561 = vmatprep.subr.bf16.mxu0 %v11014_v21 }
 0x427   : > { %10506 = vmatmul.mubr.bf16.gmra.mxu0 %v11008_v17  ;;  %v11054_v17 = vld [vmem:[#allocation5 + $0x110] sm:$0xff]  }
 0x428   : > { %10509 = vmatprep.mubr.bf16.mxu0 %v11011_v22  ;;  %10562 = vmatpush3.bf16.msra.mxu0 %v11014_v21  ;;  %v11053_v21 = vld [vmem:[#allocation5 + $0x108] sm:$0xff]  }
 0x429   : > { %10563 = vmatprep.subr.bf16.mxu0 %v11019_v33 }
 0x42b   : > { %10602 = vmatmul.mubr.bf16.vlgmr.msra.gmra.mxu1 %v11020_v28  ;;  %v11055_v28 = vld [vmem:[#allocation5 + $0x118] sm:$0xff]  }
 0x42c   : > { %10564 = vmatpush3.bf16.msra.mxu0 %v11019_v33  ;;  %10605 = vmatprep.mubr.bf16.mxu1 %v11021_v7 }
 0x42d   : > { %10621 = vmatprep.subr.bf16.mxu0 %v11022_v61 }
 0x42f   : > { %10510 = vmatmul.mubr.bf16.gmra.mxu0 %v11016_v44 }
 0x430   : > { %10565 = vmatprep.mubr.bf16.mxu0 %v11018_v16 }
 0x433   : > { %10606 = vmatmul.mubr.bf16.gmra.mxu1 %v11025_v63 }
 0x434   : > { %10609 = vmatprep.mubr.bf16.mxu1 %v11027_v32 }
 0x437   : > { %10566 = vmatmul.mubr.bf16.vlgmr.msra.gmra.mxu0 %v11023_v50 }
 0x438   : > { %10622 = vmatpush3.bf16.msra.mxu0 %v11022_v61  ;;  %10569 = vmatprep.mubr.bf16.mxu0 %v11024_v18 }
 0x439   : > { %10623 = vmatprep.subr.bf16.mxu0 %v11026_v31 }
 0x43b   : > { %10610 = vmatmul.mubr.bf16.gmra.mxu1 %v11031_v42 }
 0x43c   : > { %10624 = vmatpush3.bf16.msra.mxu0 %v11026_v31  ;;  %10613 = vmatprep.mubr.bf16.mxu1 %v11032_v34 }
 0x43d   : > { %10625 = vmatprep.subr.bf16.mxu0 %v11030_v15 }
 0x43f   : > { %10570 = vmatmul.mubr.bf16.gmra.mxu0 %v11028_v54 }
 0x440   : > { %10573 = vmatprep.mubr.bf16.mxu0 %v11029_v38  ;;  %10626 = vmatpush3.bf16.msra.mxu0 %v11030_v15 }
 0x441   : > { %10627 = vmatprep.subr.bf16.mxu0 %v11033_v27 }
 0x443   : > { %10614 = vmatmul.mubr.bf16.gmra.mxu1 %v11037_v13 }
 0x444   : > { %10628 = vmatpush3.bf16.msra.mxu0 %v11033_v27  ;;  %10617 = vmatprep.mubr.bf16.mxu1 %v11038_v4 }
 0x445   : > { %10629 = vmatprep.subr.bf16.mxu0 %v11036_v0 }
 0x447   : > { %10574 = vmatmul.mubr.bf16.gmra.mxu0 %v11034_v26 }
 0x448   : > { %10577 = vmatprep.mubr.bf16.mxu0 %v11035_v20  ;;  %10630 = vmatpush3.bf16.msra.mxu0 %v11036_v0 }
 0x449   : > { %10631 = vmatprep.subr.bf16.mxu0 %v11040_v36 }
 0x44b   : > { %10618 = vmatmul.mubr.bf16.gmra.mxu1 %v11042_v14 }
 0x44c   : > { %10632 = vmatpush3.bf16.msra.mxu0 %v11040_v36  ;;  %10673 = vmatprep.mubr.msk.bf16.mxu1 %vm11131_vm2, %v13196_v24 }
 0x44d   : > { %10633 = vmatprep.subr.bf16.mxu0 %v11043_v55 }
 0x44f   : > { %10578 = vmatmul.mubr.bf16.gmra.mxu0 %v11039_v30 }
 0x450   : > { %10581 = vmatprep.mubr.bf16.mxu0 %v11041_v12  ;;  %10634 = vmatpush3.bf16.msra.mxu0 %v11043_v55 }
 0x451   : > { %10635 = vmatprep.subr.bf16.mxu0 %v11046_v45 }
 0x453   : > { %v10387_v23 = vpop.f32.mrf.mxu1 }
 0x454   : > { %10636 = vmatpush3.bf16.msra.mxu0 %v11046_v45 }
 0x455   : > { %v5423_v35 = vpop.f32.mrf.mxu1 }
 0x457   : > { %10582 = vmatmul.mubr.bf16.gmra.mxu0 %v11044_v48  ;;  %v10388_v3 = vpop.f32.mrf.mxu1 }
 0x458   : > { %10637 = vmatprep.mubr.bf16.mxu0 %v11045_v57 }
 0x459   : > { %v5426_v8 = vpop.f32.mrf.mxu1 }
 0x45f   : > { %v10351_v49 = vpop.f32.mrf.mxu0  ;;  %10638 = vmatmul.mubr.bf16.vlgmr.msra.gmra.mxu0 %v11047_v1 }
 0x460   : > { %v12605_v40 = vadd.f32 %v10387_v23, %v10351_v49  ;;  %10641 = vmatprep.mubr.bf16.mxu0 %v11048_v37 }
 0x461   : > { %v5202_v25 = vpop.f32.mrf.mxu0 }
 0x462   : > { %v12607_v53 = vadd.f32 %v5423_v35, %v5202_v25 }
 0x463   : > { %v10352_v41 = vpop.f32.mrf.mxu0  ;;  %v10391_v2 = vpop.f32.mrf.mxu1 }
 0x464   : > { %v12609_v39 = vadd.f32 %v10388_v3, %v10352_v41 }
 0x465   : > { %v5205_v58 = vpop.f32.mrf.mxu0  ;;  %v5439_v52 = vpop.f32.mrf.mxu1 }
 0x466   : > { %v12611_v11 = vadd.f32 %v5426_v8, %v5205_v58 }
 0x467   : > { %10642 = vmatmul.mubr.bf16.gmra.mxu0 %v11049_v59  ;;  %v10392_v29 = vpop.f32.mrf.mxu1 }
 0x468   : > { %10645 = vmatprep.mubr.bf16.mxu0 %v11050_v6 }
 0x469   : > { %v5442_v9 = vpop.f32.mrf.mxu1 }
 0x46f   : > { %v10355_v60 = vpop.f32.mrf.mxu0  ;;  %10646 = vmatmul.mubr.bf16.gmra.mxu0 %v11051_v10 }
 0x470   : > { %v12613_v43 = vadd.f32 %v10391_v2, %v10355_v60  ;;  %10649 = vmatprep.mubr.bf16.mxu0 %v11052_v51 }
 0x471   : > { %v5218_v46 = vpop.f32.mrf.mxu0 }
 0x472   : > { %v12615_v5 = vadd.f32 %v5439_v52, %v5218_v46 }
 0x473   : > { %v10356_v19 = vpop.f32.mrf.mxu0  ;;  %v10395_v33 = vpop.f32.mrf.mxu1 }
 0x474   : > { %v12617_v56 = vadd.f32 %v10392_v29, %v10356_v19 }
 0x475   : > { %v5221_v47 = vpop.f32.mrf.mxu0  ;;  %v5455_v22 = vpop.f32.mrf.mxu1 }
 0x476   : > { %v12619_v62 = vadd.f32 %v5442_v9, %v5221_v47 }
 0x477   : > { %10650 = vmatmul.mubr.bf16.gmra.mxu0 %v11053_v21  ;;  %v10396_v7 = vpop.f32.mrf.mxu1 }
 0x478   : > { %10653 = vmatprep.mubr.bf16.mxu0 %v11054_v17 }
 0x479   : > { %v5458_v32 = vpop.f32.mrf.mxu1 }
 0x47f   : > { %v10359_v61 = vpop.f32.mrf.mxu0  ;;  %10654 = vmatmul.mubr.bf16.gmra.mxu0 %v11055_v28 }
 0x480   : > { %v12621_v44 = vadd.f32 %v10395_v33, %v10359_v61 }
 0x481   : > { %v5234_v16 = vpop.f32.mrf.mxu0 }
 0x482   : > { %v12623_v63 = vadd.f32 %v5455_v22, %v5234_v16 }
 0x483   : > { %v10360_v50 = vpop.f32.mrf.mxu0  ;;  %v10399_v15 = vpop.f32.mrf.mxu1 }
 0x484   : > { %v12625_v31 = vadd.f32 %v10396_v7, %v10360_v50 }
 0x485   : > { %v5237_v18 = vpop.f32.mrf.mxu0  ;;  %v5471_v34 = vpop.f32.mrf.mxu1 }
 0x486   : > { %v12627_v42 = vadd.f32 %v5458_v32, %v5237_v18 }
 0x487   : > { %v10400_v54 = vpop.f32.mrf.mxu1 }
 0x489   : > { %v5474_v13 = vpop.f32.mrf.mxu1 }
 0x48f   : > { %v10363_v27 = vpop.f32.mrf.mxu0 }
 0x490   : > { %v12629_v38 = vadd.f32 %v10399_v15, %v10363_v27 }
 0x491   : > { %v5250_v0 = vpop.f32.mrf.mxu0 }
 0x492   : > { %v12631_v4 = vadd.f32 %v5471_v34, %v5250_v0 }
 0x493   : > { %v10364_v26 = vpop.f32.mrf.mxu0  ;;  %v10403_v36 = vpop.f32.mrf.mxu1 }
 0x494   : > { %v12633_v20 = vadd.f32 %v10400_v54, %v10364_v26 }
 0x495   : > { %v5253_v14 = vpop.f32.mrf.mxu0  ;;  %v5487_v55 = vpop.f32.mrf.mxu1 }
 0x496   : > { %v12635_v30 = vadd.f32 %v5474_v13, %v5253_v14 }
 0x497   : > { %v10404_v45 = vpop.f32.mrf.mxu1 }
 0x499   : > { %v5490_v12 = vpop.f32.mrf.mxu1 }
 0x49b   : > { %v10459_v48 = vpop.f32.mrf.mxu1 }
 0x49d   : > { %v5959_v57 = vpop.f32.mrf.mxu1 }
 0x49f   : > { %v10367_v23 = vpop.f32.mrf.mxu0  ;;  %v10460_v35 = vpop.f32.mrf.mxu1 }
 0x4a0   : > { %v12637_v1 = vadd.f32 %v10403_v36, %v10367_v23 }
 0x4a1   : > { %v5266_v37 = vpop.f32.mrf.mxu0  ;;  %v5962_v49 = vpop.f32.mrf.mxu1 }
 0x4a2   : > { %v12639_v3 = vadd.f32 %v5487_v55, %v5266_v37 }
 0x4a3   : > { %v10368_v25 = vpop.f32.mrf.mxu0  ;;  %v10463_v41 = vpop.f32.mrf.mxu1 }
 0x4a4   : > { %v12641_v8 = vadd.f32 %v10404_v45, %v10368_v25 }
 0x4a5   : > { %v5269_v58 = vpop.f32.mrf.mxu0  ;;  %v5975_v59 = vpop.f32.mrf.mxu1 }
 0x4a6   : > { %v12643_v6 = vadd.f32 %v5490_v12, %v5269_v58 }
 0x4a7   : > { %v10423_v2 = vpop.f32.mrf.mxu0  ;;  %v10464_v52 = vpop.f32.mrf.mxu1 }
 0x4a8   : > { %v5762_v10 = vadd.f32 %v10423_v2, %v12605_v40 }
 0x4a9   : > { %v5681_v51 = vpop.f32.mrf.mxu0  ;;  %v5978_v60 = vpop.f32.mrf.mxu1 }
 0x4aa   : > { %v5760_v29 = vadd.f32 %v5681_v51, %v12607_v53  ;;  %v12647_v46 = vadd.f32 %v10459_v48, %v5762_v10 }
 0x4ab   : > { %v10424_v19 = vpop.f32.mrf.mxu0  ;;  %v10467_v9 = vpop.f32.mrf.mxu1 }
 0x4ac   : > { %v5763_v47 = vadd.f32 %v10424_v19, %v12609_v39  ;;  %v12650_v21 = vadd.f32 %v5959_v57, %v5760_v29 }
 0x4ad   : > { %v5684_v17 = vpop.f32.mrf.mxu0  ;;  %v5991_v33 = vpop.f32.mrf.mxu1 }
 0x4ae   : > { %v5761_v22 = vadd.f32 %v5684_v17, %v12611_v11  ;;  %v12653_v28 = vadd.f32 %v10460_v35, %v5763_v47 }
 0x4af   : > { %v10427_v61 = vpop.f32.mrf.mxu0  ;;  %v10468_v40 = vpop.f32.mrf.mxu1 }
 0x4b0   : > { %v5766_v7 = vadd.f32 %v10427_v61, %v12613_v43  ;;  %v12656_v16 = vadd.f32 %v5962_v49, %v5761_v22 }
 0x4b1   : > { %v5697_v53 = vpop.f32.mrf.mxu0  ;;  %v5994_v32 = vpop.f32.mrf.mxu1 }
 0x4b2   : > { %v5764_v50 = vadd.f32 %v5697_v53, %v12615_v5  ;;  %v12659_v18 = vadd.f32 %v10463_v41, %v5766_v7 }
 0x4b3   : > { %v10428_v39 = vpop.f32.mrf.mxu0  ;;  %v10471_v15 = vpop.f32.mrf.mxu1 }
 0x4b4   : > { %v5767_v34 = vadd.f32 %v10428_v39, %v12617_v56  ;;  %v12662_v54 = vadd.f32 %v5975_v59, %v5764_v50 }
 0x4b5   : > { %v5700_v11 = vpop.f32.mrf.mxu0  ;;  %v6007_v27 = vpop.f32.mrf.mxu1 }
 0x4b6   : > { %v5765_v0 = vadd.f32 %v5700_v11, %v12619_v62  ;;  %v12665_v13 = vadd.f32 %v10464_v52, %v5767_v34 }
 0x4b7   : > { %v10431_v43 = vpop.f32.mrf.mxu0  ;;  %v10472_v26 = vpop.f32.mrf.mxu1 }
 0x4b8   : > { %v5770_v36 = vadd.f32 %v10431_v43, %v12621_v44  ;;  %v12668_v14 = vadd.f32 %v5978_v60, %v5765_v0 }
 0x4b9   : > { %v5713_v5 = vpop.f32.mrf.mxu0  ;;  %v6010_v55 = vpop.f32.mrf.mxu1 }
 0x4ba   : > { %v5768_v45 = vadd.f32 %v5713_v5, %v12623_v63  ;;  %v12671_v12 = vadd.f32 %v10467_v9, %v5770_v36 }
 0x4bb   : > { %v10432_v56 = vpop.f32.mrf.mxu0  ;;  %v10475_v48 = vpop.f32.mrf.mxu1 }
 0x4bc   : > { %v5771_v57 = vadd.f32 %v10432_v56, %v12625_v31  ;;  %v12674_v23 = vadd.f32 %v5991_v33, %v5768_v45 }
 0x4bd   : > { %v5716_v62 = vpop.f32.mrf.mxu0  ;;  %v6023_v35 = vpop.f32.mrf.mxu1 }
 0x4be   : > { %v5769_v37 = vadd.f32 %v5716_v62, %v12627_v42  ;;  %v12677_v49 = vadd.f32 %v10468_v40, %v5771_v57 }
 0x4bf   : > { %v10435_v44 = vpop.f32.mrf.mxu0  ;;  %v10476_v25 = vpop.f32.mrf.mxu1 }
 0x4c0   : > { %v5774_v41 = vadd.f32 %v10435_v44, %v12629_v38  ;;  %v12680_v58 = vadd.f32 %v5994_v32, %v5769_v37 }
 0x4c1   : > { %v5729_v63 = vpop.f32.mrf.mxu0  ;;  %v6026_v59 = vpop.f32.mrf.mxu1 }
 0x4c2   : > { %v5772_v2 = vadd.f32 %v5729_v63, %v12631_v4  ;;  %v6052_v52 = vadd.f32 %v10471_v15, %v5774_v41 }
 0x4c3   : > { %v10436_v31 = vpop.f32.mrf.mxu0  ;;  %v12683_v10 = vpop.f32.mrf.mxu1 }
 0x4c4   : > { %v5775_v51 = vadd.f32 %v10436_v31, %v12633_v20  ;;  %v6050_v60 = vadd.f32 %v6007_v27, %v5772_v2 }
 0x4c5   : > { %v5732_v42 = vpop.f32.mrf.mxu0  ;;  %v12686_v29 = vpop.f32.mrf.mxu1 }
 0x4c6   : > { %v5773_v19 = vadd.f32 %v5732_v42, %v12635_v30  ;;  %v6053_v9 = vadd.f32 %v10472_v26, %v5775_v51 }
 0x4c7   : > { %v10439_v38 = vpop.f32.mrf.mxu0  ;;  %v12689_v47 = vpop.f32.mrf.mxu1 }
 0x4c8   : > { %v5778_v17 = vadd.f32 %v10439_v38, %v12637_v1  ;;  %v6051_v33 = vadd.f32 %v6010_v55, %v5773_v19 }
 0x4c9   : > { %v5745_v4 = vpop.f32.mrf.mxu0  ;;  %v12692_v22 = vpop.f32.mrf.mxu1 }
 0x4ca   : > { %v5776_v61 = vadd.f32 %v5745_v4, %v12639_v3  ;;  %v6056_v40 = vadd.f32 %v10475_v48, %v5778_v17 }
 0x4cb   : > { %v10440_v20 = vpop.f32.mrf.mxu0  ;;  %v12695_v7 = vpop.f32.mrf.mxu1 }
 0x4cc   : > { %v5779_v53 = vadd.f32 %v10440_v20, %v12641_v8  ;;  %v6054_v32 = vadd.f32 %v6023_v35, %v5776_v61 }
 0x4cd   : > { %v5748_v30 = vpop.f32.mrf.mxu0  ;;  %v12698_v50 = vpop.f32.mrf.mxu1 }
 0x4ce   : > { %v5777_v39 = vadd.f32 %v5748_v30, %v12643_v6  ;;  %v6057_v15 = vadd.f32 %v10476_v25, %v5779_v53 }
 0x4cf   : > { %v10495_v1 = vpop.f32.mrf.mxu0  ;;  %v12701_v34 = vpop.f32.mrf.mxu1 }
 0x4d0   : > { %v12704_v11 = vadd.f32 %v10495_v1, %v12647_v46  ;;  %v6055_v3 = vadd.f32 %v6026_v59, %v5777_v39 }
 0x4d1   : > { %v6237_v27 = vpop.f32.mrf.mxu0  ;;  %v12706_v0 = vpop.f32.mrf.mxu1 }
 0x4d2   : > { %v12709_v43 = vadd.f32 %v6237_v27, %v12650_v21 }
 0x4d3   : > { %v10496_v8 = vpop.f32.mrf.mxu0  ;;  %v12711_v26 = vpop.f32.mrf.mxu1 }
 0x4d4   : > { %v12714_v36 = vadd.f32 %v10496_v8, %v12653_v28 }
 0x4d5   : > { %v6240_v6 = vpop.f32.mrf.mxu0  ;;  %v12716_v5 = vpop.f32.mrf.mxu1 }
 0x4d6   : > { %v12719_v55 = vadd.f32 %v6240_v6, %v12656_v16 }
 0x4d7   : > { %v10499_v46 = vpop.f32.mrf.mxu0  ;;  %v12721_v45 = vpop.f32.mrf.mxu1 }
 0x4d8   : > { %v12724_v56 = vadd.f32 %v10499_v46, %v12659_v18 }
 0x4d9   : > { %v6253_v21 = vpop.f32.mrf.mxu0  ;;  %v12726_v48 = vpop.f32.mrf.mxu1 }
 0x4da   : > { %v12729_v57 = vadd.f32 %v6253_v21, %v12662_v54 }
 0x4db   : > { %v10500_v28 = vpop.f32.mrf.mxu0  ;;  %v12731_v62 = vpop.f32.mrf.mxu1 }
 0x4dc   : > { %v12734_v35 = vadd.f32 %v10500_v28, %v12665_v13 }
 0x4dd   : > { %v6256_v16 = vpop.f32.mrf.mxu0  ;;  %v12736_v37 = vpop.f32.mrf.mxu1 }
 0x4de   : > { %v12739_v44 = vadd.f32 %v6256_v16, %v12668_v14 }
 0x4df   : > { %v10503_v18 = vpop.f32.mrf.mxu0  ;;  %v12741_v25 = vpop.f32.mrf.mxu1 }
 0x4e0   : > { %13207 = vst [vmem:[#allocation12_spill] sm:$0xff] %v12741_v25  ;;  %v12744_v41 = vadd.f32 %v10503_v18, %v12671_v12 }
 0x4e1   : > { %v6269_v54 = vpop.f32.mrf.mxu0  ;;  %v12749_v2 = vpop.f32.mrf.mxu1 }
 0x4e2   : > { %v12747_v63 = vadd.f32 %v6269_v54, %v12674_v23  ;;  %13208 = vst [vmem:[#allocation13_spill] sm:$0xff] %v12749_v2 }
 0x4e3   : > { %v10504_v59 = vpop.f32.mrf.mxu0  ;;  %v12757_v42 = vpop.f32.mrf.mxu1 }
 0x4e4   : > { %v12752_v13 = vadd.f32 %v10504_v59, %v12677_v49  ;;  %13209 = vst [vmem:[#allocation14_spill] sm:$0xff] %v12757_v42 }
 0x4e5   : > { %v6272_v31 = vpop.f32.mrf.mxu0  ;;  %v12763_v17 = vpop.f32.mrf.mxu1 }
 0x4e6   : > { %v12755_v14 = vadd.f32 %v6272_v31, %v12680_v58  ;;  %13210 = vst [vmem:[#allocation15_spill] sm:$0xff] %v12763_v17 }
 0x4e7   : > { %v10507_v51 = vpop.f32.mrf.mxu0  ;;  %v12769_v53 = vpop.f32.mrf.mxu1 }
 0x4e8   : > { %v12759_v19 = vadd.f32 %v10507_v51, %v6052_v52  ;;  %13213 = vst [vmem:[#allocation18_spill] sm:$0xff] %v12769_v53  ;;  %v7542_v51 = vlaneseq }
 0x4e9   : > { %v6285_v12 = vpop.f32.mrf.mxu0  ;;  %v12775_v52 = vpop.f32.mrf.mxu1 }
 0x4ea   : > { %v12761_v38 = vadd.f32 %v6285_v12, %v6050_v60  ;;  %13216 = vst [vmem:[#allocation21_spill] sm:$0xff] %v12775_v52 }
 0x4eb   : > { %v10508_v23 = vpop.f32.mrf.mxu0 }
 0x4ec   : > { %v12765_v4 = vadd.f32 %v10508_v23, %v6053_v9  ;;  %v10603_v9 = vpop.f32.mrf.mxu1 }
 0x4ed   : > { %v6288_v61 = vpop.f32.mrf.mxu0 }
 0x4ee   : > { %13211 = vst [vmem:[#allocation16_spill] sm:$0xff] %v12765_v4  ;;  %v12767_v49 = vadd.f32 %v6288_v61, %v6051_v33  ;;  %v12781_v46 = vpop.f32.mrf.mxu1 }
 0x4ef   : > { %v10511_v20 = vpop.f32.mrf.mxu0 }
 0x4f0   : > { %13212 = vst [vmem:[#allocation17_spill] sm:$0xff] %v12767_v49  ;;  %v12771_v58 = vadd.f32 %v10511_v20, %v6056_v40  ;;  %v12783_v40 = vpop.f32.mrf.mxu1  ;;  %v12805_v20 = vshrl.u32 %v7542_v51, 7 }
 0x4f1   : > { %v6301_v30 = vpop.f32.mrf.mxu0 }
 0x4f2   : > { %13214 = vst [vmem:[#allocation19_spill] sm:$0xff] %v12771_v58  ;;  %v12773_v39 = vadd.f32 %v6301_v30, %v6054_v32  ;;  %v12787_v18 = vpop.f32.mrf.mxu1  ;;  %v7546_v24 = vadd.s32 24, %v12805_v20  ;;  %v7544_v52 = vadd.s32 8, %v12805_v20  ;;  %v7550_v51 = vadd.s32 56, %v12805_v20 }
 0x4f3   : > { %v10512_v60 = vpop.f32.mrf.mxu0  ;;  %v6596_v58 = vadd.f32 %v12683_v10, %v12704_v11  ;;  %v6597_v10 = vadd.f32 %v12689_v47, %v12714_v36  ;;  %v6600_v47 = vadd.f32 %v12695_v7, %v12724_v56 }
 0x4f4   : > { %13215 = vst [vmem:[#allocation20_spill] sm:$0xff] %v12773_v39  ;;  %v12777_v1 = vadd.f32 %v10512_v60, %v6057_v15  ;;  %v7588_v17 = vand.u32 15, %v7546_v24  ;;  %v7574_v39 = vand.u32 15, %v7544_v52  ;;  %v6594_v52 = vadd.f32 %v12686_v29, %v12709_v43 }
 0x4f5   : > { %v6304_v27 = vpop.f32.mrf.mxu0 }
 0x4f6   : > { %13217 = vst [vmem:[#allocation22_spill] sm:$0xff] %v12777_v1  ;;  %v12779_v8 = vadd.f32 %v6304_v27, %v6055_v3  ;;  %v12793_v3 = vpop.f32.mrf.mxu1  ;;  %vm7806_vm5 = vcmp.lt.s32.totalorder %v7588_v17, 10  ;;  %vm7804_vm6 = vcmp.lt.s32.totalorder %v7574_v39, 10  ;;  %v13227_v17 = vmov 0.0  }
 0x4f7   : > { %v10567_v6 = vpop.f32.mrf.mxu0  ;;  %v12847_v29 = vsel %vm7804_vm6, 1.0, %v13227_v17  ;;  %v6595_v39 = vadd.f32 %v12692_v22, %v12719_v55  ;;  %v12873_v55 = vadd.s32 120, %v12805_v20 }
 0x4f8   : > { %13218 = vst [vmem:[#allocation23_spill] sm:$0xff] %v12779_v8  ;;  %v12799_v12 = vpop.f32.mrf.mxu1  ;;  %v6874_v24 = vadd.f32 %v10567_v6, %v6596_v58  ;;  %v12844_v58 = vsel %vm7806_vm5, 1.0, %v13227_v17 }
 0x4f9   : > { %v6793_v33 = vpop.f32.mrf.mxu0 }
 0x4fa   : > { %v12807_v30 = vpop.f32.mrf.mxu1  ;;  %v6872_v25 = vadd.f32 %v6793_v33, %v6594_v52  ;;  %v7152_v6 = vadd.f32 %v10603_v9, %v6874_v24 }
 0x4fb   : > { %v10568_v21 = vpop.f32.mrf.mxu0 }
 0x4fc   : > { %v12815_v8 = vpop.f32.mrf.mxu1  ;;  %v6875_v43 = vadd.f32 %v10568_v21, %v6597_v10 }
 0x4fd   : > { %v6796_v28 = vpop.f32.mrf.mxu0 }
 0x4fe   : > { %v6873_v7 = vadd.f32 %v6796_v28, %v6595_v39 }
 0x4ff   : > { %v10571_v16 = vpop.f32.mrf.mxu0 }
 0x500   : > { %v7151_v33 = vadd.f32 %v12787_v18, %v6873_v7  ;;  %v6604_v7 = vadd.f32 %v12711_v26, %v12744_v41  ;;  %v6602_v26 = vadd.f32 %v12716_v5, %v12747_v63  ;;  %v6605_v41 = vadd.f32 %v12721_v45, %v12752_v13 }
 0x501   : > { %v12785_v32 = vpop.f32.mrf.mxu0  ;;  %v6608_v5 = vadd.f32 %v12731_v62, %v12759_v19  ;;  %v6606_v45 = vadd.f32 %v12736_v37, %v12761_v38  ;;  %v13239_v62 = vld [vmem:[#allocation13_spill] sm:$0xff] }
 0x503   : > { %v12789_v54 = vpop.f32.mrf.mxu0 }
 0x505   : > { %v12791_v15 = vpop.f32.mrf.mxu0 }
 0x507   : > { %v12795_v59 = vpop.f32.mrf.mxu0 }
 0x509   : > { %v12797_v31 = vpop.f32.mrf.mxu0 }
 0x50b   : > { %v12801_v23 = vpop.f32.mrf.mxu0 }
 0x50c   : > { %13219 = vst [vmem:[#allocation24_spill] sm:$0xff] %v12801_v23  ;;  %v7552_v23 = vadd.s32 72, %v12805_v20 }
 0x50d   : > { %v12803_v61 = vpop.f32.mrf.mxu0 }
 0x50e   : > { %13220 = vst [vmem:[#allocation25_spill] sm:$0xff] %v12803_v61  ;;  %v12822_v61 = vpop.f32.mrf.mxu1  ;;  %v7630_v11 = vand.u32 15, %v7552_v23 }
 0x50f   : > { %v12809_v60 = vpop.f32.mrf.mxu0  ;;  %13225 = vst [vmem:[#allocation30_spill] sm:$0xff] %v12822_v61 }
 0x510   : > { %13221 = vst [vmem:[#allocation26_spill] sm:$0xff] %v12809_v60  ;;  %v7554_v60 = vadd.s32 88, %v12805_v20  ;;  %v12835_v61 = vpop.f32.mrf.mxu1  ;;  %vm12876_vm10 = vcmp.lt.s32.totalorder %v7630_v11, 10 }
 0x511   : > { %v12811_v27 = vpop.f32.mrf.mxu0  ;;  %v12914_v39 = vsel %vm12876_vm10, 1.0, %v13227_v17 }
 0x512   : > { %13222 = vst [vmem:[#allocation27_spill] sm:$0xff] %v12811_v27  ;;  %v7548_v27 = vadd.s32 40, %v12805_v20  ;;  %v7644_v49 = vand.u32 15, %v7554_v60  ;;  %v12857_v36 = vpop.f32.mrf.mxu1  ;;  %v12862_v60 = vld [vmem:[%s13185_s8] ss:$0 sm:$0xff] }
 0x513   : > { %v12817_v53 = vpop.f32.mrf.mxu0 }
 0x514   : > { %13223 = vst [vmem:[#allocation28_spill] sm:$0xff] %v12817_v53  ;;  %v7602_v2 = vand.u32 15, %v7548_v27  ;;  %vm12868_vm9 = vcmp.lt.s32.totalorder %v7644_v49, 10  ;;  %v6878_v27 = vadd.f32 %v10571_v16, %v6600_v47  ;;  %v12886_v49 = vld [vmem:[%s13186_s9] ss:$0 sm:$0xff]  ;;  %v12904_v52 = vpop.f32.mrf.mxu1  ;;  %v6601_v47 = vadd.f32 %v12701_v34, %v12734_v35 }
 0x515   : > { %v12819_v1 = vpop.f32.mrf.mxu0  ;;  %v12909_v11 = vsel %vm12868_vm9, 1.0, %v13227_v17 }
 0x516   : > { %13224 = vst [vmem:[#allocation29_spill] sm:$0xff] %v12819_v1  ;;  %v7616_v1 = vand.u32 15, %v7550_v51  ;;  %vm12864_vm8 = vcmp.lt.s32.totalorder %v7602_v2, 10  ;;  %v6598_v2 = vadd.f32 %v12698_v50, %v12729_v57  ;;  %v7153_v50 = vadd.f32 %v12783_v40, %v6875_v43  ;;  %v12940_v9 = vpop.f32.mrf.mxu1 }
 0x517   : > { %v12824_v42 = vpop.f32.mrf.mxu0  ;;  %v12901_v57 = vsel %vm12864_vm8, 1.0, %v13227_v17  ;;  %v7672_v40 = vand.u32 15, %v12873_v55  ;;  %v7156_v22 = vadd.f32 %v12793_v3, %v6878_v27 }
 0x518   : > { %13226 = vst [vmem:[#allocation31_spill] sm:$0xff] %v12824_v42  ;;  %vm12851_vm7 = vcmp.lt.s32.totalorder %v7616_v1, 10  ;;  %v7150_v1 = vadd.f32 %v12781_v46, %v6872_v25  ;;  %v12894_v25 = vadd.s32 104, %v12805_v20  ;;  %v6876_v24 = vadd.f32 %v12785_v32, %v6598_v2 }
 0x519   : > { %v12831_v53 = vpop.f32.mrf.mxu0  ;;  %v12891_v28 = vsel %vm12851_vm7, 1.0, %v13227_v17  ;;  %vm13058_vm12 = vcmp.lt.s32.totalorder %v7672_v40, 10 }
 0x51a   : > { %v7154_v27 = vadd.f32 %v12799_v12, %v6876_v24 }
 0x51b   : > { %v12837_v42 = vpop.f32.mrf.mxu0 }
 0x51d   : > { %v12841_v4 = vpop.f32.mrf.mxu0 }
 0x51f   : > { %v10639_v23 = vpop.f32.mrf.mxu0 }
 0x520   : > { %v7430_v56 = vadd.f32 %v10639_v23, %v7152_v6  ;;  %v6599_v23 = vadd.f32 %v12706_v0, %v12739_v44  ;;  %v6879_v0 = vadd.f32 %v12789_v54, %v6601_v47  ;;  %v13236_v47 = vld [vmem:[#allocation16_spill] sm:$0xff] }
 0x521   : > { %v7349_v51 = vpop.f32.mrf.mxu0 }
 0x522   : > { %v7457_v46 = vmul.f32 %v12862_v60, %v7430_v56  ;;  %v7428_v16 = vadd.f32 %v7349_v51, %v7150_v1  ;;  %v7658_v56 = vand.u32 15, %v12894_v25  ;;  %v6877_v44 = vadd.f32 %v12791_v15, %v6599_v23  ;;  %v13237_v23 = vld [vmem:[#allocation12_spill] sm:$0xff] }
 0x523   : > { %v10640_v10 = vpop.f32.mrf.mxu0  ;;  %v6603_v15 = vadd.f32 %v12726_v48, %v12755_v14  ;;  %v7157_v48 = vadd.f32 %v12807_v30, %v6879_v0  ;;  %v13240_v30 = vld [vmem:[#allocation30_spill] sm:$0xff] }
 0x524   : > { %v12918_v43 = vadd.f32 %v12886_v49, %v7457_v46  ;;  %v7455_v32 = vmul.f32 %v12862_v60, %v7428_v16  ;;  %v7431_v6 = vadd.f32 %v10640_v10, %v7153_v50  ;;  %v6882_v16 = vadd.f32 %v12795_v59, %v6604_v7 }
 0x525   : > { %v7352_v21 = vpop.f32.mrf.mxu0  ;;  %v6880_v59 = vadd.f32 %v12797_v31, %v6602_v26  ;;  %v7155_v31 = vadd.f32 %v12815_v8, %v6877_v44  ;;  %v13241_v8 = vld [vmem:[#allocation24_spill] sm:$0xff]  ;;  %vm13017_vm11 = vcmp.lt.s32.totalorder %v7658_v56, 10 }
 0x526   : > { %v7504_v1 = vmax.f32 %v12918_v43, 0.0  ;;  %v7482_v18 = vadd.f32 %v12886_v49, %v7455_v32  ;;  %v7458_v34 = vmul.f32 %v12862_v60, %v7431_v6  ;;  %v7429_v35 = vadd.f32 %v7352_v21, %v7151_v33  ;;  %v12959_v6 = vpop.f32.mrf.mxu1 }
 0x527   : > { %v10643_v3 = vpop.f32.mrf.mxu0  ;;  %v6609_v21 = vadd.f32 %v13237_v23, %v13236_v47  ;;  %v6883_v44 = vadd.f32 %v13241_v8, %v6605_v41  ;;  %v13246_v23 = vld [vmem:[#allocation27_spill] sm:$0xff] }
 0x528   : > { %7524 = vst [vmem:[%s12929_s16 + $0x10] sm:$0xff] %v7504_v1  ;;  %v7502_v2 = vmax.f32 %v7482_v18, 0.0  ;;  %v7485_v51 = vadd.f32 %v12886_v49, %v7458_v34  ;;  %v7456_v46 = vmul.f32 %v12862_v60, %v7429_v35  ;;  %v7434_v54 = vadd.f32 %v10643_v3, %v7156_v22  ;;  %v13238_v22 = vld [vmem:[#allocation17_spill] sm:$0xff]  ;;  %v10616_v3 = vpop.f32.mrf.mxu1 }
 0x529   : > { %v7365_v12 = vpop.f32.mrf.mxu0  ;;  %v6607_v19 = vadd.f32 %v13239_v62, %v13238_v22  ;;  %v7160_v18 = vadd.f32 %v13240_v30, %v6882_v16  ;;  %v7158_v16 = vadd.f32 %v12835_v61, %v6880_v59  ;;  %v6884_v22 = vadd.f32 %v13246_v23, %v6606_v45  ;;  %v13247_v62 = vld [vmem:[#allocation20_spill] sm:$0xff] }
 0x52a   : > { %7522 = vst [vmem:[%s12929_s16] sm:$0xff] %v7502_v2  ;;  %v7505_v50 = vmax.f32 %v7485_v51, 0.0  ;;  %v7483_v24 = vadd.f32 %v12886_v49, %v7456_v46  ;;  %v7461_v10 = vmul.f32 %v12862_v60, %v7434_v54  ;;  %v7432_v32 = vadd.f32 %v7365_v12, %v7154_v27  ;;  %v13242_v27 = vld [vmem:[#allocation19_spill] sm:$0xff]  ;;  %v13243_v51 = vld [vmem:[#allocation14_spill] sm:$0xff] }
 0x52b   : > { %v10644_v63 = vpop.f32.mrf.mxu0  ;;  %v6612_v46 = vadd.f32 %v13243_v51, %v13242_v27 }
 0x52c   : > { %7525 = vst [vmem:[%s12929_s16 + $0x18] sm:$0xff] %v7505_v50  ;;  %v7503_v13 = vmax.f32 %v7483_v24, 0.0  ;;  %v12968_v14 = vadd.f32 %v12886_v49, %v7461_v10  ;;  %v7459_v33 = vmul.f32 %v12862_v60, %v7432_v32  ;;  %v7435_v37 = vadd.f32 %v10644_v63, %v7157_v48  ;;  %v13244_v32 = vld [vmem:[#allocation25_spill] sm:$0xff]  ;;  %v13245_v48 = vld [vmem:[#allocation26_spill] sm:$0xff] }
 0x52d   : > { %v7368_v38 = vpop.f32.mrf.mxu0  ;;  %v6881_v41 = vadd.f32 %v13244_v32, %v6603_v15  ;;  %v6886_v63 = vadd.f32 %v13245_v48, %v6608_v5  ;;  %v7122_v15 = vpop.f32.mrf.mxu1  ;;  %v13248_v5 = vld [vmem:[#allocation15_spill] sm:$0xff] }
 0x52e   : > { %7523 = vst [vmem:[%s12929_s16 + $0x8] sm:$0xff] %v7503_v13  ;;  %v7904_v34 = vmul.f32 %v12847_v29, %v7503_v13  ;;  %v7508_v35 = vmax.f32 %v12968_v14, 0.0  ;;  %v7486_v0 = vadd.f32 %v12886_v49, %v7459_v33  ;;  %v7433_v7 = vadd.f32 %v7368_v38, %v7155_v31  ;;  %v13255_v48 = vld [vmem:[#allocation31_spill] sm:$0xff] }
 0x52f   : > { %v7462_v54 = vmul.f32 %v12862_v60, %v7435_v37  ;;  %v10647_v26 = vpop.f32.mrf.mxu0  ;;  %v7906_v13 = vmul.f32 %v12844_v58, %v7505_v50  ;;  %v6610_v58 = vadd.f32 %v13248_v5, %v13247_v62  ;;  %v7161_v37 = vadd.f32 %v12857_v36, %v6883_v44 }
 0x530   : > { %v7923_v12 = vadd.f32 %v7904_v34, %v7502_v2  ;;  %7528 = vst [vmem:[%s12929_s16 + $0x30] sm:$0xff] %v7508_v35  ;;  %v7506_v29 = vmax.f32 %v7486_v0, 0.0  ;;  %v7460_v24 = vmul.f32 %v12862_v60, %v7433_v7  ;;  %v7438_v10 = vadd.f32 %v10647_v26, %v7160_v18  ;;  %v13249_v34 = vld [vmem:[#allocation28_spill] sm:$0xff]  ;;  %v10619_v26 = vpop.f32.mrf.mxu1 }
 0x531   : > { %v7489_v33 = vadd.f32 %v12886_v49, %v7462_v54  ;;  %v7381_v31 = vpop.f32.mrf.mxu0  ;;  %v6887_v0 = vadd.f32 %v13249_v34, %v6609_v21  ;;  %v7159_v7 = vadd.f32 %v12904_v52, %v6881_v41  ;;  %v7164_v27 = vadd.f32 %v12940_v9, %v6886_v63  ;;  %v13252_v52 = vld [vmem:[#allocation22_spill] sm:$0xff] }
 0x532   : > { %7526 = vst [vmem:[%s12929_s16 + $0x20] sm:$0xff] %v7506_v29  ;;  %v7924_v61 = vadd.f32 %v7923_v12, %v7504_v1  ;;  %v7487_v2 = vadd.f32 %v12886_v49, %v7460_v24  ;;  %v7465_v59 = vmul.f32 %v12862_v60, %v7438_v10  ;;  %v7436_v47 = vadd.f32 %v7381_v31, %v7158_v16  ;;  %v13253_v16 = vld [vmem:[#allocation18_spill] sm:$0xff]  ;;  %v13254_v10 = vld [vmem:[#allocation29_spill] sm:$0xff] }
 0x533   : > { %v7509_v50 = vmax.f32 %v7489_v33, 0.0  ;;  %v10648_v38 = vpop.f32.mrf.mxu0  ;;  %v6613_v12 = vadd.f32 %v13253_v16, %v13252_v52  ;;  %v6885_v32 = vadd.f32 %v13254_v10, %v6607_v19  ;;  %v6890_v63 = vadd.f32 %v13255_v48, %v6612_v46  ;;  %v13256_v46 = vld [vmem:[#allocation23_spill] sm:$0xff] }
 0x534   : > { %v7925_v30 = vadd.f32 %v7924_v61, %v7906_v13  ;;  %v7507_v43 = vmax.f32 %v7487_v2, 0.0  ;;  %v13004_v1 = vadd.f32 %v12886_v49, %v7465_v59  ;;  %v7463_v18 = vmul.f32 %v12862_v60, %v7436_v47  ;;  %v7135_v47 = vpop.f32.mrf.mxu1 }
 0x535   : > { %7529 = vst [vmem:[%s12929_s16 + $0x38] sm:$0xff] %v7509_v50  ;;  %v7439_v45 = vadd.f32 %v10648_v38, %v7161_v37  ;;  %v7384_v8 = vpop.f32.mrf.mxu0  ;;  %v7165_v61 = vadd.f32 %v10616_v3, %v6887_v0  ;;  %v7910_v2 = vmul.f32 %v12891_v28, %v7509_v50  ;;  %v6888_v23 = vadd.f32 %v12831_v53, %v6610_v58 }
 0x536   : > { %v7926_v51 = vadd.f32 %v7925_v30, %v7506_v29  ;;  %7527 = vst [vmem:[%s12929_s16 + $0x28] sm:$0xff] %v7507_v43  ;;  %v7908_v36 = vmul.f32 %v12901_v57, %v7507_v43  ;;  %v7512_v44 = vmax.f32 %v13004_v1, 0.0  ;;  %v7490_v54 = vadd.f32 %v12886_v49, %v7463_v18 }
 0x537   : > { %v7466_v9 = vmul.f32 %v12862_v60, %v7439_v45  ;;  %v7437_v29 = vadd.f32 %v7384_v8, %v7159_v7  ;;  %v10651_v24 = vpop.f32.mrf.mxu0  ;;  %v7162_v57 = vadd.f32 %v12959_v6, %v6884_v22  ;;  %v13257_v22 = vld [vmem:[#allocation21_spill] sm:$0xff]  ;;  %v6891_v38 = vadd.f32 %v12837_v42, %v6613_v12  ;;  %v10620_v7 = vpop.f32.mrf.mxu1  ;;  %v11060_v12 = vld [vmem:[%s13189_s12 + $0x18] sm:$0xff]  }
 0x538   : > { %v7927_v41 = vadd.f32 %v7926_v51, %v7908_v36  ;;  %7532 = vst [vmem:[%s12929_s16 + $0x50] sm:$0xff] %v7512_v44  ;;  %v7510_v25 = vmax.f32 %v7490_v54, 0.0  ;;  %v7442_v56 = vadd.f32 %v10651_v24, %v7164_v27  ;;  %v6611_v62 = vadd.f32 %v13257_v22, %v13256_v46 }
 0x539   : > { %v7493_v13 = vadd.f32 %v12886_v49, %v7466_v9  ;;  %v7464_v33 = vmul.f32 %v12862_v60, %v7437_v29  ;;  %v7397_v31 = vpop.f32.mrf.mxu0  ;;  %v7163_v53 = vadd.f32 %v7122_v15, %v6885_v32  ;;  %v7168_v43 = vadd.f32 %v10619_v26, %v6890_v63  ;;  %v7138_v32 = vpop.f32.mrf.mxu1 }
 0x53a   : > { %7530 = vst [vmem:[%s12929_s16 + $0x40] sm:$0xff] %v7510_v25  ;;  %v7928_v6 = vadd.f32 %v7927_v41, %v7508_v35  ;;  %v7469_v19 = vmul.f32 %v12862_v60, %v7442_v56  ;;  %v7440_v59 = vadd.f32 %v7397_v31, %v7162_v57  ;;  %v7166_v51 = vadd.f32 %v7135_v47, %v6888_v23 }
 0x53b   : > { %v7513_v5 = vmax.f32 %v7493_v13, 0.0  ;;  %v7491_v37 = vadd.f32 %v12886_v49, %v7464_v33  ;;  %v10652_v3 = vpop.f32.mrf.mxu0  ;;  %v7560_v36 = vadd.s32 136, %v12805_v20  ;;  %v6889_v15 = vadd.f32 %v12841_v4, %v6611_v62 }
 0x53c   : > { %v7929_v28 = vadd.f32 %v7928_v6, %v7910_v2  ;;  %v13042_v50 = vadd.f32 %v12886_v49, %v7469_v19  ;;  %v7467_v14 = vmul.f32 %v12862_v60, %v7440_v59  ;;  %v7443_v35 = vadd.f32 %v10652_v3, %v7165_v61 }
 0x53d   : > { %7533 = vst [vmem:[%s12929_s16 + $0x58] sm:$0xff] %v7513_v5  ;;  %v7511_v30 = vmax.f32 %v7491_v37, 0.0  ;;  %v7400_v58 = vpop.f32.mrf.mxu0  ;;  %v9015_v9 = vsel %vm13017_vm11, 1.0, %v13227_v17  ;;  %v7169_v10 = vadd.f32 %v10620_v7, %v6891_v38  ;;  %v7914_v55 = vmul.f32 %v12909_v11, %v7513_v5 }
 0x53e   : > { %v7930_v18 = vadd.f32 %v7929_v28, %v7510_v25  ;;  %v7516_v34 = vmax.f32 %v13042_v50, 0.0  ;;  %v7494_v0 = vadd.f32 %v12886_v49, %v7467_v14  ;;  %v7470_v45 = vmul.f32 %v12862_v60, %v7443_v35 }
 0x53f   : > { %7531 = vst [vmem:[%s12929_s16 + $0x48] sm:$0xff] %v7511_v30  ;;  %v7912_v8 = vmul.f32 %v12914_v39, %v7511_v30  ;;  %v7441_v27 = vadd.f32 %v7400_v58, %v7163_v53  ;;  %v10655_v42 = vpop.f32.mrf.mxu0  ;;  %v7686_v56 = vand.u32 15, %v7560_v36  ;;  %v7167_v13 = vadd.f32 %v7138_v32, %v6889_v15  ;;  %v11058_v36 = vld [vmem:[%s13189_s12 + $0x28] sm:$0xff]   ;;  %v7961_v32 = vld [vmem:[%s13187_s10] sm:$0x1] }
 0x540   : > { %7536 = vst [vmem:[%s12929_s16 + $0x70] sm:$0xff] %v7516_v34  ;;  %v7514_v54 = vmax.f32 %v7494_v0, 0.0  ;;  %v7497_v26 = vadd.f32 %v12886_v49, %v7470_v45  ;;  %v7446_v52 = vadd.f32 %v10655_v42, %v7168_v43  ;;  %v7562_v11 = vadd.s32 152, %v12805_v20  ;;  %v11056_v42 = vld [vmem:[%s13189_s12 + $0x38] sm:$0xff]  }
 0x541   : > { %v7931_v16 = vadd.f32 %v7930_v18, %v7912_v8  ;;  %v7468_v39 = vmul.f32 %v12862_v60, %v7441_v27  ;;  %v7413_v4 = vpop.f32.mrf.mxu0  ;;  %v9016_v59 = vsel %vm13058_vm12, 1.0, %v13227_v17  ;;  %vm7820_vm13 = vcmp.lt.s32.totalorder %v7686_v56, 10  ;;  %10658 = vmatpush3.bf16.msra.mxu1 %v11056_v42 }
 0x542   : > { %7534 = vst [vmem:[%s12929_s16 + $0x60] sm:$0xff] %v7514_v54  ;;  %v7517_v29 = vmax.f32 %v7497_v26, 0.0  ;;  %v7473_v24 = vmul.f32 %v12862_v60, %v7446_v52  ;;  %v7444_v57 = vadd.f32 %v7413_v4, %v7166_v51  ;;  %v7700_v62 = vand.u32 15, %v7562_v11  ;;  %v11057_v51 = vld [vmem:[%s13189_s12 + $0x30] sm:$0xff]   ;;  %10659 = vmatprep.subr.bf16.mxu1 %v13227_v17  ;;  %v11063_v4 = vld [vmem:[%s13189_s12] sm:$0xff]  }
 0x543   : > { %v7932_v40 = vadd.f32 %v7931_v16, %v7512_v44  ;;  %v7495_v41 = vadd.f32 %v12886_v49, %v7468_v39  ;;  %v10656_v25 = vpop.f32.mrf.mxu0  ;;  %v9017_v50 = vsel %vm7820_vm13, 1.0, %v13227_v17  ;;  %v11059_v16 = vld [vmem:[%s13189_s12 + $0x20] sm:$0xff]   ;;  %v11061_v39 = vld [vmem:[%s13189_s12 + $0x10] sm:$0xff]  }
 0x544   : > { %7537 = vst [vmem:[%s12929_s16 + $0x78] sm:$0xff] %v7517_v29  ;;  %v7500_v21 = vadd.f32 %v12886_v49, %v7473_v24  ;;  %v7471_v48 = vmul.f32 %v12862_v60, %v7444_v57  ;;  %v7447_v63 = vadd.f32 %v10656_v25, %v7169_v10  ;;  %v7918_v3 = vmul.f32 %v9016_v59, %v7517_v29 }
 0x545   : > { %v7933_v33 = vadd.f32 %v7932_v40, %v7914_v55  ;;  %v7515_v31 = vmax.f32 %v7495_v41, 0.0  ;;  %v7416_v61 = vpop.f32.mrf.mxu0  ;;  %vm7822_vm14 = vcmp.lt.s32.totalorder %v7700_v62, 10  ;;  %10660 = vmatpush3.bf16.msra.mxu1 %v11057_v51  ;;  %v7963_v40 = vld [vmem:[%s13188_s11] sm:$0x1] }
 0x546   : > { %v7520_v1 = vmax.f32 %v7500_v21, 0.0  ;;  %v7498_v44 = vadd.f32 %v12886_v49, %v7471_v48  ;;  %v7474_v2 = vmul.f32 %v12862_v60, %v7447_v63  ;;  %v7445_v6 = vadd.f32 %v7416_v61, %v7167_v13  ;;  %10661 = vmatprep.subr.bf16.mxu1 %v13227_v17 }
 0x547   : > { %v7934_v19 = vadd.f32 %v7933_v33, %v7514_v54  ;;  %7535 = vst [vmem:[%s12929_s16 + $0x68] sm:$0xff] %v7515_v31  ;;  %v7916_v47 = vmul.f32 %v9015_v9, %v7515_v31  ;;  %v11062_v9 = vld [vmem:[%s13189_s12 + $0x8] sm:$0xff]  }
 0x548   : > { %7540 = vst [vmem:[%s12929_s16 + $0x90] sm:$0xff] %v7520_v1  ;;  %v7518_v23 = vmax.f32 %v7498_v44, 0.0  ;;  %v7501_v20 = vadd.f32 %v12886_v49, %v7474_v2  ;;  %v7472_v46 = vmul.f32 %v12862_v60, %v7445_v6  ;;  %v9018_v60 = vsel %vm7822_vm14, 1.0, %v13227_v17 }
 0x549   : > { %v7935_v22 = vadd.f32 %v7934_v19, %v7916_v47  ;;  %10662 = vmatpush3.bf16.msra.mxu1 %v11058_v36 }
 0x54a   : > { %7538 = vst [vmem:[%s12929_s16 + $0x80] sm:$0xff] %v7518_v23  ;;  %v7521_v5 = vmax.f32 %v7501_v20, 0.0  ;;  %v7499_v37 = vadd.f32 %v12886_v49, %v7472_v46  ;;  %10663 = vmatprep.subr.bf16.mxu1 %v13227_v17 }
 0x54b   : > { %v7936_v28 = vadd.f32 %v7935_v22, %v7516_v34 }
 0x54c   : > { %7541 = vst [vmem:[%s12929_s16 + $0x98] sm:$0xff] %v7521_v5  ;;  %v7519_v14 = vmax.f32 %v7499_v37, 0.0  ;;  %v7922_v58 = vmul.f32 %v9018_v60, %v7521_v5 }
 0x54d   : > { %v7937_v35 = vadd.f32 %v7936_v28, %v7918_v3  ;;  %10664 = vmatpush3.bf16.msra.mxu1 %v11059_v16 }
 0x54e   : > { %7539 = vst [vmem:[%s12929_s16 + $0x88] sm:$0xff] %v7519_v14  ;;  %v7920_v38 = vmul.f32 %v9017_v50, %v7519_v14  ;;  %10665 = vmatprep.subr.bf16.mxu1 %v13227_v17 }
 0x54f   : > { %v7938_v30 = vadd.f32 %v7937_v35, %v7518_v23 }
 0x551   : > { %v7939_v53 = vadd.f32 %v7938_v30, %v7920_v38  ;;  %10666 = vmatpush3.bf16.msra.mxu1 %v11060_v12 }
 0x552   : > { %10667 = vmatprep.subr.bf16.mxu1 %v13227_v17 }
 0x553   : > { %v7940_v43 = vadd.f32 %v7939_v53, %v7520_v1 }
 0x555   : > { %v7941_v18 = vadd.f32 %v7940_v43, %v7922_v58  ;;  %10668 = vmatpush3.bf16.msra.mxu1 %v11061_v39 }
 0x556   : > { %10669 = vmatprep.subr.bf16.mxu1 %v13227_v17 }
 0x557   : > { %v7942_v0 = vrot.slane %v7941_v18, 4 }
 0x559   : > { %v7943_v45 = vadd.f32 %v7942_v0, %v7941_v18  ;;  %10670 = vmatpush3.bf16.msra.mxu1 %v11062_v9 }
 0x55a   : > { %10671 = vmatprep.subr.bf16.mxu1 %v13227_v17  ;;  %v7982_v17 = vld [vmem:[%s13190_s13] sm:$0x1] }
 0x55b   : > { %v7944_v49 = vrot.slane %v7943_v45, 2 }
 0x55d   : > { %v7945_v7 = vadd.f32 %v7944_v49, %v7943_v45  ;;  %10672 = vmatpush3.bf16.msra.mxu1 %v11063_v4 }
 0x55f   : > { %v7946_v34 = vrot.slane %v7945_v7, 1 }
 0x561   : > { %v7947_v8 = vadd.f32 %v7946_v34, %v7945_v7 }
 0x563   : > { %v7948_v27 = vmul.f32 0.01, %v7947_v8 }
 0x565   : > { %7949 = vadd.xlane.f32.xlu0 %v7948_v27 }
 0x5ee   : > { %v7950_v15 = vpop.xlane.xlu0 %7949 }
 0x5ef   : > { %v7952_v54 = vmul.f32 0.0078125, %v7950_v15 }
 0x5f1   : > { %v7953_v26 = vsub.f32 %v7948_v27, %v7952_v54 }
 0x5f3   : > { %v7954_v52 = vmul.f32 %v7953_v26, %v7953_v26 }
 0x5f5   : > { %7955 = vadd.xlane.f32.xlu0 %v7954_v52 }
 0x67e   : > { %v7956_v29 = vpop.xlane.xlu0 %7955 }
 0x67f   : > { %v7957_v24 = vmul.f32 0.0078125, %v7956_v29 }
 0x681   : > { %v7958_v57 = vadd.f32 1e-05, %v7957_v24 }
 0x683   : > { %11064 = vrsqrt.f32 %v7958_v57 }
 0x690   : > { %v11065_v10 = vpop.eup %11064 }
 0x691   : > { %v7960_v55 = vmul.f32 %v11065_v10, %v7953_v26 }
 0x693   : > { %v7962_v41 = vmul.f32 %v7961_v32, %v7960_v55 }
 0x695   : > { %v7964_v25 = vadd.f32 %v7963_v40, %v7962_v41 }
 0x697   : > { %v7965_v56 = vpack.c.bf16 %v7964_v25, %v7964_v25 }
 0x699   : > { %10674 = vmatmul.mubr.bf16.vlgmr.msra.gmra.mxu1 %v7965_v56 }
 0x759   : > { %v8065_v21 = vpop.f32.mrf.mxu1 }
 0x75a   : > { %v8066_v48 = vadd.f32 %v8065_v21, %v7982_v17 }
 0x75b   : > { %v10675_v63 = vpop.f32.mrf.mxu1 }
 0x75c   : > { %8071 = vst [vmem:[%s487_s27] sm:$0x1] %v8066_v48 }
 0x75d   : > { %v8068_v13 = vpop.f32.mrf.mxu1 }
 0x75e   : > { %11081 = shalt.err (!%p11078_p3)
}
 0x75f   : > { %s11082_s20 = scalar_lea.hbm %s13136_s17, 16  ;;  %s11086_s16 = scalar_lea.hbm %s13191_s14, 32 }
 0x760   : > { %p11083_p4 = scmp.ne.s32.totalorder %s13136_s17, %s11082_s20  ;;  %p11087_p9 = scmp.lt.s32.totalorder %s13136_s17, %s13191_s14 }
 0x761   : > { %p11088_p10 = scmp.lt.s32.totalorder %s11086_s16, %s11082_s20 }
 0x762   : > { %p11084_p7 = pnand %p11083_p4, %p11251_p5 }
 0x763   : > { %p11089_p11 = por %p11088_p10, %p11087_p9 }
 0x764   : > { %p11085_p8 = pneg %p11084_p7 }
 0x766   : > { %p11090_p12 = pnand %p11089_p11, %p11085_p8 }
 0x768   : > { %11093 = shalt.err (!%p11090_p12)
}
 0x769   : > { %10679 = dma.vmem_to_hbm [thread:$0]  (%p11251_p5), %s13138_s0, 16, %s13136_s17, %s8073_s24   ;;  %v10676_v33 = vpop.f32.mrf.mxu1 }
 0x76a PF: > { %p10685_p13 = scmp.ge.s32.totalorder %s11128_s21, 2  ;;  %s8105_s25 = sand.u32 1, %s11116_s18  }
 0x76b   : > { %s8106_s1 = scalar_lea.sflag [#allocation7], %s8105_s25 }
 0x76c   : > { %p10682_p0 = pnand %p10685_p13, %p11255_p6 }
 0x76e   : > { %p10683_p1 = pneg %p10682_p0 }
 0x770   : > { %11111 = dma.done.wait (%p10683_p1), %s8106_s1, 16  }
 0x771   : > { %11113 = vsyncadd (%p10683_p1), %s8106_s1, 4294967280  ;;  %s13260_s21 = sld [smem:[#allocation10_spill]]  ;;  %s13263_s18 = smov %s11120_s19 }
 0x772   : > { %s13261_s26 = sld [smem:[#allocation9_spill]] }
 0x773   : > { %s13262_s20 = sld [smem:[#allocation11_spill]] }
 0x777   : > { %p26_p2 = scmp.ge.s32.totalorder %s13260_s21, 4  }
 0x778   : > { %s13264_s19 = smov %s13261_s26 }
 0x779   :  { %28 = sbr.rel (!%p26_p2) target bundleno = 6 (0x6), region = 143 }
 0x77e   :  { %8118 = vsyncpa [#allocation7], 1 }
 0x77f   :  { %8120 = vsyncpa [#allocation7 + $0x1], 1 }

</bundles_post_ra>
